<compile_context>
chip_gen: v7x
topology: tpu7x:2x2x1
jax: 0.10.0
libtpu: 0.0.40
codegen_flags: <defaults>
</compile_context>

<pallas_src>
import functools

import jax
import jax.numpy as jnp
import numpy as np
from jax.experimental import pallas as pl
from jax.experimental.pallas import tpu as pltpu


# ----------------------------------------------------------------------------
# Fused kernel: dwconv3x3+BN (q/k/v lane-fused) + cls concat + block-diag QKV
# projection + batched multi-head softmax attention + lane-dense out projection
# ----------------------------------------------------------------------------
def _fused_attention_kernel(x_ref, wconv_ref, bnscale_ref, bnshift_ref,
                            wqkv_ref, wproj_ref, bproj_ref, o_ref,
                            xpad_ref, *, H, W, num_heads, head_dim, C_out,
                            with_cls_token):
    # x_ref      : [1, T, C_in]          tokens of this batch element
    # wconv_ref  : [9, 3*C_in]           flat depthwise taps, q|k|v on lanes
    # bnscale_ref/bnshift_ref : [1, 3*C_in]  fused eval-mode BN affine, q|k|v
    # wqkv_ref   : [3*C_in, 3*C_out]     block-diagonal q/k/v weights (wq scaled)
    # wproj_ref  : [C_out, Npad], bproj_ref : [1, Npad]   (lane-dense, padded)
    # o_ref      : [1, T, Npad]
    # xpad_ref   : VMEM scratch [H+2, Wp, 3*C_in] (zero-bordered spatial buffer)
    C_in = x_ref.shape[-1]
    C3 = 3 * C_in
    T = x_ref.shape[1]
    Wp = xpad_ref.shape[1]

    x = x_ref[0].astype(jnp.float32)                       # [T, C_in]
    if with_cls_token:
        cls_tok = x[0:1, :]                                # [1, C_in]
        xsp = x[1:, :].reshape(H, W, C_in)                 # [H, W, C_in]
    else:
        cls_tok = None
        xsp = x.reshape(H, W, C_in)

    # Replicate channels across lanes once so all three branches share one pass.
    x3 = jnp.concatenate([xsp, xsp, xsp], axis=-1)         # [H, W, 3*C_in]

    # Zero only the padded border (the interior is fully overwritten each step;
    # this runs every grid step so each core's scratch is always valid).
    xpad_ref[0:1, :, :] = jnp.zeros((1, Wp, C3), jnp.float32)
    xpad_ref[H + 1:H + 2, :, :] = jnp.zeros((1, Wp, C3), jnp.float32)
    xpad_ref[:, 0:1, :] = jnp.zeros((H + 2, 1, C3), jnp.float32)
    xpad_ref[:, W + 1:, :] = jnp.zeros((H + 2, Wp - (W + 1), C3), jnp.float32)
    xpad_ref[1:H + 1, 1:W + 1, :] = x3

    # ---- lane-fused depthwise 3x3 conv + BN (q, k, v in one pass) ----
    taps = wconv_ref[...].astype(jnp.float32)              # [9, 3*C_in], hoisted
    bn_scale = bnscale_ref[...].astype(jnp.float32)        # [1, 3*C_in]
    bn_shift = bnshift_ref[...].astype(jnp.float32)        # [1, 3*C_in]

    acc = jnp.zeros((H, W, C3), jnp.float32)
    for di in range(3):
        for dj in range(3):
            t = 3 * di + dj
            acc = acc + xpad_ref[di:di + H, dj:dj + W, :] * taps[t:t + 1, :]
    y3 = acc * bn_scale + bn_shift                         # [H, W, 3*C_in]
    yflat = y3.reshape(H * W, C3)

    if with_cls_token:
        cls3 = jnp.concatenate([cls_tok, cls_tok, cls_tok], axis=-1)   # [1, 3*C_in]
        tok3 = jnp.concatenate([cls3, yflat], axis=0)                  # [T, 3*C_in]
    else:
        tok3 = yflat

    # ---- single block-diagonal QKV projection (scale folded into wq block) ----
    qkv = jnp.dot(tok3, wqkv_ref[...].astype(jnp.float32),
                  preferred_element_type=jnp.float32)       # [T, 3*C_out]
    q = qkv[:, 0:C_out]
    k = qkv[:, C_out:2 * C_out]
    v = qkv[:, 2 * C_out:3 * C_out]

    # ---- batched multi-head softmax attention ----
    nh, hd = num_heads, head_dim
    qh = jnp.stack([q[:, i * hd:(i + 1) * hd] for i in range(nh)], axis=0)  # [nh,T,hd]
    kh = jnp.stack([k[:, i * hd:(i + 1) * hd] for i in range(nh)], axis=0)
    vh = jnp.stack([v[:, i * hd:(i + 1) * hd] for i in range(nh)], axis=0)

    s = jnp.einsum('hqd,hkd->hqk', qh, kh,
                   preferred_element_type=jnp.float32)       # [nh, T, T]
    s = s - jnp.max(s, axis=-1, keepdims=True)
    p = jnp.exp(s)
    denom = jnp.sum(p, axis=-1, keepdims=True)
    r = pl.reciprocal(denom, approx=True)
    r = r * (2.0 - denom * r)          # one Newton step: rel-err ~1e-7, EUP+VALU
    p = p * r
    oh = jnp.einsum('hqk,hkd->hqd', p, vh,
                    preferred_element_type=jnp.float32)      # [nh, T, hd]
    ocat = jnp.concatenate([oh[i] for i in range(nh)], axis=-1)   # [T, C_out]

    # ---- lane-dense output projection (Npad=128 columns, unmasked store) ----
    out = jnp.dot(ocat, wproj_ref[...].astype(jnp.float32),
                  preferred_element_type=jnp.float32) + bproj_ref[...].astype(jnp.float32)
    o_ref[0] = out.astype(o_ref.dtype)                      # [T, Npad]


# ----------------------------------------------------------------------------
# Full module forward: single fused pallas_call
# ----------------------------------------------------------------------------
def attention_forward(x, h, w, params, num_heads, with_cls_token=True):
    B, T, C_in = x.shape
    C_out = params["wq"].shape[1]
    head_dim = C_out // num_heads
    scale = C_out ** (-0.5)             # matches `self.scale = dim_out ** -0.5`
    C3_in, C3_out = 3 * C_in, 3 * C_out
    N_pad = ((C_out + 127) // 128) * 128

    # Lane-fused conv/BN parameters: q|k|v concatenated on the channel (lane) axis.
    wconv3 = jnp.concatenate([params["conv_q"].reshape(9, C_in),
                              params["conv_k"].reshape(9, C_in),
                              params["conv_v"].reshape(9, C_in)], axis=-1)   # [9, 3*C_in]
    bn_scale3 = jnp.concatenate([params["bn_scale_q"], params["bn_scale_k"],
                                 params["bn_scale_v"]], axis=-1)             # [1, 3*C_in]
    bn_shift3 = jnp.concatenate([params["bn_shift_q"], params["bn_shift_k"],
                                 params["bn_shift_v"]], axis=-1)             # [1, 3*C_in]

    # Block-diagonal QKV weight (attention scale folded into the q block).
    wqkv = jnp.zeros((C3_in, C3_out), jnp.float32)
    wqkv = wqkv.at[:C_in, :C_out].set(params["wq"] * scale)
    wqkv = wqkv.at[C_in:2 * C_in, C_out:2 * C_out].set(params["wk"])
    wqkv = wqkv.at[2 * C_in:, 2 * C_out:].set(params["wv"])

    # Lane-dense output projection: pad columns to 128, slice back afterwards.
    wproj_pad = jnp.zeros((C_out, N_pad), jnp.float32).at[:, :C_out].set(params["wproj"])
    bproj_pad = jnp.zeros((1, N_pad), jnp.float32).at[:, :C_out].set(
        params["bproj"].reshape(1, C_out))

    wp_pad = ((w + 2 + 7) // 8) * 8     # pad scratch's sublane dim to a multiple of 8

    # TODO(synk): for single-TC chips (v5e/v6e) fold several batch elements into
    # one grid step to amortize the ~0.35us/step pipeline overhead; for real CvT
    # stage shapes (T~3137) switch the per-head [T,T] score materialization to a
    # flash-style q/KV-tiled variant with bf16 matmul operands and an explicit
    # vmem_limit_bytes (required on v7x's 64 MiB VMEM).
    kernel = functools.partial(_fused_attention_kernel, H=h, W=w,
                               num_heads=num_heads, head_dim=head_dim,
                               C_out=C_out, with_cls_token=with_cls_token)
    out_pad = pl.pallas_call(
        kernel,
        out_shape=jax.ShapeDtypeStruct((B, T, N_pad), x.dtype),
        grid=(B,),
        in_specs=[
            pl.BlockSpec((1, T, C_in), lambda b: (b, 0, 0)),
            pl.BlockSpec((9, C3_in), lambda b: (0, 0)),
            pl.BlockSpec((1, C3_in), lambda b: (0, 0)),
            pl.BlockSpec((1, C3_in), lambda b: (0, 0)),
            pl.BlockSpec((C3_in, C3_out), lambda b: (0, 0)),
            pl.BlockSpec((C_out, N_pad), lambda b: (0, 0)),
            pl.BlockSpec((1, N_pad), lambda b: (0, 0)),
        ],
        out_specs=pl.BlockSpec((1, T, N_pad), lambda b: (b, 0, 0)),
        scratch_shapes=[pltpu.VMEM((h + 2, wp_pad, C3_in), jnp.float32)],
        compiler_params=pltpu.CompilerParams(
            dimension_semantics=("parallel",)),
    )(x, wconv3, bn_scale3, bn_shift3, wqkv, wproj_pad, bproj_pad)
    return out_pad[:, :, :C_out]


# ----------------------------------------------------------------------------
# Pure-JAX reference (for correctness check)
# ----------------------------------------------------------------------------
def ref_forward(x, h, w, params, num_heads):
    B, T, C_in = x.shape
    C_out = params["wq"].shape[1]
    scale = C_out ** (-0.5)
    cls_tok, xsp = x[:, :1], x[:, 1:]
    xn = xsp.reshape(B, h, w, C_in)

    def branch(name):
        xp = jnp.pad(xn, ((0, 0), (1, 1), (1, 1), (0, 0)))
        wc = params[f"conv_{name}"]
        out = jnp.zeros_like(xn)
        for di in range(3):
            for dj in range(3):
                out = out + xp[:, di:di + h, dj:dj + w, :] * wc[di, dj]
        out = out * params[f"bn_scale_{name}"][0] + params[f"bn_shift_{name}"][0]
        return jnp.concatenate([cls_tok, out.reshape(B, h * w, C_in)], axis=1)

    q_t, k_t, v_t = branch("q"), branch("k"), branch("v")
    d = C_out // num_heads

    def to_heads(t, wmat):
        y = t @ wmat
        return y.reshape(B, T, num_heads, d).transpose(0, 2, 1, 3)

    q, k, v = to_heads(q_t, params["wq"]), to_heads(k_t, params["wk"]), to_heads(v_t, params["wv"])
    s = jnp.einsum("bhld,bhtd->bhlt", q, k) * scale
    s = s - jnp.max(s, axis=-1, keepdims=True)
    p = jnp.exp(s)
    p = p / jnp.sum(p, axis=-1, keepdims=True)
    o = jnp.einsum("bhlt,bhtd->bhld", p, v)
    o = o.transpose(0, 2, 1, 3).reshape(B, T, C_out)
    return o @ params["wproj"] + params["bproj"]


# ----------------------------------------------------------------------------
def make_params(key, dim_in, dim_out, eps=1e-5):
    ks = jax.random.split(key, 16)
    params = {}
    i = 0
    for name in ("q", "k", "v"):
        params[f"conv_{name}"] = 0.1 * jax.random.normal(ks[i], (3, 3, dim_in), jnp.float32); i += 1
        gamma = 1.0 + 0.1 * jax.random.normal(ks[i], (1, dim_in), jnp.float32); i += 1
        beta = 0.1 * jax.random.normal(ks[i], (1, dim_in), jnp.float32); i += 1
        mean = 0.1 * jax.random.normal(ks[i], (1, dim_in), jnp.float32); i += 1
        var = jnp.abs(1.0 + 0.1 * jax.random.normal(ks[i], (1, dim_in), jnp.float32))
        bn_scale = gamma / jnp.sqrt(var + eps)
        params[f"bn_scale_{name}"] = bn_scale
        params[f"bn_shift_{name}"] = beta - mean * bn_scale
    # linear weights stored as [in, out] (PyTorch weight transposed); qkv_bias=False
    params["wq"] = 0.1 * jax.random.normal(ks[11], (dim_in, dim_out), jnp.float32)
    params["wk"] = 0.1 * jax.random.normal(ks[12], (dim_in, dim_out), jnp.float32)
    params["wv"] = 0.1 * jax.random.normal(ks[13], (dim_in, dim_out), jnp.float32)
    params["wproj"] = 0.1 * jax.random.normal(ks[14], (dim_out, dim_out), jnp.float32)
    params["bproj"] = 0.1 * jax.random.normal(ks[15], (dim_out,), jnp.float32)
    return params


if __name__ == "__main__":
    B, H, W = 2, 8, 8
    dim_in = dim_out = 32
    num_heads = 4
    T = 1 + H * W   # with_cls_token=True

    key = jax.random.PRNGKey(0)
    kx, kp = jax.random.split(key)
    x = jax.random.normal(kx, (B, T, dim_in), jnp.float32)
    params = make_params(kp, dim_in, dim_out)

    out = attention_forward(x, H, W, params, num_heads)
    out = jax.block_until_ready(out)

    ref = ref_forward(x, H, W, params, num_heads)
    np.testing.assert_allclose(np.asarray(out), np.asarray(ref), rtol=1e-4, atol=1e-4)
    assert out.shape == (B, T, dim_out)

    print("KERNEL_OK")
</pallas_src>

<mosaic_0001>
module attributes {stable_mosaic.version = 11 : i64} {
  func.func @_fused_attention_kernel(%arg0: i32, %arg1: memref<1x65x32xf32, #tpu.memory_space<vmem>>, %arg2: memref<9x96xf32, #tpu.memory_space<vmem>>, %arg3: memref<1x96xf32, #tpu.memory_space<vmem>>, %arg4: memref<1x96xf32, #tpu.memory_space<vmem>>, %arg5: memref<96x96xf32, #tpu.memory_space<vmem>>, %arg6: memref<32x128xf32, #tpu.memory_space<vmem>>, %arg7: memref<1x128xf32, #tpu.memory_space<vmem>>, %arg8: memref<1x65x128xf32, #tpu.memory_space<vmem>>, %arg9: memref<10x16x96xf32, #tpu.memory_space<vmem>>) attributes {dimension_semantics = [#tpu.dimension_semantics<parallel>], iteration_bounds = array<i64: 2>, scalar_prefetch = 0 : i64, scratch_operands = 1 : i64, tpu.core_type = #tpu.core_type<tc>, window_params = [{transform_indices = @transform_0, window_bounds = array<i64: 1, 65, 32>}, {pipeline_mode = #tpu.pipeline_mode<synchronous>, transform_indices = @transform_1, window_bounds = array<i64: 9, 96>}, {pipeline_mode = #tpu.pipeline_mode<synchronous>, transform_indices = @transform_2, window_bounds = array<i64: 1, 96>}, {pipeline_mode = #tpu.pipeline_mode<synchronous>, transform_indices = @transform_3, window_bounds = array<i64: 1, 96>}, {pipeline_mode = #tpu.pipeline_mode<synchronous>, transform_indices = @transform_4, window_bounds = array<i64: 96, 96>}, {pipeline_mode = #tpu.pipeline_mode<synchronous>, transform_indices = @transform_5, window_bounds = array<i64: 32, 128>}, {pipeline_mode = #tpu.pipeline_mode<synchronous>, transform_indices = @transform_6, window_bounds = array<i64: 1, 128>}, {transform_indices = @transform_7, window_bounds = array<i64: 1, 65, 128>}]} {
    %c0 = arith.constant 0 : index
    %c0_0 = arith.constant 0 : index
    %c0_1 = arith.constant 0 : index
    %0 = vector.load %arg1[%c0, %c0_0, %c0_1] : memref<1x65x32xf32, #tpu.memory_space<vmem>>, vector<1x65x32xf32>
    %1 = vector.shape_cast %0 : vector<1x65x32xf32> to vector<65x32xf32>
    %2 = vector.extract_strided_slice %1 {offsets = [0, 0], sizes = [1, 32], strides = [1, 1]} : vector<65x32xf32> to vector<1x32xf32>
    %3 = vector.extract_strided_slice %1 {offsets = [1, 0], sizes = [64, 32], strides = [1, 1]} : vector<65x32xf32> to vector<64x32xf32>
    %4 = vector.shape_cast %3 : vector<64x32xf32> to vector<8x8x32xf32>
    %5 = tpu.concatenate %4, %4, %4 in 2 : vector<8x8x32xf32>, vector<8x8x32xf32>, vector<8x8x32xf32> -> vector<8x8x96xf32>
    %cst = arith.constant 0.000000e+00 : f32
    %6 = vector.broadcast %cst : f32 to vector<1x16x96xf32>
    %c0_2 = arith.constant 0 : index
    %c0_3 = arith.constant 0 : index
    %c0_4 = arith.constant 0 : index
    %7 = vector.load %arg9[%c0_2, %c0_3, %c0_4] : memref<10x16x96xf32, #tpu.memory_space<vmem>>, vector<1x16x96xf32>
    tpu.vector_store %arg9[%c0_2, %c0_3, %c0_4], %6 {strides = array<i32>} : memref<10x16x96xf32, #tpu.memory_space<vmem>>, vector<1x16x96xf32>,
    %cst_5 = arith.constant 0.000000e+00 : f32
    %8 = vector.broadcast %cst_5 : f32 to vector<1x16x96xf32>
    %c9 = arith.constant 9 : index
    %c0_6 = arith.constant 0 : index
    %c0_7 = arith.constant 0 : index
    %9 = vector.load %arg9[%c9, %c0_6, %c0_7] : memref<10x16x96xf32, #tpu.memory_space<vmem>>, vector<1x16x96xf32>
    tpu.vector_store %arg9[%c9, %c0_6, %c0_7], %8 {strides = array<i32>} : memref<10x16x96xf32, #tpu.memory_space<vmem>>, vector<1x16x96xf32>,
    %cst_8 = arith.constant 0.000000e+00 : f32
    %10 = vector.broadcast %cst_8 : f32 to vector<10x1x96xf32>
    %c0_9 = arith.constant 0 : index
    %c0_10 = arith.constant 0 : index
    %c0_11 = arith.constant 0 : index
    %11 = vector.load %arg9[%c0_9, %c0_10, %c0_11] : memref<10x16x96xf32, #tpu.memory_space<vmem>>, vector<10x1x96xf32>
    tpu.vector_store %arg9[%c0_9, %c0_10, %c0_11], %10 {strides = array<i32>} : memref<10x16x96xf32, #tpu.memory_space<vmem>>, vector<10x1x96xf32>,
    %cst_12 = arith.constant 0.000000e+00 : f32
    %12 = vector.broadcast %cst_12 : f32 to vector<10x7x96xf32>
    %c0_13 = arith.constant 0 : index
    %c9_14 = arith.constant 9 : index
    %c0_15 = arith.constant 0 : index
    %13 = vector.load %arg9[%c0_13, %c9_14, %c0_15] : memref<10x16x96xf32, #tpu.memory_space<vmem>>, vector<10x7x96xf32>
    tpu.vector_store %arg9[%c0_13, %c9_14, %c0_15], %12 {strides = array<i32>} : memref<10x16x96xf32, #tpu.memory_space<vmem>>, vector<10x7x96xf32>,
    %c1 = arith.constant 1 : index
    %c1_16 = arith.constant 1 : index
    %c0_17 = arith.constant 0 : index
    %14 = vector.load %arg9[%c1, %c1_16, %c0_17] : memref<10x16x96xf32, #tpu.memory_space<vmem>>, vector<8x8x96xf32>
    tpu.vector_store %arg9[%c1, %c1_16, %c0_17], %5 {strides = array<i32>} : memref<10x16x96xf32, #tpu.memory_space<vmem>>, vector<8x8x96xf32>,
    %c0_18 = arith.constant 0 : index
    %c0_19 = arith.constant 0 : index
    %15 = vector.load %arg2[%c0_18, %c0_19] : memref<9x96xf32, #tpu.memory_space<vmem>>, vector<9x96xf32>
    %c0_20 = arith.constant 0 : index
    %c0_21 = arith.constant 0 : index
    %16 = vector.load %arg3[%c0_20, %c0_21] : memref<1x96xf32, #tpu.memory_space<vmem>>, vector<1x96xf32>
    %c0_22 = arith.constant 0 : index
    %c0_23 = arith.constant 0 : index
    %17 = vector.load %arg4[%c0_22, %c0_23] : memref<1x96xf32, #tpu.memory_space<vmem>>, vector<1x96xf32>
    %cst_24 = arith.constant 0.000000e+00 : f32
    %18 = vector.broadcast %cst_24 : f32 to vector<8x8x96xf32>
    %c0_25 = arith.constant 0 : index
    %c0_26 = arith.constant 0 : index
    %c0_27 = arith.constant 0 : index
    %19 = vector.load %arg9[%c0_25, %c0_26, %c0_27] : memref<10x16x96xf32, #tpu.memory_space<vmem>>, vector<8x8x96xf32>
    %20 = vector.extract_strided_slice %15 {offsets = [0, 0], sizes = [1, 96], strides = [1, 1]} : vector<9x96xf32> to vector<1x96xf32>
    %21 = vector.shape_cast %20 : vector<1x96xf32> to vector<1x1x96xf32>
    %22 = vector.broadcast %21 : vector<1x1x96xf32> to vector<8x8x96xf32>
    %23 = arith.mulf %19, %22 : vector<8x8x96xf32>
    %24 = arith.addf %18, %23 : vector<8x8x96xf32>
    %c0_28 = arith.constant 0 : index
    %c1_29 = arith.constant 1 : index
    %c0_30 = arith.constant 0 : index
    %25 = vector.load %arg9[%c0_28, %c1_29, %c0_30] : memref<10x16x96xf32, #tpu.memory_space<vmem>>, vector<8x8x96xf32>
    %26 = vector.extract_strided_slice %15 {offsets = [1, 0], sizes = [1, 96], strides = [1, 1]} : vector<9x96xf32> to vector<1x96xf32>
    %27 = vector.shape_cast %26 : vector<1x96xf32> to vector<1x1x96xf32>
    %28 = vector.broadcast %27 : vector<1x1x96xf32> to vector<8x8x96xf32>
    %29 = arith.mulf %25, %28 : vector<8x8x96xf32>
    %30 = arith.addf %24, %29 : vector<8x8x96xf32>
    %c0_31 = arith.constant 0 : index
    %c2 = arith.constant 2 : index
    %c0_32 = arith.constant 0 : index
    %31 = vector.load %arg9[%c0_31, %c2, %c0_32] : memref<10x16x96xf32, #tpu.memory_space<vmem>>, vector<8x8x96xf32>
    %32 = vector.extract_strided_slice %15 {offsets = [2, 0], sizes = [1, 96], strides = [1, 1]} : vector<9x96xf32> to vector<1x96xf32>
    %33 = vector.shape_cast %32 : vector<1x96xf32> to vector<1x1x96xf32>
    %34 = vector.broadcast %33 : vector<1x1x96xf32> to vector<8x8x96xf32>
    %35 = arith.mulf %31, %34 : vector<8x8x96xf32>
    %36 = arith.addf %30, %35 : vector<8x8x96xf32>
    %c1_33 = arith.constant 1 : index
    %c0_34 = arith.constant 0 : index
    %c0_35 = arith.constant 0 : index
    %37 = vector.load %arg9[%c1_33, %c0_34, %c0_35] : memref<10x16x96xf32, #tpu.memory_space<vmem>>, vector<8x8x96xf32>
    %38 = vector.extract_strided_slice %15 {offsets = [3, 0], sizes = [1, 96], strides = [1, 1]} : vector<9x96xf32> to vector<1x96xf32>
    %39 = vector.shape_cast %38 : vector<1x96xf32> to vector<1x1x96xf32>
    %40 = vector.broadcast %39 : vector<1x1x96xf32> to vector<8x8x96xf32>
    %41 = arith.mulf %37, %40 : vector<8x8x96xf32>
    %42 = arith.addf %36, %41 : vector<8x8x96xf32>
    %c1_36 = arith.constant 1 : index
    %c1_37 = arith.constant 1 : index
    %c0_38 = arith.constant 0 : index
    %43 = vector.load %arg9[%c1_36, %c1_37, %c0_38] : memref<10x16x96xf32, #tpu.memory_space<vmem>>, vector<8x8x96xf32>
    %44 = vector.extract_strided_slice %15 {offsets = [4, 0], sizes = [1, 96], strides = [1, 1]} : vector<9x96xf32> to vector<1x96xf32>
    %45 = vector.shape_cast %44 : vector<1x96xf32> to vector<1x1x96xf32>
    %46 = vector.broadcast %45 : vector<1x1x96xf32> to vector<8x8x96xf32>
    %47 = arith.mulf %43, %46 : vector<8x8x96xf32>
    %48 = arith.addf %42, %47 : vector<8x8x96xf32>
    %c1_39 = arith.constant 1 : index
    %c2_40 = arith.constant 2 : index
    %c0_41 = arith.constant 0 : index
    %49 = vector.load %arg9[%c1_39, %c2_40, %c0_41] : memref<10x16x96xf32, #tpu.memory_space<vmem>>, vector<8x8x96xf32>
    %50 = vector.extract_strided_slice %15 {offsets = [5, 0], sizes = [1, 96], strides = [1, 1]} : vector<9x96xf32> to vector<1x96xf32>
    %51 = vector.shape_cast %50 : vector<1x96xf32> to vector<1x1x96xf32>
    %52 = vector.broadcast %51 : vector<1x1x96xf32> to vector<8x8x96xf32>
    %53 = arith.mulf %49, %52 : vector<8x8x96xf32>
    %54 = arith.addf %48, %53 : vector<8x8x96xf32>
    %c2_42 = arith.constant 2 : index
    %c0_43 = arith.constant 0 : index
    %c0_44 = arith.constant 0 : index
    %55 = vector.load %arg9[%c2_42, %c0_43, %c0_44] : memref<10x16x96xf32, #tpu.memory_space<vmem>>, vector<8x8x96xf32>
    %56 = vector.extract_strided_slice %15 {offsets = [6, 0], sizes = [1, 96], strides = [1, 1]} : vector<9x96xf32> to vector<1x96xf32>
    %57 = vector.shape_cast %56 : vector<1x96xf32> to vector<1x1x96xf32>
    %58 = vector.broadcast %57 : vector<1x1x96xf32> to vector<8x8x96xf32>
    %59 = arith.mulf %55, %58 : vector<8x8x96xf32>
    %60 = arith.addf %54, %59 : vector<8x8x96xf32>
    %c2_45 = arith.constant 2 : index
    %c1_46 = arith.constant 1 : index
    %c0_47 = arith.constant 0 : index
    %61 = vector.load %arg9[%c2_45, %c1_46, %c0_47] : memref<10x16x96xf32, #tpu.memory_space<vmem>>, vector<8x8x96xf32>
    %62 = vector.extract_strided_slice %15 {offsets = [7, 0], sizes = [1, 96], strides = [1, 1]} : vector<9x96xf32> to vector<1x96xf32>
    %63 = vector.shape_cast %62 : vector<1x96xf32> to vector<1x1x96xf32>
    %64 = vector.broadcast %63 : vector<1x1x96xf32> to vector<8x8x96xf32>
    %65 = arith.mulf %61, %64 : vector<8x8x96xf32>
    %66 = arith.addf %60, %65 : vector<8x8x96xf32>
    %c2_48 = arith.constant 2 : index
    %c2_49 = arith.constant 2 : index
    %c0_50 = arith.constant 0 : index
    %67 = vector.load %arg9[%c2_48, %c2_49, %c0_50] : memref<10x16x96xf32, #tpu.memory_space<vmem>>, vector<8x8x96xf32>
    %68 = vector.extract_strided_slice %15 {offsets = [8, 0], sizes = [1, 96], strides = [1, 1]} : vector<9x96xf32> to vector<1x96xf32>
    %69 = vector.shape_cast %68 : vector<1x96xf32> to vector<1x1x96xf32>
    %70 = vector.broadcast %69 : vector<1x1x96xf32> to vector<8x8x96xf32>
    %71 = arith.mulf %67, %70 : vector<8x8x96xf32>
    %72 = arith.addf %66, %71 : vector<8x8x96xf32>
    %73 = vector.shape_cast %16 : vector<1x96xf32> to vector<1x1x96xf32>
    %74 = vector.broadcast %73 : vector<1x1x96xf32> to vector<8x8x96xf32>
    %75 = arith.mulf %72, %74 : vector<8x8x96xf32>
    %76 = vector.shape_cast %17 : vector<1x96xf32> to vector<1x1x96xf32>
    %77 = vector.broadcast %76 : vector<1x1x96xf32> to vector<8x8x96xf32>
    %78 = arith.addf %75, %77 : vector<8x8x96xf32>
    %79 = vector.shape_cast %78 : vector<8x8x96xf32> to vector<64x96xf32>
    %80 = tpu.concatenate %2, %2, %2 in 1 : vector<1x32xf32>, vector<1x32xf32>, vector<1x32xf32> -> vector<1x96xf32>
    %81 = tpu.concatenate %80, %79 in 0 : vector<1x96xf32>, vector<64x96xf32> -> vector<65x96xf32>
    %c0_51 = arith.constant 0 : index
    %c0_52 = arith.constant 0 : index
    %82 = vector.load %arg5[%c0_51, %c0_52] : memref<96x96xf32, #tpu.memory_space<vmem>>, vector<96x96xf32>
    %cst_53 = arith.constant dense<0.000000e+00> : vector<65x96xf32>
    %83 = tpu.matmul %81, %82, %cst_53 {dimension_numbers = #tpu.dot_dimension_numbers<[1], [0], [0], [1], [0, 0, 1, 1], [], []>} : vector<65x96xf32>, vector<96x96xf32>, vector<65x96xf32> -> vector<65x96xf32>
    %84 = vector.extract_strided_slice %83 {offsets = [0, 0], sizes = [65, 32], strides = [1, 1]} : vector<65x96xf32> to vector<65x32xf32>
    %85 = vector.extract_strided_slice %83 {offsets = [0, 32], sizes = [65, 32], strides = [1, 1]} : vector<65x96xf32> to vector<65x32xf32>
    %86 = vector.extract_strided_slice %83 {offsets = [0, 64], sizes = [65, 32], strides = [1, 1]} : vector<65x96xf32> to vector<65x32xf32>
    %87 = vector.extract_strided_slice %84 {offsets = [0, 0], sizes = [65, 8], strides = [1, 1]} : vector<65x32xf32> to vector<65x8xf32>
    %88 = vector.extract_strided_slice %84 {offsets = [0, 8], sizes = [65, 8], strides = [1, 1]} : vector<65x32xf32> to vector<65x8xf32>
    %89 = vector.extract_strided_slice %84 {offsets = [0, 16], sizes = [65, 8], strides = [1, 1]} : vector<65x32xf32> to vector<65x8xf32>
    %90 = vector.extract_strided_slice %84 {offsets = [0, 24], sizes = [65, 8], strides = [1, 1]} : vector<65x32xf32> to vector<65x8xf32>
    %91 = vector.shape_cast %87 : vector<65x8xf32> to vector<1x65x8xf32>
    %92 = vector.shape_cast %88 : vector<65x8xf32> to vector<1x65x8xf32>
    %93 = vector.shape_cast %89 : vector<65x8xf32> to vector<1x65x8xf32>
    %94 = vector.shape_cast %90 : vector<65x8xf32> to vector<1x65x8xf32>
    %95 = tpu.concatenate %91, %92, %93, %94 in 0 : vector<1x65x8xf32>, vector<1x65x8xf32>, vector<1x65x8xf32>, vector<1x65x8xf32> -> vector<4x65x8xf32>
    %96 = vector.extract_strided_slice %85 {offsets = [0, 0], sizes = [65, 8], strides = [1, 1]} : vector<65x32xf32> to vector<65x8xf32>
    %97 = vector.extract_strided_slice %85 {offsets = [0, 8], sizes = [65, 8], strides = [1, 1]} : vector<65x32xf32> to vector<65x8xf32>
    %98 = vector.extract_strided_slice %85 {offsets = [0, 16], sizes = [65, 8], strides = [1, 1]} : vector<65x32xf32> to vector<65x8xf32>
    %99 = vector.extract_strided_slice %85 {offsets = [0, 24], sizes = [65, 8], strides = [1, 1]} : vector<65x32xf32> to vector<65x8xf32>
    %100 = vector.shape_cast %96 : vector<65x8xf32> to vector<1x65x8xf32>
    %101 = vector.shape_cast %97 : vector<65x8xf32> to vector<1x65x8xf32>
    %102 = vector.shape_cast %98 : vector<65x8xf32> to vector<1x65x8xf32>
    %103 = vector.shape_cast %99 : vector<65x8xf32> to vector<1x65x8xf32>
    %104 = tpu.concatenate %100, %101, %102, %103 in 0 : vector<1x65x8xf32>, vector<1x65x8xf32>, vector<1x65x8xf32>, vector<1x65x8xf32> -> vector<4x65x8xf32>
    %105 = vector.extract_strided_slice %86 {offsets = [0, 0], sizes = [65, 8], strides = [1, 1]} : vector<65x32xf32> to vector<65x8xf32>
    %106 = vector.extract_strided_slice %86 {offsets = [0, 8], sizes = [65, 8], strides = [1, 1]} : vector<65x32xf32> to vector<65x8xf32>
    %107 = vector.extract_strided_slice %86 {offsets = [0, 16], sizes = [65, 8], strides = [1, 1]} : vector<65x32xf32> to vector<65x8xf32>
    %108 = vector.extract_strided_slice %86 {offsets = [0, 24], sizes = [65, 8], strides = [1, 1]} : vector<65x32xf32> to vector<65x8xf32>
    %109 = vector.shape_cast %105 : vector<65x8xf32> to vector<1x65x8xf32>
    %110 = vector.shape_cast %106 : vector<65x8xf32> to vector<1x65x8xf32>
    %111 = vector.shape_cast %107 : vector<65x8xf32> to vector<1x65x8xf32>
    %112 = vector.shape_cast %108 : vector<65x8xf32> to vector<1x65x8xf32>
    %113 = tpu.concatenate %109, %110, %111, %112 in 0 : vector<1x65x8xf32>, vector<1x65x8xf32>, vector<1x65x8xf32>, vector<1x65x8xf32> -> vector<4x65x8xf32>
    "tpu.trace_start"() <{level = 10 : i32, message = "hqd,hkd->hqk"}> : () -> ()
    %cst_54 = arith.constant dense<0.000000e+00> : vector<4x65x65xf32>
    %114 = tpu.matmul %95, %104, %cst_54 {dimension_numbers = #tpu.dot_dimension_numbers<[2], [2], [1], [1], [0, 0, 0, 1, 1, 1], [0], [0]>} : vector<4x65x8xf32>, vector<4x65x8xf32>, vector<4x65x65xf32> -> vector<4x65x65xf32>
    "tpu.trace_stop"() : () -> ()
    %cst_55 = arith.constant dense<0xFF800000> : vector<4x65xf32>
    %115 = vector.multi_reduction <maximumf>, %114, %cst_55 [2] : vector<4x65x65xf32> to vector<4x65xf32>
    %116 = vector.shape_cast %115 : vector<4x65xf32> to vector<4x65x1xf32>
    %117 = vector.broadcast %116 : vector<4x65x1xf32> to vector<4x65x65xf32>
    %118 = arith.subf %114, %117 : vector<4x65x65xf32>
    %119 = math.exp %118 : vector<4x65x65xf32>
    %cst_56 = arith.constant dense<0.000000e+00> : vector<4x65xf32>
    %120 = vector.multi_reduction <add>, %119, %cst_56 [2] : vector<4x65x65xf32> to vector<4x65xf32>
    %121 = vector.shape_cast %120 : vector<4x65xf32> to vector<4x65x1xf32>
    %122 = tpu.reciprocal %121 {approx = true} : vector<4x65x1xf32> -> vector<4x65x1xf32>
    %123 = arith.mulf %121, %122 : vector<4x65x1xf32>
    %cst_57 = arith.constant 2.000000e+00 : f32
    %124 = vector.broadcast %cst_57 : f32 to vector<4x65x1xf32>
    %125 = arith.subf %124, %123 : vector<4x65x1xf32>
    %126 = arith.mulf %122, %125 : vector<4x65x1xf32>
    %127 = vector.broadcast %126 : vector<4x65x1xf32> to vector<4x65x65xf32>
    %128 = arith.mulf %119, %127 : vector<4x65x65xf32>
    "tpu.trace_start"() <{level = 10 : i32, message = "hqk,hkd->hqd"}> : () -> ()
    %cst_58 = arith.constant dense<0.000000e+00> : vector<4x65x8xf32>
    %129 = tpu.matmul %128, %113, %cst_58 {dimension_numbers = #tpu.dot_dimension_numbers<[2], [1], [1], [2], [0, 0, 0, 1, 1, 2], [0], [0]>} : vector<4x65x65xf32>, vector<4x65x8xf32>, vector<4x65x8xf32> -> vector<4x65x8xf32>
    "tpu.trace_stop"() : () -> ()
    %130 = vector.extract_strided_slice %129 {offsets = [0, 0, 0], sizes = [1, 65, 8], strides = [1, 1, 1]} : vector<4x65x8xf32> to vector<1x65x8xf32>
    %131 = vector.shape_cast %130 : vector<1x65x8xf32> to vector<65x8xf32>
    %132 = vector.extract_strided_slice %129 {offsets = [1, 0, 0], sizes = [1, 65, 8], strides = [1, 1, 1]} : vector<4x65x8xf32> to vector<1x65x8xf32>
    %133 = vector.shape_cast %132 : vector<1x65x8xf32> to vector<65x8xf32>
    %134 = vector.extract_strided_slice %129 {offsets = [2, 0, 0], sizes = [1, 65, 8], strides = [1, 1, 1]} : vector<4x65x8xf32> to vector<1x65x8xf32>
    %135 = vector.shape_cast %134 : vector<1x65x8xf32> to vector<65x8xf32>
    %136 = vector.extract_strided_slice %129 {offsets = [3, 0, 0], sizes = [1, 65, 8], strides = [1, 1, 1]} : vector<4x65x8xf32> to vector<1x65x8xf32>
    %137 = vector.shape_cast %136 : vector<1x65x8xf32> to vector<65x8xf32>
    %138 = tpu.concatenate %131, %133, %135, %137 in 1 : vector<65x8xf32>, vector<65x8xf32>, vector<65x8xf32>, vector<65x8xf32> -> vector<65x32xf32>
    %c0_59 = arith.constant 0 : index
    %c0_60 = arith.constant 0 : index
    %139 = vector.load %arg6[%c0_59, %c0_60] : memref<32x128xf32, #tpu.memory_space<vmem>>, vector<32x128xf32>
    %cst_61 = arith.constant dense<0.000000e+00> : vector<65x128xf32>
    %140 = tpu.matmul %138, %139, %cst_61 {dimension_numbers = #tpu.dot_dimension_numbers<[1], [0], [0], [1], [0, 0, 1, 1], [], []>} : vector<65x32xf32>, vector<32x128xf32>, vector<65x128xf32> -> vector<65x128xf32>
    %c0_62 = arith.constant 0 : index
    %c0_63 = arith.constant 0 : index
    %141 = vector.load %arg7[%c0_62, %c0_63] : memref<1x128xf32, #tpu.memory_space<vmem>>, vector<1x128xf32>
    %142 = vector.broadcast %141 : vector<1x128xf32> to vector<65x128xf32>
    %143 = arith.addf %140, %142 : vector<65x128xf32>
    %c0_64 = arith.constant 0 : index
    %c0_65 = arith.constant 0 : index
    %c0_66 = arith.constant 0 : index
    %144 = vector.load %arg8[%c0_64, %c0_65, %c0_66] : memref<1x65x128xf32, #tpu.memory_space<vmem>>, vector<1x65x128xf32>
    %145 = vector.shape_cast %144 : vector<1x65x128xf32> to vector<65x128xf32>
    %146 = vector.shape_cast %143 : vector<65x128xf32> to vector<1x65x128xf32>
    tpu.vector_store %arg8[%c0_64, %c0_65, %c0_66], %146 {strides = array<i32>} : memref<1x65x128xf32, #tpu.memory_space<vmem>>, vector<1x65x128xf32>,
    return
  }
  func.func @transform_0(%arg0: i32) -> (i32, i32, i32) {
    %c0_i32 = arith.constant 0 : i32
    %c0_i32_0 = arith.constant 0 : i32
    %c0_i32_1 = arith.constant 0 : i32
    return %arg0, %c0_i32, %c0_i32_0 : i32, i32, i32
  }
  func.func @transform_1(%arg0: i32) -> (i32, i32) {
    %c0_i32 = arith.constant 0 : i32
    %c0_i32_0 = arith.constant 0 : i32
    %c0_i32_1 = arith.constant 0 : i32
    return %c0_i32, %c0_i32_0 : i32, i32
  }
  func.func @transform_2(%arg0: i32) -> (i32, i32) {
    %c0_i32 = arith.constant 0 : i32
    %c0_i32_0 = arith.constant 0 : i32
    %c0_i32_1 = arith.constant 0 : i32
    return %c0_i32, %c0_i32_0 : i32, i32
  }
  func.func @transform_3(%arg0: i32) -> (i32, i32) {
    %c0_i32 = arith.constant 0 : i32
    %c0_i32_0 = arith.constant 0 : i32
    %c0_i32_1 = arith.constant 0 : i32
    return %c0_i32, %c0_i32_0 : i32, i32
  }
  func.func @transform_4(%arg0: i32) -> (i32, i32) {
    %c0_i32 = arith.constant 0 : i32
    %c0_i32_0 = arith.constant 0 : i32
    %c0_i32_1 = arith.constant 0 : i32
    return %c0_i32, %c0_i32_0 : i32, i32
  }
  func.func @transform_5(%arg0: i32) -> (i32, i32) {
    %c0_i32 = arith.constant 0 : i32
    %c0_i32_0 = arith.constant 0 : i32
    %c0_i32_1 = arith.constant 0 : i32
    return %c0_i32, %c0_i32_0 : i32, i32
  }
  func.func @transform_6(%arg0: i32) -> (i32, i32) {
    %c0_i32 = arith.constant 0 : i32
    %c0_i32_0 = arith.constant 0 : i32
    %c0_i32_1 = arith.constant 0 : i32
    return %c0_i32, %c0_i32_0 : i32, i32
  }
  func.func @transform_7(%arg0: i32) -> (i32, i32, i32) {
    %c0_i32 = arith.constant 0 : i32
    %c0_i32_0 = arith.constant 0 : i32
    %c0_i32_1 = arith.constant 0 : i32
    return %arg0, %c0_i32, %c0_i32_0 : i32, i32, i32
  }
}

</mosaic_0001>

<bundles_post_ra>
// kernel: tpu_custom_call.1
= control target key start
LH: loop header
LB: loop body
LE: loop exit
PB: predicated region body
PF: predicated region fallthrough
CT: control target
= control target key end

     0   :  { %s4413_s24 = smov 0   ;;  %s5948_s0 = inlined_call_operand.vmem [shape: f32[2,65,32], index: 0, kind: input, shape index: {}]   ;;  %s5949_s1 = inlined_call_operand.vmem [shape: f32[9,96], index: 1, kind: input, shape index: {}]   ;;  %s5950_s2 = inlined_call_operand.vmem [shape: f32[1,96], index: 2, kind: input, shape index: {}]   ;;  %s5951_s3 = inlined_call_operand.vmem [shape: f32[1,96], index: 3, kind: input, shape index: {}]   ;;  %s5952_s4 = inlined_call_operand.vmem [shape: f32[96,96], index: 4, kind: input, shape index: {}]   ;;  %s5953_s5 = inlined_call_operand.vmem [shape: f32[32,128], index: 5, kind: input, shape index: {}]   ;;  %s5954_s6 = inlined_call_operand.vmem [shape: f32[1,128], index: 6, kind: input, shape index: {}]   ;;  %s5955_s7 = inlined_call_operand.vmem [shape: f32[2,65,128], index: 7, kind: output, shape index: {}]  }
   0x1 LB: > { %s3121_s25 = sadd.s32 4294967295, %s4359_s24   ;;  %p3125_p0 = scmp.ge.s32.totalorder %s4359_s24, 1  ;;  %s4359_s24 = sphi %s4413_s24, %s17_s24  }
   0x2   : > { %p237_p1 = scmp.lt.s32.totalorder %s4359_s24, 3 }
   0x4   : > { %p238_p2 = pnand %p3125_p0, %p237_p1 }
   0x6   : > { %241 = sbr.rel (%p238_p2) target bundleno = 1895 (0x767), region = 48 }
   0xd   : > { %p269_p3 = scmp.lt.s32.totalorder %s3121_s25, 1  ;;  %vm389_vm0 = vcmask 785408   ;;  %vm395_vm1 = vcmask 778240   ;;  %vm406_vm2 = vcmask 784384   ;;  %v5958_v0 = vmov 0.0   ;;  %v745_v1 = vld [vmem:[%s5952_s4] sm:$0xff] }
   0xe   : > { %390 = vst.msk [vmem:[#allocation2] sm:$0xff] %vm389_vm0, %v5958_v0  ;;  %391 = vst.msk [vmem:[#allocation2 + $0x8] sm:$0xff] %vm389_vm0, %v5958_v0  ;;  %v746_v2 = vld [vmem:[%s5952_s4 + $0x8] sm:$0xff]  ;;  %vm297_vm3 = vcmask 1046528   ;;  %v5956_v10 = vmov 0.0|0.0   ;;  %v747_v14 = vld [vmem:[%s5952_s4 + $0x10] sm:$0xff]  ;;  %v438_v46 = vlaneseq }
   0xf   : > { %s5968_s25 = smov (!%p269_p3, %s3121_s25), 1  ;;  %393 = vst.msk [vmem:[#allocation2 + $0x90] sm:$0xff] %vm389_vm0, %v5958_v0  ;;  %394 = vst.msk [vmem:[#allocation2 + $0x98] sm:$0xff] %vm389_vm0, %v5958_v0  ;;  %v3889_v6 = vpack.c.bf16 %v746_v2, %v745_v1  ;;  %3888 = vmatprep.subr.bf16.mxu0 %v5956_v10  ;;  %3906 = vmatprep.subr.bf16.mxu1 %v5956_v10  ;;  %v748_v15 = vld [vmem:[%s5952_s4 + $0x18] sm:$0xff]  ;;  %s4363_s15 = smov 32   ;;  %v749_v19 = vld [vmem:[%s5952_s4 + $0x20] sm:$0xff] }
  0x10   : > { %397 = vst.msk [vmem:[#allocation2 + $0x10] sm:$0x1] %vm395_vm1, %v5958_v0  ;;  %398 = vst.msk [vmem:[#allocation2 + $0x20] sm:$0x1] %vm395_vm1, %v5958_v0  ;;  %s4028_s26 = smul.u32 72, %s5968_s25  ;;  %v3892_v17 = vpack.c.bf16 %v748_v15, %v747_v14  ;;  %v750_v20 = vld [vmem:[%s5952_s4 + $0x28] sm:$0xff] }
  0x11   : > { %408 = vst.msk [vmem:[#allocation2 + $0x19] sm:$0x7f] %vm406_vm2, %v5958_v0  ;;  %409 = vst.msk [vmem:[#allocation2 + $0x29] sm:$0x7f] %vm406_vm2, %v5958_v0  ;;  %3890 = vmatpush3.bf16.msra.mxu0 %v3889_v6  ;;  %s4364_s20 = smov 64   ;;  %v3895_v21 = vpack.c.bf16 %v750_v20, %v749_v19  ;;  %v751_v25 = vld [vmem:[%s5952_s4 + $0x30] sm:$0xff] }
  0x12   : > { %399 = vst.msk [vmem:[#allocation2 + $0x30] sm:$0x1] %vm395_vm1, %v5958_v0  ;;  %400 = vst.msk [vmem:[#allocation2 + $0x40] sm:$0x1] %vm395_vm1, %v5958_v0  ;;  %s4477_s29 = scalar_lea.vmem %s5948_s0, %s4028_s26  ;;  %3891 = vmatprep.subr.bf16.mxu0 %v5956_v10  ;;  %v752_v26 = vld [vmem:[%s5952_s4 + $0x38] sm:$0xff]  ;;  %v753_v31 = vld [vmem:[%s5952_s4 + $0x40] sm:$0xff]  ;;  %s5934_s21 = scalar_lea.vmem %s5955_s7, %s4028_s26 }
  0x13   : > { %401 = vst.msk [vmem:[#allocation2 + $0x50] sm:$0x1] %vm395_vm1, %v5958_v0  ;;  %402 = vst.msk [vmem:[#allocation2 + $0x60] sm:$0x1] %vm395_vm1, %v5958_v0  ;;  %v280_v3 = vld [vmem:[%s4477_s29 + $0x8] sm:$0xff]  ;;  %v281_v4 = vld [vmem:[%s4477_s29 + $0x10] sm:$0xff]  ;;  %v3898_v27 = vpack.c.bf16 %v752_v26, %v751_v25 }
  0x14   : > { %403 = vst.msk [vmem:[#allocation2 + $0x70] sm:$0x1] %vm395_vm1, %v5958_v0  ;;  %404 = vst.msk [vmem:[#allocation2 + $0x80] sm:$0x1] %vm395_vm1, %v5958_v0  ;;  %v4488_v5 = vld [vmem:[%s4477_s29] sm:$0xff]  ;;  %v299_v7 = vrot.slane %v280_v3, 1 }
  0x15   : > { %410 = vst.msk [vmem:[#allocation2 + $0x39] sm:$0x7f] %vm406_vm2, %v5958_v0  ;;  %411 = vst.msk [vmem:[#allocation2 + $0x49] sm:$0x7f] %vm406_vm2, %v5958_v0  ;;  %v301_v8 = vrot.slane %v281_v4, 1  ;;  %v298_v9 = vrot.slane %v4488_v5, 1  ;;  %3893 = vmatpush3.bf16.msra.mxu0 %v3892_v17 }
  0x16   : > { %412 = vst.msk [vmem:[#allocation2 + $0x59] sm:$0x7f] %vm406_vm2, %v5958_v0  ;;  %413 = vst.msk [vmem:[#allocation2 + $0x69] sm:$0x7f] %vm406_vm2, %v5958_v0  ;;  %v282_v11 = vld [vmem:[%s4477_s29 + $0x18] sm:$0xff]  ;;  %v283_v18 = vld [vmem:[%s4477_s29 + $0x20] sm:$0xff]  ;;  %3894 = vmatprep.subr.bf16.mxu0 %v5956_v10 }
  0x17   : > { %414 = vst.msk [vmem:[#allocation2 + $0x79] sm:$0x7f] %vm406_vm2, %v5958_v0  ;;  %415 = vst.msk [vmem:[#allocation2 + $0x89] sm:$0x7f] %vm406_vm2, %v5958_v0  ;;  %v4495_v12 = vsel %vm297_vm3, %v299_v7, %v301_v8  ;;  %v4498_v13 = vsel %vm297_vm3, %v298_v9, %v299_v7  ;;  %v303_v16 = vrot.slane %v282_v11, 1  ;;  %v305_v23 = vrot.slane %v283_v18, 1 }
  0x18   : > { %396 = vst.msk [vmem:[#allocation2] sm:$0x1] %vm395_vm1, %v5958_v0  ;;  %405 = vst.msk [vmem:[#allocation2 + $0x90] sm:$0x1] %vm395_vm1, %v5958_v0  ;;  %325 = vrot.lane.b32.xlu1 %v4495_v12, %s4363_s15  ;;  %323 = vrot.lane.b32.xlu0 %v4498_v13, %s4363_s15  ;;  %v284_v24 = vld [vmem:[%s4477_s29 + $0x28] sm:$0xff]  ;;  %v285_v30 = vld [vmem:[%s4477_s29 + $0x30] sm:$0xff] }
  0x19   : > { %407 = vst.msk [vmem:[#allocation2 + $0x9] sm:$0x7f] %vm406_vm2, %v5958_v0  ;;  %416 = vst.msk [vmem:[#allocation2 + $0x99] sm:$0x7f] %vm406_vm2, %v5958_v0  ;;  %v4523_v22 = vsel %vm297_vm3, %v301_v8, %v303_v16  ;;  %3896 = vmatpush3.bf16.msra.mxu0 %v3895_v21  ;;  %v4538_v28 = vsel %vm297_vm3, %v303_v16, %v305_v23  ;;  %v307_v29 = vrot.slane %v284_v24, 1  ;;  %v754_v32 = vld [vmem:[%s5952_s4 + $0x48] sm:$0xff] }
  0x1a   : > { %3897 = vmatprep.subr.bf16.mxu0 %v5956_v10  ;;  %v3901_v33 = vpack.c.bf16 %v754_v32, %v753_v31  ;;  %v309_v35 = vrot.slane %v285_v30, 1  ;;  %v286_v36 = vld [vmem:[%s4477_s29 + $0x38] sm:$0xff]  ;;  %v755_v37 = vld [vmem:[%s5952_s4 + $0x50] sm:$0xff]  ;;  %v287_v42 = vld [vmem:[%s4477_s29 + $0x40] sm:$0x1]  ;;  %vm4365_vm4 = vmmov 0  }
  0x1b   : > { %v4553_v34 = vsel %vm297_vm3, %v305_v23, %v307_v29  ;;  %v756_v38 = vld [vmem:[%s5952_s4 + $0x58] sm:$0xff]  ;;  %v311_v41 = vrot.slane %v286_v36, 1  ;;  %v313_v44 = vrot.slane %v287_v42, 1  ;;  %3466 = vmatprep.mubr.msk.f32.mxu0 %vm4365_vm4, %v5958_v0  ;;  %3511 = vmatprep.mubr.msk.f32.mxu1 %vm4365_vm4, %v5958_v0  ;;  %v439_v47 = vshrl.u32 %v438_v46, 7  ;;  %v426_v50 = vld [vmem:[%s5949_s1] sm:$0xff]  ;;  %s4366_s22 = smov 120  }
  0x1c   : > { %349 = vrot.lane.b32.xlu1 %v4495_v12, %s4364_s20  ;;  %347 = vrot.lane.b32.xlu0 %v4498_v13, %s4364_s20  ;;  %v3904_v39 = vpack.c.bf16 %v756_v38, %v755_v37  ;;  %v4568_v40 = vsel %vm297_vm3, %v307_v29, %v309_v35  ;;  %vm371_vm5 = vcmask 261120   ;;  %v458_v57 = vld [vmem:[#allocation2 + $0x1] sm:$0xff]  ;;  %vm380_vm6 = vcmask 523264   ;;  %s4367_s23 = smov 112   ;;  %s4368_s27 = smov 104  }
  0x1d   : > { %3899 = vmatpush3.bf16.msra.mxu0 %v3898_v27  ;;  %v4577_v43 = vsel %vm297_vm3, %v309_v35, %v311_v41  ;;  %v4589_v45 = vsel %vm297_vm3, %v311_v41, %v313_v44  ;;  %v440_v48 = vsub.s32 0, %v439_v47  ;;  %v468_v49 = vsub.s32 1, %v439_v47  ;;  %s4369_s28 = smov 96   ;;  %s4371_s11 = smov 16  }
  0x1e   : > { %3900 = vmatprep.subr.bf16.mxu0 %v5956_v10  ;;  %v496_v51 = vsub.s32 2, %v439_v47  ;;  %v524_v6 = vsub.s32 3, %v439_v47  ;;  %v552_v7 = vsub.s32 4, %v439_v47  ;;  %v609_v14 = vsub.s32 6, %v439_v47 }
  0x1f   : > { %v4602_v54 = vrot.slane %v426_v50, %v440_v48  ;;  %v4604_v55 = vrot.slane %v426_v50, %v468_v49  ;;  %v430_v56 = vld [vmem:[#allocation2] sm:$0xff]  ;;  %v637_v16 = vsub.s32 7, %v439_v47  ;;  %vm727_vm7 = vcmask 1040384  }
  0x20   : > { %351 = vrot.lane.b32.xlu1 %v4523_v22, %s4364_s20  ;;  %327 = vrot.lane.b32.xlu0 %v4523_v22, %s4363_s15  ;;  %v4606_v58 = vrot.slane %v426_v50, %v496_v51  ;;  %v486_v4 = vld [vmem:[#allocation2 + $0x2] sm:$0xff]  ;;  %v4622_v18 = vrot.slane %v426_v50, %v524_v6  ;;  %v4625_v19 = vrot.slane %v426_v50, %v552_v7  ;;  %vm967_vm8 = vcmask 64512  }
  0x21   : > { %3902 = vmatpush3.bf16.msra.mxu0 %v3901_v33  ;;  %v442_v63 = vmul.f32 %v4602_v54, %v430_v56  ;;  %v470_v1 = vmul.f32 %v4604_v55, %v458_v57  ;;  %v4629_v25 = vrot.slane %v426_v50, %v609_v14  ;;  %v4633_v30 = vrot.slane %v426_v50, %v637_v16  ;;  %vm4974_vm9 = vmpackc.low %vm967_vm8, %vm967_vm8 }
  0x22   : > { %3903 = vmatprep.subr.bf16.mxu0 %v5956_v10  ;;  %vm1606_vm10 = vcmask 531456   ;;  %vm1631_vm11 = vcmask 524288   ;;  %vm2889_vm12 = vcmask 130048   ;;  %vm2899_vm13 = vcmask 195584  }
  0x23   : > { %v478_v11 = vadd.f32 %v470_v1, %v442_v63 }
  0x24   : > { %353 = vrot.lane.b32.xlu1 %v4538_v28, %s4364_s20  ;;  %329 = vrot.lane.b32.xlu0 %v4538_v28, %s4363_s15 }
  0x25   : > { %3905 = vmatpush3.bf16.msra.mxu0 %v3904_v39 }
  0x26   : > { %3922 = vmatprep.subr.bf16.mxu0 %v5956_v10 }
  0x28   : > { %355 = vrot.lane.b32.xlu1 %v4553_v34, %s4364_s20  ;;  %331 = vrot.lane.b32.xlu0 %v4553_v34, %s4363_s15 }
  0x2c   : > { %357 = vrot.lane.b32.xlu1 %v4568_v40, %s4364_s20  ;;  %333 = vrot.lane.b32.xlu0 %v4568_v40, %s4363_s15 }
  0x30   : > { %359 = vrot.lane.b32.xlu1 %v4577_v43, %s4364_s20  ;;  %335 = vrot.lane.b32.xlu0 %v4577_v43, %s4363_s15 }
  0x34   : > { %711 = vrot.lane.b32.xlu1 %v4488_v5, %s4363_s15  ;;  %337 = vrot.lane.b32.xlu0 %v4589_v45, %s4363_s15  ;;  %s4372_s15 = smov 24  }
  0x38   : > { %714 = vrot.lane.b32.xlu1 %v4488_v5, %s4364_s20  ;;  %361 = vrot.lane.b32.xlu0 %v4589_v45, %s4364_s20 }
  0x8a   : > { %v326_v52 = vpop.permute.xlu1 %325  ;;  %v324_v53 = vpop.permute.xlu0 %323 }
  0x8b   : > { %v373_v59 = vsel %vm371_vm5, %v4495_v12, %v326_v52  ;;  %v372_v60 = vsel %vm371_vm5, %v4498_v13, %v324_v53  ;;  %v498_v12 = vmul.f32 %v4606_v58, %v486_v4  ;;  %v580_v13 = vsub.s32 5, %v439_v47 }
  0x8d   : > { %v506_v23 = vadd.f32 %v498_v12, %v478_v11  ;;  %v4627_v24 = vrot.slane %v426_v50, %v580_v13 }
  0x8e   : > { %v350_v61 = vpop.permute.xlu1 %349  ;;  %v348_v62 = vpop.permute.xlu0 %347 }
  0x8f   : > { %v382_v2 = vsel %vm380_vm6, %v373_v59, %v350_v61  ;;  %v381_v3 = vsel %vm380_vm6, %v372_v60, %v348_v62 }
  0x90   : > { %419 = vst.msk [vmem:[#allocation2 + $0x21] sm:$0xff] %vm389_vm0, %v382_v2  ;;  %418 = vst.msk [vmem:[#allocation2 + $0x11] sm:$0xff] %vm389_vm0, %v381_v3 }
  0x92   : > { %v352_v8 = vpop.permute.xlu1 %351  ;;  %v328_v9 = vpop.permute.xlu0 %327 }
  0x93   : > { %v374_v15 = vsel %vm371_vm5, %v4523_v22, %v328_v9 }
  0x94   : > { %v383_v17 = vsel %vm380_vm6, %v374_v15, %v352_v8 }
  0x95   : > { %420 = vst.msk [vmem:[#allocation2 + $0x31] sm:$0xff] %vm389_vm0, %v383_v17 }
  0x96   : > { %v354_v20 = vpop.permute.xlu1 %353  ;;  %v330_v21 = vpop.permute.xlu0 %329 }
  0x97   : > { %v375_v26 = vsel %vm371_vm5, %v4538_v28, %v330_v21  ;;  %v514_v22 = vld [vmem:[#allocation2 + $0x10] sm:$0xff]  ;;  %v599_v33 = vld [vmem:[#allocation2 + $0x20] sm:$0xff]  ;;  %v4643_v28 = vld [vmem:[%s5949_s1 + $0x8] ss:$0 sm:$0xff] }
  0x98   : > { %v542_v27 = vld [vmem:[#allocation2 + $0x11] sm:$0xff]  ;;  %v384_v31 = vsel %vm380_vm6, %v375_v26, %v354_v20  ;;  %v526_v32 = vmul.f32 %v4622_v18, %v514_v22  ;;  %v627_v35 = vld [vmem:[#allocation2 + $0x21] sm:$0xff]  ;;  %v443_v37 = vmul.f32 %v514_v22, %v4602_v54  ;;  %v611_v44 = vmul.f32 %v4629_v25, %v599_v33 }
  0x99   : > { %v570_v29 = vld [vmem:[#allocation2 + $0x12] sm:$0xff]  ;;  %421 = vst.msk [vmem:[#allocation2 + $0x41] sm:$0xff] %vm389_vm0, %v384_v31  ;;  %v554_v36 = vmul.f32 %v4625_v19, %v542_v27  ;;  %v655_v46 = vld [vmem:[#allocation2 + $0x22] sm:$0xff]  ;;  %v471_v47 = vmul.f32 %v542_v27, %v4604_v55  ;;  %v639_v49 = vmul.f32 %v4633_v30, %v627_v35  ;;  %v444_v51 = vmul.f32 %v599_v33, %v4602_v54 }
  0x9a   : > { %v356_v38 = vpop.permute.xlu1 %355  ;;  %v332_v39 = vpop.permute.xlu0 %331  ;;  %v534_v41 = vadd.f32 %v526_v32, %v506_v23  ;;  %v582_v42 = vmul.f32 %v4627_v24, %v570_v29  ;;  %v499_v50 = vmul.f32 %v570_v29, %v4606_v58  ;;  %v472_v59 = vmul.f32 %v627_v35, %v4604_v55 }
  0x9b   : > { %v376_v48 = vsel %vm371_vm5, %v4553_v34, %v332_v39  ;;  %v479_v56 = vadd.f32 %v471_v47, %v443_v37  ;;  %v667_v60 = vmul.f32 %v4643_v28, %v655_v46  ;;  %v527_v61 = vmul.f32 %v599_v33, %v4622_v18 }
  0x9c   : > { %v385_v52 = vsel %vm380_vm6, %v376_v48, %v356_v38  ;;  %v562_v53 = vadd.f32 %v554_v36, %v534_v41  ;;  %v600_v57 = vld [vmem:[#allocation2 + $0x30] sm:$0xff]  ;;  %v555_v34 = vmul.f32 %v627_v35, %v4625_v19  ;;  %v500_v62 = vmul.f32 %v655_v46, %v4606_v58  ;;  %v4678_v38 = vld [vmem:[%s5950_s2] ss:$0 sm:$0xff] }
  0x9d   : > { %422 = vst.msk [vmem:[#allocation2 + $0x51] sm:$0xff] %vm389_vm0, %v385_v52  ;;  %v507_v3 = vadd.f32 %v499_v50, %v479_v56  ;;  %v628_v4 = vld [vmem:[#allocation2 + $0x31] sm:$0xff]  ;;  %v480_v7 = vadd.f32 %v472_v59, %v444_v51  ;;  %v528_v8 = vmul.f32 %v600_v57, %v4622_v18  ;;  %v583_v11 = vmul.f32 %v655_v46, %v4627_v24 }
  0x9e   : > { %v358_v63 = vpop.permute.xlu1 %357  ;;  %v334_v1 = vpop.permute.xlu0 %333  ;;  %v590_v2 = vadd.f32 %v582_v42, %v562_v53  ;;  %v656_v6 = vld [vmem:[#allocation2 + $0x32] sm:$0xff]  ;;  %v612_v12 = vmul.f32 %v4629_v25, %v600_v57  ;;  %v445_v13 = vmul.f32 %v600_v57, %v4602_v54  ;;  %v640_v21 = vmul.f32 %v4633_v30, %v628_v4 }
  0x9f   : > { %v377_v9 = vsel %vm371_vm5, %v4568_v40, %v334_v1  ;;  %v535_v16 = vadd.f32 %v527_v61, %v507_v3  ;;  %v508_v17 = vadd.f32 %v500_v62, %v480_v7  ;;  %v668_v23 = vmul.f32 %v4643_v28, %v656_v6 }
  0xa0   : > { %v386_v14 = vsel %vm380_vm6, %v377_v9, %v358_v63  ;;  %v619_v15 = vadd.f32 %v611_v44, %v590_v2  ;;  %v601_v20 = vld [vmem:[#allocation2 + $0x40] sm:$0xff]  ;;  %v556_v40 = vmul.f32 %v628_v4, %v4625_v19  ;;  %v473_v26 = vmul.f32 %v628_v4, %v4604_v55 }
  0xa1   : > { %423 = vst.msk [vmem:[#allocation2 + $0x61] sm:$0xff] %vm389_vm0, %v386_v14  ;;  %v563_v31 = vadd.f32 %v555_v34, %v535_v16  ;;  %v536_v32 = vadd.f32 %v528_v8, %v508_v17  ;;  %v584_v33 = vmul.f32 %v656_v6, %v4627_v24  ;;  %v629_v35 = vld [vmem:[#allocation2 + $0x41] sm:$0xff]  ;;  %v501_v41 = vmul.f32 %v656_v6, %v4606_v58 }
  0xa2   : > { %v360_v22 = vpop.permute.xlu1 %359  ;;  %v336_v27 = vpop.permute.xlu0 %335  ;;  %v647_v29 = vadd.f32 %v639_v49, %v619_v15  ;;  %v657_v36 = vld [vmem:[#allocation2 + $0x42] sm:$0xff]  ;;  %v481_v39 = vadd.f32 %v473_v26, %v445_v13  ;;  %v529_v42 = vmul.f32 %v601_v20, %v4622_v18  ;;  %v613_v49 = vmul.f32 %v4629_v25, %v601_v20 }
  0xa3   : > { %v378_v37 = vsel %vm371_vm5, %v4577_v43, %v336_v27  ;;  %v591_v47 = vadd.f32 %v583_v11, %v563_v31  ;;  %v564_v48 = vadd.f32 %v556_v40, %v536_v32  ;;  %v4687_v43 = vld [vmem:[%s5951_s3] ss:$0 sm:$0xff]  ;;  %v641_v50 = vmul.f32 %v4633_v30, %v629_v35 }
  0xa4   : > { %v387_v44 = vsel %vm380_vm6, %v378_v37, %v360_v22  ;;  %v675_v46 = vadd.f32 %v667_v60, %v647_v29  ;;  %v669_v51 = vmul.f32 %v4643_v28, %v657_v36  ;;  %v509_v52 = vadd.f32 %v501_v41, %v481_v39  ;;  %v602_v34 = vld [vmem:[#allocation2 + $0x50] sm:$0xff] }
  0xa5   : > { %424 = vst.msk [vmem:[#allocation2 + $0x71] sm:$0xff] %vm389_vm0, %v387_v44  ;;  %v620_v59 = vadd.f32 %v612_v12, %v591_v47  ;;  %v592_v60 = vadd.f32 %v584_v33, %v564_v48  ;;  %v557_v61 = vmul.f32 %v629_v35, %v4625_v19  ;;  %v585_v1 = vmul.f32 %v657_v36, %v4627_v24  ;;  %v630_v17 = vld [vmem:[#allocation2 + $0x51] sm:$0xff] }
  0xa6   : > { %v712_v53 = vpop.permute.xlu1 %711  ;;  %v338_v56 = vpop.permute.xlu0 %337  ;;  %v689_v57 = vmul.f32 %v4678_v38, %v675_v46  ;;  %v537_v63 = vadd.f32 %v529_v42, %v509_v52  ;;  %v446_v2 = vmul.f32 %v601_v20, %v4602_v54  ;;  %v474_v7 = vmul.f32 %v629_v35, %v4604_v55  ;;  %v658_v31 = vld [vmem:[#allocation2 + $0x52] sm:$0xff] }
  0xa7   : > { %v379_v62 = vsel %vm371_vm5, %v4589_v45, %v338_v56  ;;  %v648_v4 = vadd.f32 %v640_v21, %v620_v59  ;;  %v621_v6 = vadd.f32 %v613_v49, %v592_v60  ;;  %v717_v8 = vsel %vm371_vm5, %v4488_v5, %v712_v53 }
  0xa8   : > { %v703_v3 = vadd.f32 %v4687_v43, %v689_v57  ;;  %v565_v9 = vadd.f32 %v557_v61, %v537_v63  ;;  %v502_v11 = vmul.f32 %v657_v36, %v4606_v58  ;;  %v530_v12 = vmul.f32 %v602_v34, %v4622_v18  ;;  %v603_v41 = vld [vmem:[#allocation2 + $0x60] sm:$0xff] }
  0xa9   : > { %v676_v15 = vadd.f32 %v668_v23, %v648_v4  ;;  %v649_v16 = vadd.f32 %v641_v50, %v621_v6  ;;  %v482_v20 = vadd.f32 %v474_v7, %v446_v2  ;;  %v614_v22 = vmul.f32 %v4629_v25, %v602_v34  ;;  %v631_v53 = vld [vmem:[#allocation2 + $0x61] sm:$0xff] }
  0xaa   : > { %v715_v45 = vpop.permute.xlu1 %714  ;;  %v362_v13 = vpop.permute.xlu0 %361  ;;  %v728_v14 = vrot.slane %v703_v3, 7  ;;  %v593_v26 = vadd.f32 %v585_v1, %v565_v9  ;;  %v642_v33 = vmul.f32 %v4633_v30, %v630_v17  ;;  %v558_v35 = vmul.f32 %v630_v17, %v4625_v19  ;;  %v659_v56 = vld [vmem:[#allocation2 + $0x62] sm:$0xff] }
  0xab   : > { %v718_v21 = vsel %vm380_vm6, %v717_v8, %v715_v45  ;;  %v388_v40 = vsel %vm380_vm6, %v379_v62, %v362_v13  ;;  %v690_v27 = vmul.f32 %v4678_v38, %v676_v15  ;;  %v677_v29 = vadd.f32 %v669_v51, %v649_v16 }
  0xac   : > { %425 = vst.msk [vmem:[#allocation2 + $0x81] sm:$0xff] %vm389_vm0, %v388_v40  ;;  %v744_v5 = vsel %vm727_vm7, %v718_v21, %v728_v14  ;;  %v510_v32 = vadd.f32 %v502_v11, %v482_v20  ;;  %v622_v23 = vadd.f32 %v614_v22, %v593_v26  ;;  %v447_v42 = vmul.f32 %v602_v34, %v4602_v54  ;;  %v604_v3 = vld [vmem:[#allocation2 + $0x70] sm:$0xff] }
  0xad   : > { %3467 = vmatmul.mubr.msk.f32.vlgmr.msra.gmra.mrb[0].mxu0 %vm389_vm0, %v744_v5  ;;  %v704_v36 = vadd.f32 %v4687_v43, %v690_v27  ;;  %v691_v37 = vmul.f32 %v4678_v38, %v677_v29  ;;  %v670_v46 = vmul.f32 %v4643_v28, %v658_v31  ;;  %v475_v47 = vmul.f32 %v630_v17, %v4604_v55  ;;  %v660_v16 = vld [vmem:[#allocation2 + $0x72] sm:$0xff] }
  0xae   : > { %3469 = vmatprep.mubr.msk.f32.mxu0 %vm4365_vm4, %v5958_v0  ;;  %v538_v39 = vadd.f32 %v530_v12, %v510_v32  ;;  %v650_v44 = vadd.f32 %v642_v33, %v622_v23  ;;  %v586_v51 = vmul.f32 %v658_v31, %v4627_v24  ;;  %v503_v59 = vmul.f32 %v658_v31, %v4606_v58 }
  0xaf   : > { %v729_v48 = vrot.slane %v704_v36, 7  ;;  %v705_v49 = vadd.f32 %v4687_v43, %v691_v37  ;;  %v483_v57 = vadd.f32 %v475_v47, %v447_v42  ;;  %v531_v60 = vmul.f32 %v603_v41, %v4622_v18 }
  0xb0   : > { %v566_v50 = vadd.f32 %v558_v35, %v538_v39  ;;  %v678_v52 = vadd.f32 %v670_v46, %v650_v44  ;;  %v615_v63 = vmul.f32 %v4629_v25, %v603_v41  ;;  %v448_v4 = vmul.f32 %v603_v41, %v4602_v54 }
  0xb1   : > { %v730_v61 = vsel %vm727_vm7, %v728_v14, %v729_v48  ;;  %v731_v34 = vrot.slane %v705_v49, 7  ;;  %v511_v2 = vadd.f32 %v503_v59, %v483_v57  ;;  %v643_v7 = vmul.f32 %v4633_v30, %v631_v53  ;;  %v632_v14 = vld [vmem:[#allocation2 + $0x71] sm:$0xff] }
  0xb2   : > { %v594_v62 = vadd.f32 %v586_v51, %v566_v50  ;;  %3470 = vmatmul.mubr.msk.f32.gmra.mrb[2].mxu0 %vm389_vm0, %v730_v61  ;;  %v692_v1 = vmul.f32 %v4678_v38, %v678_v52  ;;  %v671_v8 = vmul.f32 %v4643_v28, %v659_v56  ;;  %v476_v9 = vmul.f32 %v631_v53, %v4604_v55 }
  0xb3   : > { %3472 = vmatprep.mubr.msk.f32.mxu0 %vm4365_vm4, %v5958_v0  ;;  %v732_v11 = vsel %vm727_vm7, %v729_v48, %v731_v34  ;;  %v539_v45 = vadd.f32 %v531_v60, %v511_v2  ;;  %v559_v13 = vmul.f32 %v631_v53, %v4625_v19  ;;  %v504_v20 = vmul.f32 %v659_v56, %v4606_v58  ;;  %v605_v27 = vld [vmem:[#allocation2 + $0x80] sm:$0xff] }
  0xb4   : > { %v623_v6 = vadd.f32 %v615_v63, %v594_v62  ;;  %v706_v12 = vadd.f32 %v4687_v43, %v692_v1  ;;  %v484_v17 = vadd.f32 %v476_v9, %v448_v4  ;;  %v532_v21 = vmul.f32 %v604_v3, %v4622_v18  ;;  %v633_v37 = vld [vmem:[#allocation2 + $0x81] sm:$0xff]  ;;  %v634_v1 = vld [vmem:[#allocation2 + $0x91] sm:$0xff] }
  0xb5   : > { %v567_v26 = vadd.f32 %v559_v13, %v539_v45  ;;  %v587_v22 = vmul.f32 %v659_v56, %v4627_v24  ;;  %v616_v5 = vmul.f32 %v4629_v25, %v604_v3  ;;  %v449_v32 = vmul.f32 %v604_v3, %v4602_v54  ;;  %v661_v49 = vld [vmem:[#allocation2 + $0x82] sm:$0xff] }
  0xb6   : > { %v651_v15 = vadd.f32 %v643_v7, %v623_v6  ;;  %3473 = vmatmul.mubr.msk.f32.gmra.mrb[4].mxu0 %vm389_vm0, %v732_v11  ;;  %v733_v40 = vrot.slane %v706_v12, 7  ;;  %v512_v31 = vadd.f32 %v504_v20, %v484_v17  ;;  %v477_v23 = vmul.f32 %v632_v14, %v4604_v55  ;;  %v662_v7 = vld [vmem:[#allocation2 + $0x92] sm:$0xff] }
  0xb7   : > { %3475 = vmatprep.mubr.msk.f32.mxu0 %vm4365_vm4, %v5958_v0  ;;  %v595_v35 = vadd.f32 %v587_v22, %v567_v26  ;;  %v560_v36 = vmul.f32 %v632_v14, %v4625_v19  ;;  %v505_v39 = vmul.f32 %v660_v16, %v4606_v58  ;;  %v533_v46 = vmul.f32 %v605_v27, %v4622_v18  ;;  %v606_v18 = vld [vmem:[#allocation2 + $0x90] sm:$0xff] }
  0xb8   : > { %v679_v29 = vadd.f32 %v671_v8, %v651_v15  ;;  %v734_v33 = vsel %vm727_vm7, %v731_v34, %v733_v40  ;;  %v540_v42 = vadd.f32 %v532_v21, %v512_v31  ;;  %v485_v44 = vadd.f32 %v477_v23, %v449_v32 }
  0xb9   : > { %v624_v47 = vadd.f32 %v616_v5, %v595_v35  ;;  %v644_v54 = vmul.f32 %v4633_v30, %v632_v14  ;;  %v588_v55 = vmul.f32 %v660_v16, %v4627_v24  ;;  %v617_v48 = vmul.f32 %v4629_v25, %v605_v27 }
  0xba   : > { %v693_v41 = vmul.f32 %v4678_v38, %v679_v29  ;;  %3476 = vmatmul.mubr.msk.f32.gmra.mrb[6].mxu0 %vm389_vm0, %v734_v33  ;;  %v568_v50 = vadd.f32 %v560_v36, %v540_v42  ;;  %v513_v51 = vadd.f32 %v505_v39, %v485_v44  ;;  %v561_v52 = vmul.f32 %v633_v37, %v4625_v19 }
  0xbb   : > { %3478 = vmatprep.mubr.msk.f32.mxu0 %vm4365_vm4, %v5958_v0  ;;  %v652_v53 = vadd.f32 %v644_v54, %v624_v47  ;;  %v672_v56 = vmul.f32 %v4643_v28, %v660_v16  ;;  %v645_v57 = vmul.f32 %v4633_v30, %v633_v37  ;;  %v589_v34 = vmul.f32 %v661_v49, %v4627_v24 }
  0xbc   : > { %v707_v58 = vadd.f32 %v4687_v43, %v693_v41  ;;  %v596_v60 = vadd.f32 %v588_v55, %v568_v50  ;;  %v541_v61 = vadd.f32 %v533_v46, %v513_v51  ;;  %v618_v63 = vmul.f32 %v4629_v25, %v606_v18 }
  0xbd   : > { %v680_v62 = vadd.f32 %v672_v56, %v652_v53  ;;  %v673_v19 = vmul.f32 %v4643_v28, %v661_v49  ;;  %v646_v9 = vmul.f32 %v4633_v30, %v634_v1  ;;  %v674_v45 = vmul.f32 %v4643_v28, %v662_v7 }
  0xbe   : > { %v735_v59 = vrot.slane %v707_v58, 7  ;;  %v625_v3 = vadd.f32 %v617_v48, %v596_v60  ;;  %v569_v4 = vadd.f32 %v561_v52, %v541_v61 }
  0xbf   : > { %v694_v6 = vmul.f32 %v4678_v38, %v680_v62 }
  0xc0   : > { %v736_v2 = vsel %vm727_vm7, %v733_v40, %v735_v59  ;;  %v653_v8 = vadd.f32 %v645_v57, %v625_v3  ;;  %v597_v24 = vadd.f32 %v589_v34, %v569_v4 }
  0xc1   : > { %3479 = vmatmul.mubr.msk.f32.gmra.mrb[8].mxu0 %vm389_vm0, %v736_v2  ;;  %v708_v25 = vadd.f32 %v4687_v43, %v694_v6 }
  0xc2   : > { %3481 = vmatprep.mubr.msk.f32.mxu0 %vm4365_vm4, %v5958_v0  ;;  %v681_v11 = vadd.f32 %v673_v19, %v653_v8  ;;  %v626_v12 = vadd.f32 %v618_v63, %v597_v24 }
  0xc3   : > { %v737_v13 = vrot.slane %v708_v25, 7 }
  0xc4   : > { %v695_v14 = vmul.f32 %v4678_v38, %v681_v11  ;;  %v654_v15 = vadd.f32 %v646_v9, %v626_v12 }
  0xc5   : > { %v738_v16 = vsel %vm727_vm7, %v735_v59, %v737_v13 }
  0xc6   : > { %3482 = vmatmul.mubr.msk.f32.gmra.mrb[10].mxu0 %vm389_vm0, %v738_v16  ;;  %v709_v17 = vadd.f32 %v4687_v43, %v695_v14  ;;  %v682_v20 = vadd.f32 %v674_v45, %v654_v15 }
  0xc7   : > { %3484 = vmatprep.mubr.msk.f32.mxu0 %vm4365_vm4, %v5958_v0 }
  0xc8   : > { %v739_v30 = vrot.slane %v709_v17, 7  ;;  %v696_v21 = vmul.f32 %v4678_v38, %v682_v20 }
  0xca   : > { %v740_v40 = vsel %vm727_vm7, %v737_v13, %v739_v30  ;;  %v710_v28 = vadd.f32 %v4687_v43, %v696_v21 }
  0xcb   : > { %3485 = vmatmul.mubr.msk.f32.gmra.mrb[12].mxu0 %vm389_vm0, %v740_v40 }
  0xcc   : > { %3487 = vmatprep.mubr.msk.f32.mxu0 %vm4365_vm4, %v5958_v0  ;;  %v741_v26 = vrot.slane %v710_v28, 7 }
  0xce   : > { %v742_v22 = vsel %vm727_vm7, %v739_v30, %v741_v26 }
  0xcf   : > { %3488 = vmatmul.mubr.msk.f32.gmra.mrb[14].mxu0 %vm389_vm0, %v742_v22 }
  0xd0   : > { %3490 = vmatprep.mubr.msk.f32.mxu0 %vm4365_vm4, %v5958_v0 }
  0xd3   : > { %3491 = vmatmul.mubr.msk.f32.gmra.mrb[16].mxu0 %vm389_vm0, %v741_v26 }
  0xd4   : > { %3556 = vmatprep.mubr.msk.f32.mxu0 %vm4365_vm4, %v5958_v0 }
 0x180   : > { %v4791_v38 = vpop.f32.mrb[0].mxu0 }
 0x181   : > { %895 = vrot.lane.b32.xlu0 %v4791_v38, %s4366_s22  ;;  %v3468_v43 = vpop.f32.mrb[1].mxu0 }
 0x185   : > { %v4795_v5 = vpop.f32.mrb[2].mxu0 }
 0x186   : > { %897 = vrot.lane.b32.xlu1 %v4795_v5, %s4366_s22  ;;  %v3471_v27 = vpop.f32.mrb[3].mxu0  ;;  %v4801_v29 = vpack.i.bf16 %v4795_v5, %v4791_v38 }
 0x189   : > { %v4803_v31 = vpop.f32.mrb[4].mxu0 }
 0x18a   : > { %899 = vrot.lane.b32.xlu0 %v4803_v31, %s4366_s22  ;;  %v3474_v32 = vpop.f32.mrb[5].mxu0 }
 0x18d   : > { %v4807_v23 = vpop.f32.mrb[6].mxu0 }
 0x18e   : > { %901 = vrot.lane.b32.xlu1 %v4807_v23, %s4366_s22  ;;  %v3477_v33 = vpop.f32.mrb[7].mxu0  ;;  %v4813_v35 = vpack.i.bf16 %v4807_v23, %v4803_v31 }
 0x194   : > { %v4815_v36 = vpop.f32.mrb[8].mxu0 }
 0x195   : > { %903 = vrot.lane.b32.xlu0 %v4815_v36, %s4366_s22  ;;  %v3480_v37 = vpop.f32.mrb[9].mxu0 }
 0x199   : > { %v4819_v39 = vpop.f32.mrb[10].mxu0 }
 0x19a   : > { %905 = vrot.lane.b32.xlu1 %v4819_v39, %s4366_s22  ;;  %v3483_v41 = vpop.f32.mrb[11].mxu0  ;;  %v4825_v42 = vpack.i.bf16 %v4819_v39, %v4815_v36 }
 0x19e   : > { %v4827_v44 = vpop.f32.mrb[12].mxu0 }
 0x19f   : > { %907 = vrot.lane.b32.xlu0 %v4827_v44, %s4366_s22  ;;  %v3486_v46 = vpop.f32.mrb[13].mxu0 }
 0x1a2   : > { %v4831_v47 = vpop.f32.mrb[14].mxu0 }
 0x1a3   : > { %915 = vrot.lane.b32.xlu0 %v4795_v5, %s4367_s23  ;;  %909 = vrot.lane.b32.xlu1 %v4831_v47, %s4366_s22  ;;  %v3489_v54 = vpop.f32.mrb[15].mxu0  ;;  %v4838_v55 = vpack.i.bf16 %v4831_v47, %v4827_v44 }
 0x1a6   : > { %v4840_v48 = vpop.f32.mrb[16].mxu0 }
 0x1a7   : > { %933 = vrot.lane.b32.xlu0 %v4795_v5, %s4368_s27  ;;  %913 = vrot.lane.b32.xlu1 %v4791_v38, %s4367_s23  ;;  %v3492_v49 = vpop.f32.mrb[17].mxu0 }
 0x1ab   : > { %931 = vrot.lane.b32.xlu1 %v4791_v38, %s4368_s27  ;;  %911 = vrot.lane.b32.xlu0 %v4840_v48, %s4366_s22 }
 0x1af   : > { %917 = vrot.lane.b32.xlu1 %v4803_v31, %s4367_s23  ;;  %919 = vrot.lane.b32.xlu0 %v4807_v23, %s4367_s23 }
 0x1b3   : > { %935 = vrot.lane.b32.xlu1 %v4803_v31, %s4368_s27  ;;  %937 = vrot.lane.b32.xlu0 %v4807_v23, %s4368_s27 }
 0x1b7   : > { %921 = vrot.lane.b32.xlu1 %v4815_v36, %s4367_s23  ;;  %923 = vrot.lane.b32.xlu0 %v4819_v39, %s4367_s23 }
 0x1bb   : > { %939 = vrot.lane.b32.xlu1 %v4815_v36, %s4368_s27  ;;  %941 = vrot.lane.b32.xlu0 %v4819_v39, %s4368_s27 }
 0x1bf   : > { %4050 = vrot.lane.b32.xlu1 %v4801_v29, %s4369_s28  ;;  %927 = vrot.lane.b32.xlu0 %v4831_v47, %s4367_s23 }
 0x1c3   : > { %925 = vrot.lane.b32.xlu1 %v4827_v44, %s4367_s23 }
 0x1c7   : > { %943 = vrot.lane.b32.xlu1 %v4827_v44, %s4368_s27 }
 0x1cb   : > { %4060 = vrot.lane.b32.xlu1 %v4813_v35, %s4369_s28 }
 0x1cf   : > { %929 = vrot.lane.b32.xlu1 %v4840_v48, %s4367_s23 }
 0x1d3   : > { %4070 = vrot.lane.b32.xlu1 %v4825_v42, %s4369_s28 }
 0x1d7   : > { %4080 = vrot.lane.b32.xlu1 %v4838_v55, %s4369_s28 }
 0x1db   : > { %965 = vrot.lane.b32.xlu1 %v4840_v48, %s4369_s28 }
 0x1f3   : > { %v4876_v58 = vpop.permute.xlu0 %895 }
 0x1f8   : > { %v4878_v50 = vpop.permute.xlu1 %897 }
 0x1f9   : > { %v4882_v51 = vpack.i.bf16 %v4878_v50, %v4876_v58 }
 0x1fb   : > { %4055 = vrot.lane.b32.xlu0 %v4882_v51, %s4369_s28 }
 0x1fc   : > { %v4888_v52 = vpop.permute.xlu0 %899 }
 0x1ff   : > { %945 = vrot.lane.b32.xlu0 %v4831_v47, %s4368_s27 }
 0x200   : > { %v4890_v18 = vpop.permute.xlu1 %901 }
 0x201   : > { %v4894_v53 = vpack.i.bf16 %v4890_v18, %v4888_v52 }
 0x203   : > { %4065 = vrot.lane.b32.xlu0 %v4894_v53, %s4369_s28 }
 0x207   : > { %947 = vrot.lane.b32.xlu0 %v4840_v48, %s4368_s27  ;;  %v4900_v56 = vpop.permute.xlu0 %903 }
 0x20c   : > { %v4902_v57 = vpop.permute.xlu1 %905 }
 0x20d   : > { %v4906_v59 = vpack.i.bf16 %v4902_v57, %v4900_v56 }
 0x20f   : > { %4075 = vrot.lane.b32.xlu0 %v4906_v59, %s4369_s28 }
 0x211   : > { %v4910_v60 = vpop.permute.xlu0 %907 }
 0x215   : > { %v4912_v61 = vpop.permute.xlu1 %909  ;;  %v4914_v34 = vpop.permute.xlu0 %915 }
 0x216   : > { %v4084_v62 = vpack.i.bf16 %v4912_v61, %v4910_v60 }
 0x218   : > { %4085 = vrot.lane.b32.xlu0 %v4084_v62, %s4369_s28 }
 0x219   : > { %v4919_v63 = vpop.permute.xlu1 %913  ;;  %v4921_v1 = vpop.permute.xlu0 %933 }
 0x21a   : > { %v4925_v2 = vpack.i.bf16 %v4914_v34, %v4919_v63 }
 0x21c   : > { %4090 = vrot.lane.b32.xlu1 %v4925_v2, %s4369_s28 }
 0x21d   : > { %v4929_v3 = vpop.permute.xlu1 %931  ;;  %v4931_v19 = vpop.permute.xlu0 %911 }
 0x21e   : > { %1130 = vrot.lane.b32.xlu0 %v4931_v19, %s4369_s28  ;;  %v4094_v4 = vpack.i.bf16 %v4921_v1, %v4929_v3 }
 0x221   : > { %v4937_v6 = vpop.permute.xlu1 %917  ;;  %v4939_v7 = vpop.permute.xlu0 %919 }
 0x222   : > { %4095 = vrot.lane.b32.xlu0 %v4094_v4, %s4369_s28  ;;  %v4944_v8 = vpack.i.bf16 %v4939_v7, %v4937_v6 }
 0x224   : > { %4100 = vrot.lane.b32.xlu1 %v4944_v8, %s4369_s28 }
 0x225   : > { %v4948_v24 = vpop.permute.xlu1 %935  ;;  %v4950_v9 = vpop.permute.xlu0 %937 }
 0x226   : > { %v4104_v25 = vpack.i.bf16 %v4950_v9, %v4948_v24 }
 0x228   : > { %4105 = vrot.lane.b32.xlu0 %v4104_v25, %s4369_s28 }
 0x229   : > { %v4955_v11 = vpop.permute.xlu1 %921  ;;  %v4957_v12 = vpop.permute.xlu0 %923 }
 0x22a   : > { %v4961_v45 = vpack.i.bf16 %v4957_v12, %v4955_v11 }
 0x22c   : > { %4110 = vrot.lane.b32.xlu1 %v4961_v45, %s4369_s28 }
 0x22d   : > { %v4965_v13 = vpop.permute.xlu1 %939  ;;  %v4967_v14 = vpop.permute.xlu0 %941 }
 0x22e   : > { %v4114_v15 = vpack.i.bf16 %v4967_v14, %v4965_v13 }
 0x230   : > { %4115 = vrot.lane.b32.xlu0 %v4114_v15, %s4369_s28 }
 0x231   : > { %v4051_v16 = vpop.permute.xlu1 %4050  ;;  %v4978_v40 = vpop.permute.xlu0 %927 }
 0x232   : > { %v4053_v17 = vunpack.i.h.bf16 %v4051_v16  ;;  %v4052_v20 = vunpack.i.l.bf16 %v4051_v16 }
 0x234   : > { %v3907_v21 = vpack.c.bf16 %v4053_v17, %v4052_v20 }
 0x235   : > { %v4980_v28 = vpop.permute.xlu1 %925 }
 0x236   : > { %3909 = vmatpush3.bf16.xpose.msk.msra.mxu1 %vm4974_vm9, %v3907_v21  ;;  %v4986_v26 = vpack.i.bf16 %v4978_v40, %v4980_v28 }
 0x237   : > { %3910 = vmatprep.subr.bf16.mxu1 %v5956_v10 }
 0x238   : > { %4120 = vrot.lane.b32.xlu1 %v4986_v26, %s4369_s28 }
 0x239   : > { %v4991_v22 = vpop.permute.xlu1 %943 }
 0x23d   : > { %v4061_v43 = vpop.permute.xlu1 %4060 }
 0x23e   : > { %v4063_v27 = vunpack.i.h.bf16 %v4061_v43  ;;  %v4062_v32 = vunpack.i.l.bf16 %v4061_v43 }
 0x240   : > { %v3911_v33 = vpack.c.bf16 %v4063_v27, %v4062_v32 }
 0x241   : > { %v4993_v37 = vpop.permute.xlu1 %929 }
 0x242   : > { %3913 = vmatpush3.bf16.xpose.msk.msra.mxu1 %vm4974_vm9, %v3911_v33  ;;  %1294 = vrot.lane.b32.xlu1 %v4993_v37, %s4369_s28 }
 0x243   : > { %3914 = vmatprep.subr.bf16.mxu1 %v5956_v10 }
 0x245   : > { %v4071_v41 = vpop.permute.xlu1 %4070 }
 0x246   : > { %v4073_v46 = vunpack.i.h.bf16 %v4071_v41  ;;  %v4072_v54 = vunpack.i.l.bf16 %v4071_v41  ;;  %4135 = vrot.lane.b32.xlu1 %v4882_v51, %s4364_s20 }
 0x248   : > { %v3915_v49 = vpack.c.bf16 %v4073_v46, %v4072_v54 }
 0x249   : > { %v4081_v16 = vpop.permute.xlu1 %4080 }
 0x24a   : > { %3917 = vmatpush3.bf16.xpose.msk.msra.mxu1 %vm4974_vm9, %v3915_v49  ;;  %4145 = vrot.lane.b32.xlu1 %v4894_v53, %s4364_s20  ;;  %v4083_v17 = vunpack.i.h.bf16 %v4081_v16  ;;  %v4082_v20 = vunpack.i.l.bf16 %v4081_v16 }
 0x24b   : > { %3918 = vmatprep.subr.bf16.mxu1 %v5956_v10 }
 0x24c   : > { %v3919_v21 = vpack.c.bf16 %v4083_v17, %v4082_v20 }
 0x24d   : > { %v966_v51 = vpop.permute.xlu1 %965 }
 0x24e   : > { %4155 = vrot.lane.b32.xlu1 %v4906_v59, %s4364_s20 }
 0x252   : > { %3921 = vmatpush3.bf16.xpose.msk.msra.mxu1 %vm4974_vm9, %v3919_v21  ;;  %4165 = vrot.lane.b32.xlu1 %v4084_v62, %s4364_s20 }
 0x253   : > { %3509 = vmatprep.subr.mxu1 %v5958_v0 }
 0x256   : > { %2128 = vrot.lane.b32.xlu1 %v4840_v48, %s4364_s20 }
 0x25a   : > { %3510 = vmatpush3.xpose.msk.msra.mxu1 %vm967_vm8, %v966_v51  ;;  %4175 = vrot.lane.b32.xlu1 %v4094_v4, %s4364_s20 }
 0x25b   : > { %3938 = vmatprep.subr.bf16.mxu1 %v5956_v10 }
 0x25d   : > { %3512 = vmatmul.mubr.msk.f32.vlgmr.msra.gmra.mrb[0].mxu1 %vm967_vm8, %v4791_v38 }
 0x25e   : > { %4185 = vrot.lane.b32.xlu1 %v4104_v25, %s4364_s20  ;;  %3514 = vmatprep.mubr.msk.f32.mxu1 %vm4365_vm4, %v5958_v0 }
 0x261   : > { %3515 = vmatmul.mubr.msk.f32.gmra.mrb[2].mxu1 %vm967_vm8, %v4795_v5 }
 0x262   : > { %4195 = vrot.lane.b32.xlu1 %v4114_v15, %s4364_s20  ;;  %3517 = vmatprep.mubr.msk.f32.mxu1 %vm4365_vm4, %v5958_v0 }
 0x265   : > { %3518 = vmatmul.mubr.msk.f32.gmra.mrb[4].mxu1 %vm967_vm8, %v4803_v31 }
 0x266   : > { %3520 = vmatprep.mubr.msk.f32.mxu1 %vm4365_vm4, %v5958_v0 }
 0x269   : > { %3521 = vmatmul.mubr.msk.f32.gmra.mrb[6].mxu1 %vm967_vm8, %v4807_v23 }
 0x26a   : > { %3523 = vmatprep.mubr.msk.f32.mxu1 %vm4365_vm4, %v5958_v0 }
 0x26d   : > { %v4056_v38 = vpop.permute.xlu0 %4055  ;;  %3524 = vmatmul.mubr.msk.f32.gmra.mrb[8].mxu1 %vm967_vm8, %v4815_v36 }
 0x26e   : > { %v4058_v5 = vunpack.i.h.bf16 %v4056_v38  ;;  %v4057_v53 = vunpack.i.l.bf16 %v4056_v38  ;;  %3526 = vmatprep.mubr.msk.f32.mxu1 %vm4365_vm4, %v5958_v0 }
 0x270   : > { %v3923_v59 = vpack.c.bf16 %v4058_v5, %v4057_v53 }
 0x271   : > { %v5040_v31 = vpop.permute.xlu0 %945  ;;  %3527 = vmatmul.mubr.msk.f32.gmra.mrb[10].mxu1 %vm967_vm8, %v4819_v39 }
 0x272   : > { %3925 = vmatpush3.bf16.xpose.msk.msra.mxu0 %vm4974_vm9, %v3923_v59  ;;  %v5048_v23 = vpack.i.bf16 %v5040_v31, %v4991_v22  ;;  %3529 = vmatprep.mubr.msk.f32.mxu1 %vm4365_vm4, %v5958_v0 }
 0x273   : > { %3926 = vmatprep.subr.bf16.mxu0 %v5956_v10 }
 0x274   : > { %4125 = vrot.lane.b32.xlu0 %v5048_v23, %s4369_s28 }
 0x275   : > { %v4066_v36 = vpop.permute.xlu0 %4065  ;;  %3530 = vmatmul.mubr.msk.f32.gmra.mrb[12].mxu1 %vm967_vm8, %v4827_v44 }
 0x276   : > { %v4068_v39 = vunpack.i.h.bf16 %v4066_v36  ;;  %v4067_v62 = vunpack.i.l.bf16 %v4066_v36  ;;  %3532 = vmatprep.mubr.msk.f32.mxu1 %vm4365_vm4, %v5958_v0 }
 0x278   : > { %v3927_v4 = vpack.c.bf16 %v4068_v39, %v4067_v62 }
 0x279   : > { %v5059_v25 = vpop.permute.xlu0 %947  ;;  %3533 = vmatmul.mubr.msk.f32.gmra.mrb[14].mxu1 %vm967_vm8, %v4831_v47 }
 0x27a   : > { %1458 = vrot.lane.b32.xlu0 %v5059_v25, %s4369_s28  ;;  %3535 = vmatprep.mubr.msk.f32.mxu1 %vm4365_vm4, %v5958_v0 }
 0x27b   : > { %3929 = vmatpush3.bf16.xpose.msk.msra.mxu0 %vm4974_vm9, %v3927_v4 }
 0x27c   : > { %3930 = vmatprep.subr.bf16.mxu0 %v5956_v10 }
 0x27d   : > { %3536 = vmatmul.mubr.msk.f32.gmra.mrb[16].mxu1 %vm967_vm8, %v4840_v48 }
 0x27e   : > { %4130 = vrot.lane.b32.xlu0 %v4801_v29, %s4364_s20  ;;  %3601 = vmatprep.mubr.msk.f32.mxu1 %vm4365_vm4, %v5958_v0 }
 0x281   : > { %v4076_v44 = vpop.permute.xlu0 %4075 }
 0x282   : > { %4140 = vrot.lane.b32.xlu0 %v4813_v35, %s4364_s20  ;;  %v4078_v47 = vunpack.i.h.bf16 %v4076_v44  ;;  %v4077_v15 = vunpack.i.l.bf16 %v4076_v44 }
 0x284   : > { %v3931_v43 = vpack.c.bf16 %v4078_v47, %v4077_v15 }
 0x286   : > { %4150 = vrot.lane.b32.xlu0 %v4825_v42, %s4364_s20  ;;  %3933 = vmatpush3.bf16.xpose.msk.msra.mxu0 %vm4974_vm9, %v3931_v43 }
 0x287   : > { %3934 = vmatprep.subr.bf16.mxu0 %v5956_v10 }
 0x28a   : > { %4160 = vrot.lane.b32.xlu0 %v4838_v55, %s4364_s20  ;;  %v4086_v29 = vpop.permute.xlu0 %4085 }
 0x28b   : > { %v4088_v48 = vunpack.i.h.bf16 %v4086_v29  ;;  %v4087_v27 = vunpack.i.l.bf16 %v4086_v29 }
 0x28d   : > { %v3935_v32 = vpack.c.bf16 %v4088_v48, %v4087_v27 }
 0x28e   : > { %4170 = vrot.lane.b32.xlu0 %v4925_v2, %s4364_s20  ;;  %v4091_v35 = vpop.permute.xlu1 %4090 }
 0x28f   : > { %v4093_v33 = vunpack.i.h.bf16 %v4091_v35  ;;  %v4092_v41 = vunpack.i.l.bf16 %v4091_v35  ;;  %3937 = vmatpush3.bf16.xpose.msk.msra.mxu0 %vm4974_vm9, %v3935_v32 }
 0x290   : > { %v1131_v42 = vpop.permute.xlu0 %1130  ;;  %3554 = vmatprep.subr.mxu0 %v5958_v0 }
 0x291   : > { %v3939_v46 = vpack.c.bf16 %v4093_v33, %v4092_v41 }
 0x292   : > { %4180 = vrot.lane.b32.xlu0 %v4944_v8, %s4364_s20 }
 0x293   : > { %3941 = vmatpush3.bf16.xpose.msk.msra.mxu1 %vm4974_vm9, %v3939_v46 }
 0x294   : > { %v4096_v55 = vpop.permute.xlu0 %4095  ;;  %3942 = vmatprep.subr.bf16.mxu1 %v5956_v10 }
 0x295   : > { %v4098_v2 = vunpack.i.h.bf16 %v4096_v55  ;;  %v4097_v54 = vunpack.i.l.bf16 %v4096_v55 }
 0x296   : > { %4190 = vrot.lane.b32.xlu0 %v4961_v45, %s4364_s20  ;;  %v4101_v49 = vpop.permute.xlu1 %4100 }
 0x297   : > { %v4103_v16 = vunpack.i.h.bf16 %v4101_v49  ;;  %v4102_v17 = vunpack.i.l.bf16 %v4101_v49  ;;  %3555 = vmatpush3.xpose.msk.msra.mxu0 %vm967_vm8, %v1131_v42  ;;  %v3955_v20 = vpack.c.bf16 %v4098_v2, %v4097_v54 }
 0x298   : > { %3954 = vmatprep.subr.bf16.mxu0 %v5956_v10 }
 0x299   : > { %v3943_v8 = vpack.c.bf16 %v4103_v16, %v4102_v17 }
 0x29a   : > { %2293 = vrot.lane.b32.xlu0 %v4931_v19, %s4364_s20  ;;  %v4106_v21 = vpop.permute.xlu0 %4105  ;;  %3557 = vmatmul.mubr.msk.f32.vlgmr.msra.gmra.mrb[18].mxu0 %vm967_vm8, %v4876_v58 }
 0x29b   : > { %3945 = vmatpush3.bf16.xpose.msk.msra.mxu1 %vm4974_vm9, %v3943_v8  ;;  %3957 = vmatpush3.bf16.xpose.msk.msra.mxu0 %vm4974_vm9, %v3955_v20  ;;  %v4108_v45 = vunpack.i.h.bf16 %v4106_v21  ;;  %v4107_v51 = vunpack.i.l.bf16 %v4106_v21 }
 0x29c   : > { %3559 = vmatprep.mubr.msk.f32.mxu0 %vm4365_vm4, %v5958_v0  ;;  %3946 = vmatprep.subr.bf16.mxu1 %v5956_v10 }
 0x29d   : > { %3958 = vmatprep.subr.bf16.mxu0 %v5956_v10  ;;  %v3959_v53 = vpack.c.bf16 %v4108_v45, %v4107_v51 }
 0x29e   : > { %v4111_v38 = vpop.permute.xlu1 %4110  ;;  %3560 = vmatmul.mubr.msk.f32.gmra.mrb[20].mxu0 %vm967_vm8, %v4878_v50 }
 0x29f   : > { %v4113_v58 = vunpack.i.h.bf16 %v4111_v38  ;;  %v4112_v5 = vunpack.i.l.bf16 %v4111_v38  ;;  %3562 = vmatprep.mubr.msk.f32.mxu0 %vm4365_vm4, %v5958_v0 }
 0x2a1   : > { %v3947_v59 = vpack.c.bf16 %v4113_v58, %v4112_v5 }
 0x2a2   : > { %v4116_v36 = vpop.permute.xlu0 %4115  ;;  %3563 = vmatmul.mubr.msk.f32.gmra.mrb[22].mxu0 %vm967_vm8, %v4888_v52 }
 0x2a3   : > { %3949 = vmatpush3.bf16.xpose.msk.msra.mxu1 %vm4974_vm9, %v3947_v59  ;;  %3961 = vmatpush3.bf16.xpose.msk.msra.mxu0 %vm4974_vm9, %v3959_v53  ;;  %v4118_v50 = vunpack.i.h.bf16 %v4116_v36  ;;  %v4117_v39 = vunpack.i.l.bf16 %v4116_v36 }
 0x2a4   : > { %3565 = vmatprep.mubr.msk.f32.mxu0 %vm4365_vm4, %v5958_v0  ;;  %3962 = vmatprep.subr.bf16.mxu0 %v5956_v10 }
 0x2a5   : > { %3950 = vmatprep.subr.bf16.mxu1 %v5956_v10  ;;  %v3963_v52 = vpack.c.bf16 %v4118_v50, %v4117_v39 }
 0x2a6   : > { %3566 = vmatmul.mubr.msk.f32.gmra.mrb[24].mxu0 %vm967_vm8, %v4890_v18 }
 0x2a7   : > { %3568 = vmatprep.mubr.msk.f32.mxu0 %vm4365_vm4, %v5958_v0 }
 0x2aa   : > { %v4121_v62 = vpop.permute.xlu1 %4120  ;;  %3569 = vmatmul.mubr.msk.f32.gmra.mrb[26].mxu0 %vm967_vm8, %v4900_v56 }
 0x2ab   : > { %v4123_v4 = vunpack.i.h.bf16 %v4121_v62  ;;  %v4122_v44 = vunpack.i.l.bf16 %v4121_v62  ;;  %3965 = vmatpush3.bf16.xpose.msk.msra.mxu0 %vm4974_vm9, %v3963_v52  ;;  %3571 = vmatprep.mubr.msk.f32.mxu0 %vm4365_vm4, %v5958_v0 }
 0x2ac   : > { %3966 = vmatprep.subr.bf16.mxu0 %v5956_v10 }
 0x2ad   : > { %v3951_v47 = vpack.c.bf16 %v4123_v4, %v4122_v44 }
 0x2ae   : > { %3572 = vmatmul.mubr.msk.f32.gmra.mrb[28].mxu0 %vm967_vm8, %v4902_v57 }
 0x2af   : > { %3953 = vmatpush3.bf16.xpose.msk.msra.mxu1 %vm4974_vm9, %v3951_v47  ;;  %3574 = vmatprep.mubr.msk.f32.mxu0 %vm4365_vm4, %v5958_v0 }
 0x2b0   : > { %3599 = vmatprep.subr.mxu1 %v5958_v0 }
 0x2b2   : > { %3575 = vmatmul.mubr.msk.f32.gmra.mrb[30].mxu0 %vm967_vm8, %v4910_v60 }
 0x2b3   : > { %3577 = vmatprep.mubr.msk.f32.mxu0 %vm4365_vm4, %v5958_v0 }
 0x2b4   : > { %v1295_v18 = vpop.permute.xlu1 %1294 }
 0x2b6   : > { %3578 = vmatmul.mubr.msk.f32.gmra.mrb[32].mxu0 %vm967_vm8, %v4912_v61 }
 0x2b7   : > { %3600 = vmatpush3.xpose.msk.msra.mxu1 %vm967_vm8, %v1295_v18  ;;  %3580 = vmatprep.mubr.msk.f32.mxu0 %vm4365_vm4, %v5958_v0 }
 0x2b8   : > { %3970 = vmatprep.subr.bf16.mxu1 %v5956_v10  ;;  %v4136_v61 = vpop.permute.xlu1 %4135 }
 0x2ba   : > { %3581 = vmatmul.mubr.msk.f32.gmra.mrb[34].mxu0 %vm967_vm8, %v4931_v19  ;;  %3602 = vmatmul.mubr.msk.f32.vlgmr.msra.gmra.mrb[18].mxu1 %vm967_vm8, %v4919_v63 }
 0x2bb   : > { %3604 = vmatprep.mubr.msk.f32.mxu1 %vm4365_vm4, %v5958_v0  ;;  %3646 = vmatprep.mubr.msk.f32.mxu0 %vm4365_vm4, %v5958_v0 }
 0x2bc   : > { %v4146_v19 = vpop.permute.xlu1 %4145 }
 0x2bd   : > { %v4148_v48 = vunpack.i.h.bf16 %v4146_v19  ;;  %v4147_v30 = vunpack.i.l.bf16 %v4146_v19 }
 0x2be   : > { %3605 = vmatmul.mubr.msk.f32.gmra.mrb[20].mxu1 %vm967_vm8, %v4914_v34 }
 0x2bf   : > { %3607 = vmatprep.mubr.msk.f32.mxu1 %vm4365_vm4, %v5958_v0  ;;  %v3986_v46 = vpack.c.bf16 %v4148_v48, %v4147_v30 }
 0x2c0   : > { %v4156_v43 = vpop.permute.xlu1 %4155 }
 0x2c1   : > { %v4158_v33 = vunpack.i.h.bf16 %v4156_v43  ;;  %v4157_v41 = vunpack.i.l.bf16 %v4156_v43 }
 0x2c2   : > { %3608 = vmatmul.mubr.msk.f32.gmra.mrb[22].mxu1 %vm967_vm8, %v4937_v6  ;;  %v4138_v6 = vunpack.i.h.bf16 %v4136_v61 }
 0x2c3   : > { %3610 = vmatprep.mubr.msk.f32.mxu1 %vm4365_vm4, %v5958_v0  ;;  %v3989_v49 = vpack.c.bf16 %v4158_v33, %v4157_v41 }
 0x2c4   : > { %v4166_v54 = vpop.permute.xlu1 %4165 }
 0x2c5   : > { %v4168_v17 = vunpack.i.h.bf16 %v4166_v54  ;;  %v4167_v20 = vunpack.i.l.bf16 %v4166_v54 }
 0x2c6   : > { %3611 = vmatmul.mubr.msk.f32.gmra.mrb[24].mxu1 %vm967_vm8, %v4939_v7  ;;  %v4137_v7 = vunpack.i.l.bf16 %v4136_v61 }
 0x2c7   : > { %3613 = vmatprep.mubr.msk.f32.mxu1 %vm4365_vm4, %v5958_v0  ;;  %v3992_v51 = vpack.c.bf16 %v4168_v17, %v4167_v20 }
 0x2c8   : > { %v3983_v15 = vpack.c.bf16 %v4138_v6, %v4137_v7 }
 0x2ca   : > { %3614 = vmatmul.mubr.msk.f32.gmra.mrb[26].mxu1 %vm967_vm8, %v4955_v11 }
 0x2cb   : > { %3616 = vmatprep.mubr.msk.f32.mxu1 %vm4365_vm4, %v5958_v0 }
 0x2ce   : > { %3617 = vmatmul.mubr.msk.f32.gmra.mrb[28].mxu1 %vm967_vm8, %v4957_v12 }
 0x2cf   : > { %3619 = vmatprep.mubr.msk.f32.mxu1 %vm4365_vm4, %v5958_v0 }
 0x2d2   : > { %3620 = vmatmul.mubr.msk.f32.gmra.mrb[30].mxu1 %vm967_vm8, %v4980_v28 }
 0x2d3   : > { %3622 = vmatprep.mubr.msk.f32.mxu1 %vm4365_vm4, %v5958_v0 }
 0x2d6   : > { %3623 = vmatmul.mubr.msk.f32.gmra.mrb[32].mxu1 %vm967_vm8, %v4978_v40 }
 0x2d7   : > { %3625 = vmatprep.mubr.msk.f32.mxu1 %vm4365_vm4, %v5958_v0 }
 0x2da   : > { %3626 = vmatmul.mubr.msk.f32.gmra.mrb[34].mxu1 %vm967_vm8, %v4993_v37 }
 0x2db   : > { %3691 = vmatprep.mubr.msk.f32.mxu1 %vm4365_vm4, %v5958_v0 }
 0x2e6   : > { %v4126_v56 = vpop.permute.xlu0 %4125 }
 0x2e7   : > { %v4128_v57 = vunpack.i.h.bf16 %v4126_v56  ;;  %v4127_v60 = vunpack.i.l.bf16 %v4126_v56 }
 0x2e9   : > { %v3967_v34 = vpack.c.bf16 %v4128_v57, %v4127_v60 }
 0x2eb   : > { %3969 = vmatpush3.bf16.xpose.msk.msra.mxu0 %vm4974_vm9, %v3967_v34 }
 0x2ec   : > { %v1459_v63 = vpop.permute.xlu0 %1458  ;;  %3644 = vmatprep.subr.mxu0 %v5958_v0 }
 0x2f0   : > { %v4131_v11 = vpop.permute.xlu0 %4130 }
 0x2f1   : > { %v4133_v12 = vunpack.i.h.bf16 %v4131_v11  ;;  %v4132_v40 = vunpack.i.l.bf16 %v4131_v11 }
 0x2f3   : > { %v3971_v28 = vpack.c.bf16 %v4133_v12, %v4132_v40  ;;  %3645 = vmatpush3.xpose.msk.msra.mxu0 %vm967_vm8, %v1459_v63 }
 0x2f4   : > { %v4141_v29 = vpop.permute.xlu0 %4140  ;;  %3982 = vmatprep.subr.bf16.mxu0 %v5956_v10 }
 0x2f5   : > { %v4143_v27 = vunpack.i.h.bf16 %v4141_v29  ;;  %v4142_v32 = vunpack.i.l.bf16 %v4141_v29  ;;  %3972 = vmatpush3.bf16.msra.mxu1 %v3971_v28 }
 0x2f6   : > { %3647 = vmatmul.mubr.msk.f32.vlgmr.msra.gmra.mrb[36].mxu0 %vm967_vm8, %v4929_v3  ;;  %3973 = vmatprep.subr.bf16.mxu1 %v5956_v10 }
 0x2f7   : > { %v3974_v35 = vpack.c.bf16 %v4143_v27, %v4142_v32  ;;  %3984 = vmatpush3.bf16.msra.mxu0 %v3983_v15  ;;  %3649 = vmatprep.mubr.msk.f32.mxu0 %vm4365_vm4, %v5958_v0 }
 0x2f8   : > { %v4151_v42 = vpop.permute.xlu0 %4150  ;;  %3985 = vmatprep.subr.bf16.mxu0 %v5956_v10 }
 0x2f9   : > { %v4153_v55 = vunpack.i.h.bf16 %v4151_v42  ;;  %v4152_v2 = vunpack.i.l.bf16 %v4151_v42  ;;  %3975 = vmatpush3.bf16.msra.mxu1 %v3974_v35 }
 0x2fa   : > { %3650 = vmatmul.mubr.msk.f32.gmra.mrb[38].mxu0 %vm967_vm8, %v4921_v1  ;;  %3976 = vmatprep.subr.bf16.mxu1 %v5956_v10 }
 0x2fb   : > { %v3977_v3 = vpack.c.bf16 %v4153_v55, %v4152_v2  ;;  %3987 = vmatpush3.bf16.msra.mxu0 %v3986_v46  ;;  %3652 = vmatprep.mubr.msk.f32.mxu0 %vm4365_vm4, %v5958_v0 }
 0x2fc   : > { %v4161_v16 = vpop.permute.xlu0 %4160  ;;  %3988 = vmatprep.subr.bf16.mxu0 %v5956_v10 }
 0x2fd   : > { %v4163_v8 = vunpack.i.h.bf16 %v4161_v16  ;;  %v4162_v21 = vunpack.i.l.bf16 %v4161_v16  ;;  %3978 = vmatpush3.bf16.msra.mxu1 %v3977_v3 }
 0x2fe   : > { %3653 = vmatmul.mubr.msk.f32.gmra.mrb[40].mxu0 %vm967_vm8, %v4948_v24  ;;  %3979 = vmatprep.subr.bf16.mxu1 %v5956_v10  ;;  %v2129_v24 = vpop.permute.xlu1 %2128 }
 0x2ff   : > { %v3980_v1 = vpack.c.bf16 %v4163_v8, %v4162_v21  ;;  %3990 = vmatpush3.bf16.msra.mxu0 %v3989_v49  ;;  %3655 = vmatprep.mubr.msk.f32.mxu0 %vm4365_vm4, %v5958_v0 }
 0x300   : > { %v5215_v45 = vpop.permute.xlu0 %4170  ;;  %3991 = vmatprep.subr.bf16.mxu0 %v5956_v10 }
 0x301   : > { %3981 = vmatpush3.bf16.msra.mxu1 %v3980_v1 }
 0x302   : > { %3656 = vmatmul.mubr.msk.f32.gmra.mrb[42].mxu0 %vm967_vm8, %v4950_v9  ;;  %3689 = vmatprep.subr.mxu1 %v5958_v0 }
 0x303   : > { %3993 = vmatpush3.bf16.msra.mxu0 %v3992_v51  ;;  %3658 = vmatprep.mubr.msk.f32.mxu0 %vm4365_vm4, %v5958_v0 }
 0x304   : > { %v5223_v38 = vpop.permute.xlu0 %4180  ;;  %3734 = vmatprep.subr.mxu0 %v5958_v0 }
 0x305   : > { %3690 = vmatpush3.msk.msra.mxu1 %vm727_vm7, %v2129_v24 }
 0x306   : > { %3659 = vmatmul.mubr.msk.f32.gmra.mrb[44].mxu0 %vm967_vm8, %v4965_v13  ;;  %3994 = vmatprep.subr.bf16.mxu1 %v5956_v10 }
 0x307   : > { %3661 = vmatprep.mubr.msk.f32.mxu0 %vm4365_vm4, %v5958_v0 }
 0x308   : > { %v5232_v9 = vpop.permute.xlu0 %4190 }
 0x30a   : > { %3662 = vmatmul.mubr.msk.f32.gmra.mrb[46].mxu0 %vm967_vm8, %v4967_v14 }
 0x30b   : > { %3664 = vmatprep.mubr.msk.f32.mxu0 %vm4365_vm4, %v5958_v0 }
 0x30c   : > { %v2294_v58 = vpop.permute.xlu0 %2293 }
 0x30d   : > { %3735 = vmatpush3.msk.msra.mxu0 %vm727_vm7, %v2294_v58 }
 0x30e   : > { %3665 = vmatmul.mubr.msk.f32.gmra.mrb[48].mxu0 %vm967_vm8, %v4991_v22  ;;  %4006 = vmatprep.subr.bf16.mxu0 %v5956_v10 }
 0x30f   : > { %3667 = vmatprep.mubr.msk.f32.mxu0 %vm4365_vm4, %v5958_v0 }
 0x312   : > { %3668 = vmatmul.mubr.msk.f32.gmra.mrb[50].mxu0 %vm967_vm8, %v5040_v31 }
 0x313   : > { %3670 = vmatprep.mubr.msk.f32.mxu0 %vm4365_vm4, %v5958_v0 }
 0x316   : > { %3671 = vmatmul.mubr.msk.f32.gmra.mrb[52].mxu0 %vm967_vm8, %v5059_v25 }
 0x317   : > { %3736 = vmatprep.mubr.msk.f32.mxu0 %vm4365_vm4, %v5958_v0 }
 0x330   : > { %v5252_v13 = vpop.f32.mrb[0].mxu1 }
 0x331   : > { %v3513_v14 = vpop.f32.mrb[1].mxu1  ;;  %v1607_v22 = vsel %vm1606_vm10, %v5252_v13, -inf }
 0x332   : > { %1608 = vmax.xlane.f32.xlu1 %v1607_v22 }
 0x334   : > { %v5256_v5 = vpop.f32.mrb[2].mxu1 }
 0x335   : > { %v3516_v31 = vpop.f32.mrb[3].mxu1  ;;  %v1610_v53 = vsel %vm1606_vm10, %v5256_v5, -inf }
 0x336   : > { %1611 = vmax.xlane.f32.xlu0 %v1610_v53 }
 0x338   : > { %v5260_v59 = vpop.f32.mrb[4].mxu1 }
 0x339   : > { %v3519_v36 = vpop.f32.mrb[5].mxu1  ;;  %v1613_v50 = vsel %vm1606_vm10, %v5260_v59, -inf }
 0x33a   : > { %1614 = vmax.xlane.f32.xlu0 %v1613_v50 }
 0x33c   : > { %v5264_v39 = vpop.f32.mrb[6].mxu1 }
 0x33d   : > { %v3522_v52 = vpop.f32.mrb[7].mxu1  ;;  %v1616_v62 = vsel %vm1606_vm10, %v5264_v39, -inf }
 0x33e   : > { %1617 = vmax.xlane.f32.xlu0 %v1616_v62 }
 0x340   : > { %v5268_v4 = vpop.f32.mrb[8].mxu1 }
 0x341   : > { %v3525_v44 = vpop.f32.mrb[9].mxu1  ;;  %v1619_v47 = vsel %vm1606_vm10, %v5268_v4, -inf }
 0x342   : > { %1620 = vmax.xlane.f32.xlu0 %v1619_v47 }
 0x343   : > { %4205 = vrot.lane.b32.xlu1 %v5048_v23, %s4364_s20 }
 0x344   : > { %v5274_v18 = vpop.f32.mrb[10].mxu1 }
 0x345   : > { %v3528_v56 = vpop.f32.mrb[11].mxu1  ;;  %v1622_v57 = vsel %vm1606_vm10, %v5274_v18, -inf }
 0x346   : > { %1623 = vmax.xlane.f32.xlu0 %v1622_v57 }
 0x348   : > { %v5278_v60 = vpop.f32.mrb[12].mxu1 }
 0x349   : > { %v3531_v61 = vpop.f32.mrb[13].mxu1  ;;  %v1625_v34 = vsel %vm1606_vm10, %v5278_v60, -inf }
 0x34a   : > { %1626 = vmax.xlane.f32.xlu0 %v1625_v34 }
 0x34c   : > { %v5282_v63 = vpop.f32.mrb[14].mxu1 }
 0x34d   : > { %v3534_v19 = vpop.f32.mrb[15].mxu1  ;;  %v1628_v23 = vsel %vm1606_vm10, %v5282_v63, -inf }
 0x34e   : > { %1629 = vmax.xlane.f32.xlu0 %v1628_v23 }
 0x350   : > { %v5286_v6 = vpop.f32.mrb[16].mxu1 }
 0x351   : > { %v3537_v7 = vpop.f32.mrb[17].mxu1  ;;  %v1632_v11 = vsel %vm1631_vm11, %v5286_v6, -inf }
 0x352   : > { %1633 = vmax.xlane.f32.xlu0 %v1632_v11 }
 0x36d   : > { %v5290_v12 = vpop.f32.mrb[18].mxu0 }
 0x36e   : > { %v3558_v40 = vpop.f32.mrb[19].mxu0  ;;  %v1635_v28 = vsel %vm1606_vm10, %v5290_v12, -inf }
 0x36f   : > { %1636 = vmax.xlane.f32.xlu0 %v1635_v28  ;;  %v5352_v40 = vpop.permute.xlu1 %4175 }
 0x371   : > { %v5294_v15 = vpop.f32.mrb[20].mxu0 }
 0x372   : > { %v3561_v43 = vpop.f32.mrb[21].mxu0  ;;  %v1638_v29 = vsel %vm1606_vm10, %v5294_v15, -inf }
 0x373   : > { %1639 = vmax.xlane.f32.xlu1 %v1638_v29  ;;  %v5358_v29 = vpop.permute.xlu1 %4185 }
 0x375   : > { %v5298_v48 = vpop.f32.mrb[22].mxu0 }
 0x376   : > { %v3564_v30 = vpop.f32.mrb[23].mxu0  ;;  %v1641_v27 = vsel %vm1606_vm10, %v5298_v48, -inf }
 0x377   : > { %1642 = vmax.xlane.f32.xlu1 %v1641_v27  ;;  %v5362_v27 = vpop.permute.xlu1 %4195 }
 0x379   : > { %v5302_v32 = vpop.f32.mrb[24].mxu0 }
 0x37a   : > { %v3567_v35 = vpop.f32.mrb[25].mxu0  ;;  %v1644_v33 = vsel %vm1606_vm10, %v5302_v32, -inf }
 0x37b   : > { %1645 = vmax.xlane.f32.xlu1 %v1644_v33 }
 0x37d   : > { %v5306_v41 = vpop.f32.mrb[26].mxu0 }
 0x37e   : > { %v3570_v42 = vpop.f32.mrb[27].mxu0  ;;  %v1647_v46 = vsel %vm1606_vm10, %v5306_v41, -inf }
 0x37f   : > { %1648 = vmax.xlane.f32.xlu1 %v1647_v46 }
 0x381   : > { %v5310_v55 = vpop.f32.mrb[28].mxu0 }
 0x382   : > { %v3573_v2 = vpop.f32.mrb[29].mxu0  ;;  %v1650_v54 = vsel %vm1606_vm10, %v5310_v55, -inf }
 0x383   : > { %1651 = vmax.xlane.f32.xlu1 %v1650_v54 }
 0x385   : > { %4200 = vrot.lane.b32.xlu0 %v4986_v26, %s4364_s20  ;;  %v5316_v3 = vpop.f32.mrb[30].mxu0 }
 0x386   : > { %v3576_v49 = vpop.f32.mrb[31].mxu0  ;;  %v1653_v16 = vsel %vm1606_vm10, %v5316_v3, -inf }
 0x387   : > { %1654 = vmax.xlane.f32.xlu1 %v1653_v16 }
 0x389   : > { %v5320_v17 = vpop.f32.mrb[32].mxu0 }
 0x38a   : > { %v3579_v20 = vpop.f32.mrb[33].mxu0  ;;  %v1656_v8 = vsel %vm1606_vm10, %v5320_v17, -inf }
 0x38b   : > { %1657 = vmax.xlane.f32.xlu1 %v1656_v8 }
 0x38d   : > { %v5324_v21 = vpop.f32.mrb[34].mxu0  ;;  %v5326_v1 = vpop.f32.mrb[18].mxu1 }
 0x38e   : > { %v3582_v51 = vpop.f32.mrb[35].mxu0  ;;  %v3603_v26 = vpop.f32.mrb[19].mxu1  ;;  %v1659_v24 = vsel %vm1631_vm11, %v5324_v21, -inf  ;;  %v1662_v47 = vsel %vm1606_vm10, %v5326_v1, -inf }
 0x38f   : > { %1660 = vmax.xlane.f32.xlu1 %v1659_v24 }
 0x391   : > { %v5330_v58 = vpop.f32.mrb[20].mxu1 }
 0x392   : > { %v3606_v14 = vpop.f32.mrb[21].mxu1  ;;  %v1665_v61 = vsel %vm1606_vm10, %v5330_v58, -inf }
 0x395   : > { %v5332_v22 = vpop.f32.mrb[22].mxu1 }
 0x396   : > { %v3609_v31 = vpop.f32.mrb[23].mxu1  ;;  %v1668_v23 = vsel %vm1606_vm10, %v5332_v22, -inf }
 0x399   : > { %v5334_v53 = vpop.f32.mrb[24].mxu1 }
 0x39a   : > { %v3612_v36 = vpop.f32.mrb[25].mxu1  ;;  %v1671_v28 = vsel %vm1606_vm10, %v5334_v53, -inf }
 0x39d   : > { %v5336_v50 = vpop.f32.mrb[26].mxu1 }
 0x39e   : > { %v3615_v52 = vpop.f32.mrb[27].mxu1  ;;  %v1674_v43 = vsel %vm1606_vm10, %v5336_v50, -inf }
 0x3a1   : > { %v5338_v62 = vpop.f32.mrb[28].mxu1 }
 0x3a2   : > { %v3618_v44 = vpop.f32.mrb[29].mxu1  ;;  %v1677_v30 = vsel %vm1606_vm10, %v5338_v62, -inf }
 0x3a4   : > { %1663 = vmax.xlane.f32.xlu0 %v1662_v47 }
 0x3a5   : > { %v5342_v56 = vpop.f32.mrb[30].mxu1 }
 0x3a6   : > { %v3621_v57 = vpop.f32.mrb[31].mxu1  ;;  %v1680_v35 = vsel %vm1606_vm10, %v5342_v56, -inf }
 0x3a8   : > { %1666 = vmax.xlane.f32.xlu0 %v1665_v61 }
 0x3a9   : > { %v5346_v34 = vpop.f32.mrb[32].mxu1 }
 0x3aa   : > { %v3624_v19 = vpop.f32.mrb[33].mxu1  ;;  %v1683_v42 = vsel %vm1606_vm10, %v5346_v34, -inf }
 0x3ac   : > { %1669 = vmax.xlane.f32.xlu0 %v1668_v23 }
 0x3ad   : > { %v5350_v7 = vpop.f32.mrb[34].mxu1 }
 0x3ae   : > { %v3627_v11 = vpop.f32.mrb[35].mxu1  ;;  %v1686_v49 = vsel %vm1631_vm11, %v5350_v7, -inf }
 0x3b0   : > { %1672 = vmax.xlane.f32.xlu0 %v1671_v28 }
 0x3b4   : > { %1675 = vmax.xlane.f32.xlu0 %v1674_v43 }
 0x3b8   : > { %1678 = vmax.xlane.f32.xlu0 %v1677_v30 }
 0x3bc   : > { %1681 = vmax.xlane.f32.xlu0 %v1680_v35 }
 0x3bf   : > { %v1609_v33 = vpop.xlane.xlu1 %1608 }
 0x3c0   : > { %v1716_v46 = vsub.f32 %v5252_v13, %v1609_v33  ;;  %1684 = vmax.xlane.f32.xlu0 %v1683_v42 }
 0x3c2   : > { %v1752_v2 = vmul.f32 1.442695, %v1716_v46 }
 0x3c3   : > { %v1612_v54 = vpop.xlane.xlu0 %1611 }
 0x3c4   : > { %4209 = vpow2.f32 %v1752_v2  ;;  %v1717_v16 = vsub.f32 %v5256_v5, %v1612_v54  ;;  %1687 = vmax.xlane.f32.xlu0 %v1686_v49 }
 0x3c6   : > { %v1754_v20 = vmul.f32 1.442695, %v1717_v16 }
 0x3c7   : > { %v1615_v8 = vpop.xlane.xlu0 %1614 }
 0x3c8   : > { %4211 = vpow2.f32 %v1754_v20  ;;  %v1718_v51 = vsub.f32 %v5260_v59, %v1615_v8 }
 0x3c9   : > { %v5373_v26 = vpop.f32.mrb[36].mxu0 }
 0x3ca   : > { %v3648_v24 = vpop.f32.mrb[37].mxu0  ;;  %v1689_v13 = vsel %vm1606_vm10, %v5373_v26, -inf  ;;  %v1756_v14 = vmul.f32 1.442695, %v1718_v51 }
 0x3cb   : > { %1690 = vmax.xlane.f32.xlu1 %v1689_v13  ;;  %v1618_v31 = vpop.xlane.xlu0 %1617 }
 0x3cc   : > { %4213 = vpow2.f32 %v1756_v14  ;;  %v1719_v36 = vsub.f32 %v5264_v39, %v1618_v31 }
 0x3cd   : > { %v5378_v52 = vpop.f32.mrb[38].mxu0 }
 0x3ce   : > { %v3651_v5 = vpop.f32.mrb[39].mxu0  ;;  %v1692_v44 = vsel %vm1606_vm10, %v5378_v52, -inf  ;;  %v5382_v47 = vpop.eup %4209  ;;  %v1758_v59 = vmul.f32 1.442695, %v1719_v36 }
 0x3cf   : > { %1693 = vmax.xlane.f32.xlu1 %v1692_v44  ;;  %v1621_v57 = vpop.xlane.xlu0 %1620  ;;  %v1824_v61 = vsel %vm1606_vm10, %v5382_v47, 0.0 }
 0x3d0   : > { %4215 = vpow2.f32 %v1758_v59  ;;  %v1720_v19 = vsub.f32 %v5268_v4, %v1621_v57  ;;  %1825 = vadd.xlane.f32.xlu0 %v1824_v61 }
 0x3d1   : > { %v5387_v23 = vpop.f32.mrb[40].mxu0 }
 0x3d2   : > { %v3654_v39 = vpop.f32.mrb[41].mxu0  ;;  %v1695_v11 = vsel %vm1606_vm10, %v5387_v23, -inf  ;;  %v5391_v28 = vpop.eup %4211  ;;  %v1760_v43 = vmul.f32 1.442695, %v1720_v19 }
 0x3d3   : > { %1696 = vmax.xlane.f32.xlu1 %v1695_v11  ;;  %v1624_v30 = vpop.xlane.xlu0 %1623  ;;  %v1827_v35 = vsel %vm1606_vm10, %v5391_v28, 0.0 }
 0x3d4   : > { %4217 = vpow2.f32 %v1760_v43  ;;  %v1721_v33 = vsub.f32 %v5274_v18, %v1624_v30  ;;  %1828 = vadd.xlane.f32.xlu0 %v1827_v35 }
 0x3d5   : > { %v5396_v4 = vpop.f32.mrb[42].mxu0 }
 0x3d6   : > { %v3657_v42 = vpop.f32.mrb[43].mxu0  ;;  %v1698_v46 = vsel %vm1606_vm10, %v5396_v4, -inf  ;;  %v5400_v2 = vpop.eup %4213  ;;  %v1762_v16 = vmul.f32 1.442695, %v1721_v33 }
 0x3d7   : > { %1699 = vmax.xlane.f32.xlu1 %v1698_v46  ;;  %v1627_v54 = vpop.xlane.xlu0 %1626  ;;  %v1830_v49 = vsel %vm1606_vm10, %v5400_v2, 0.0 }
 0x3d8   : > { %1831 = vadd.xlane.f32.xlu0 %v1830_v49  ;;  %v1722_v24 = vsub.f32 %v5278_v60, %v1627_v54  ;;  %4219 = vpow2.f32 %v1762_v16 }
 0x3d9   : > { %v5404_v20 = vpop.f32.mrb[44].mxu0 }
 0x3da   : > { %v3660_v8 = vpop.f32.mrb[45].mxu0  ;;  %v1701_v18 = vsel %vm1606_vm10, %v5404_v20, -inf  ;;  %v5408_v51 = vpop.eup %4215  ;;  %v1764_v59 = vmul.f32 1.442695, %v1722_v24 }
 0x3db   : > { %1702 = vmax.xlane.f32.xlu1 %v1701_v18  ;;  %v1630_v13 = vpop.xlane.xlu0 %1629  ;;  %v1833_v14 = vsel %vm1606_vm10, %v5408_v51, 0.0 }
 0x3dc   : > { %1834 = vadd.xlane.f32.xlu0 %v1833_v14  ;;  %4221 = vpow2.f32 %v1764_v59  ;;  %v1723_v43 = vsub.f32 %v5282_v63, %v1630_v13 }
 0x3dd   : > { %v5413_v31 = vpop.f32.mrb[46].mxu0 }
 0x3de   : > { %v3663_v36 = vpop.f32.mrb[47].mxu0  ;;  %v1704_v5 = vsel %vm1606_vm10, %v5413_v31, -inf  ;;  %v5417_v44 = vpop.eup %4217 }
 0x3df   : > { %1705 = vmax.xlane.f32.xlu1 %v1704_v5  ;;  %v1634_v57 = vpop.xlane.xlu0 %1633  ;;  %v1836_v39 = vsel %vm1606_vm10, %v5417_v44, 0.0 }
 0x3e0   : > { %v1724_v61 = vsub.f32 %v5286_v6, %v1634_v57  ;;  %v1766_v6 = vmul.f32 1.442695, %v1723_v43 }
 0x3e1   : > { %v5420_v60 = vpop.f32.mrb[48].mxu0 }
 0x3e2   : > { %v3666_v19 = vpop.f32.mrb[49].mxu0  ;;  %v1768_v11 = vmul.f32 1.442695, %v1724_v61  ;;  %v1707_v33 = vsel %vm1606_vm10, %v5420_v60, -inf  ;;  %v5429_v42 = vpop.eup %4219 }
 0x3e3   : > { %1837 = vadd.xlane.f32.xlu1 %v1836_v39  ;;  %v1839_v49 = vsel %vm1606_vm10, %v5429_v42, 0.0  ;;  %v5456_v39 = vpop.permute.xlu1 %4205 }
 0x3e4   : > { %4223 = vpow2.f32 %v1768_v11 }
 0x3e5   : > { %v5425_v30 = vpop.f32.mrb[50].mxu0  ;;  %4225 = vpow2.f32 %v1766_v6 }
 0x3e6   : > { %v3669_v35 = vpop.f32.mrb[51].mxu0  ;;  %v5435_v63 = vpop.eup %4221  ;;  %v1710_v16 = vsel %vm1606_vm10, %v5425_v30, -inf }
 0x3e7   : > { %1708 = vmax.xlane.f32.xlu1 %v1707_v33  ;;  %v1842_v24 = vsel %vm1606_vm10, %v5435_v63, 0.0 }
 0x3e9   : > { %v5431_v46 = vpop.f32.mrb[52].mxu0 }
 0x3ea   : > { %v3672_v54 = vpop.f32.mrb[53].mxu0  ;;  %v1713_v13 = vsel %vm1631_vm11, %v5431_v46, -inf }
 0x3eb   : > { %1840 = vadd.xlane.f32.xlu1 %v1839_v49 }
 0x3ee   : > { %v5439_v8 = vpop.eup %4223 }
 0x3ef   : > { %1711 = vmax.xlane.f32.xlu1 %v1710_v16  ;;  %v1848_v18 = vsel %vm1631_vm11, %v5439_v8, 0.0  ;;  %v5447_v14 = vpop.eup %4225 }
 0x3f0   : > { %1849 = vadd.xlane.f32.xlu0 %v1848_v18  ;;  %v1845_v36 = vsel %vm1606_vm10, %v5447_v14, 0.0 }
 0x3f3   : > { %1843 = vadd.xlane.f32.xlu1 %v1842_v24 }
 0x3f7   : > { %1714 = vmax.xlane.f32.xlu1 %v1713_v13 }
 0x3fb   : > { %1846 = vadd.xlane.f32.xlu1 %v1845_v36 }
 0x3fc   : > { %v1637_v5 = vpop.xlane.xlu0 %1636 }
 0x3fd   : > { %v1725_v59 = vsub.f32 %v5290_v12, %v1637_v5 }
 0x3ff   : > { %v1770_v57 = vmul.f32 1.442695, %v1725_v59 }
 0x400   : > { %v1640_v11 = vpop.xlane.xlu1 %1639  ;;  %v5458_v33 = vpop.permute.xlu0 %4200 }
 0x401   : > { %4227 = vpow2.f32 %v1770_v57  ;;  %v1726_v6 = vsub.f32 %v5294_v15, %v1640_v11 }
 0x403   : > { %v1772_v16 = vmul.f32 1.442695, %v1726_v6 }
 0x404   : > { %v1643_v43 = vpop.xlane.xlu1 %1642 }
 0x405   : > { %v1727_v5 = vsub.f32 %v5298_v48, %v1643_v43 }
 0x407   : > { %v1774_v11 = vmul.f32 1.442695, %v1727_v5 }
 0x408   : > { %v1646_v35 = vpop.xlane.xlu1 %1645 }
 0x409   : > { %v1728_v15 = vsub.f32 %v5302_v32, %v1646_v35 }
 0x40b   : > { %v5452_v61 = vpop.eup %4227 }
 0x40c   : > { %v1851_v19 = vsel %vm1606_vm10, %v5452_v61, 0.0  ;;  %v1649_v54 = vpop.xlane.xlu1 %1648 }
 0x40d   : > { %1852 = vadd.xlane.f32.xlu1 %v1851_v19  ;;  %v1729_v10 = vsub.f32 %v5306_v41, %v1649_v54 }
 0x40f   : > { %v1778_v43 = vmul.f32 1.442695, %v1729_v10 }
 0x410   : > { %v1652_v13 = vpop.xlane.xlu1 %1651 }
 0x431   : > { %v1664_v49 = vpop.xlane.xlu0 %1663 }
 0x432   : > { %v1734_v12 = vsub.f32 %v5326_v1, %v1664_v49  ;;  %v1655_v1 = vpop.xlane.xlu1 %1654 }
 0x434   : > { %v1788_v18 = vmul.f32 1.442695, %v1734_v12 }
 0x435   : > { %v1667_v24 = vpop.xlane.xlu0 %1666 }
 0x436   : > { %4229 = vpow2.f32 %v1788_v18  ;;  %v1735_v36 = vsub.f32 %v5330_v58, %v1667_v24  ;;  %v1776_v58 = vmul.f32 1.442695, %v1728_v15  ;;  %v1658_v35 = vpop.xlane.xlu1 %1657 }
 0x437   : > { %4231 = vpow2.f32 %v1772_v16  ;;  %v1730_v16 = vsub.f32 %v5310_v55, %v1652_v13  ;;  %v1731_v55 = vsub.f32 %v5316_v3, %v1655_v1 }
 0x438   : > { %v1790_v59 = vmul.f32 1.442695, %v1735_v36 }
 0x439   : > { %v1670_v57 = vpop.xlane.xlu0 %1669 }
 0x43a   : > { %v1736_v19 = vsub.f32 %v5332_v22, %v1670_v57  ;;  %4233 = vpow2.f32 %v1790_v59  ;;  %v1782_v59 = vmul.f32 1.442695, %v1731_v55 }
 0x43c   : > { %v1792_v6 = vmul.f32 1.442695, %v1736_v19  ;;  %v1661_v19 = vpop.xlane.xlu1 %1660 }
 0x43d   : > { %v1673_v49 = vpop.xlane.xlu0 %1672 }
 0x43e   : > { %4235 = vpow2.f32 %v1792_v6  ;;  %v1737_v12 = vsub.f32 %v5334_v53, %v1673_v49  ;;  %v1780_v53 = vmul.f32 1.442695, %v1730_v16  ;;  %v1733_v49 = vsub.f32 %v5324_v21, %v1661_v19 }
 0x43f   : > { %4237 = vpow2.f32 %v1774_v11 }
 0x440   : > { %v5469_v48 = vpop.eup %4229  ;;  %v1794_v22 = vmul.f32 1.442695, %v1737_v12  ;;  %v1786_v21 = vmul.f32 1.442695, %v1733_v49 }
 0x441   : > { %v1676_v18 = vpop.xlane.xlu0 %1675  ;;  %v1878_v32 = vsel %vm1606_vm10, %v5469_v48, 0.0  ;;  %v5473_v41 = vpop.eup %4231 }
 0x442   : > { %4239 = vpow2.f32 %v1794_v22  ;;  %v1738_v54 = vsub.f32 %v5336_v50, %v1676_v18  ;;  %1879 = vadd.xlane.f32.xlu1 %v1878_v32  ;;  %v1854_v10 = vsel %vm1606_vm10, %v5473_v41, 0.0  ;;  %v1732_v50 = vsub.f32 %v5320_v17, %v1658_v35 }
 0x443   : > { %4241 = vpow2.f32 %v1776_v58 }
 0x444   : > { %4243 = vpow2.f32 %v1778_v43  ;;  %v1796_v24 = vmul.f32 1.442695, %v1738_v54  ;;  %v5479_v36 = vpop.eup %4233  ;;  %v1784_v17 = vmul.f32 1.442695, %v1732_v50 }
 0x445   : > { %v1679_v13 = vpop.xlane.xlu0 %1678  ;;  %4245 = vpow2.f32 %v1780_v53  ;;  %v1881_v1 = vsel %vm1606_vm10, %v5479_v36, 0.0 }
 0x446   : > { %v1739_v5 = vsub.f32 %v5338_v62, %v1679_v13  ;;  %1855 = vadd.xlane.f32.xlu1 %v1854_v10  ;;  %4247 = vpow2.f32 %v1796_v24 }
 0x447   : > { %4249 = vpow2.f32 %v1782_v59 }
 0x448   : > { %v5483_v57 = vpop.eup %4235  ;;  %v1798_v3 = vmul.f32 1.442695, %v1739_v5 }
 0x449   : > { %v1682_v15 = vpop.xlane.xlu0 %1681  ;;  %v1884_v11 = vsel %vm1606_vm10, %v5483_v57, 0.0  ;;  %v5489_v6 = vpop.eup %4237 }
 0x44a   : > { %v1740_v62 = vsub.f32 %v5342_v56, %v1682_v15  ;;  %1885 = vadd.xlane.f32.xlu0 %v1884_v11  ;;  %1882 = vadd.xlane.f32.xlu1 %v1881_v1  ;;  %4251 = vpow2.f32 %v1798_v3  ;;  %v1857_v18 = vsel %vm1606_vm10, %v5489_v6, 0.0 }
 0x44b   : > { %4253 = vpow2.f32 %v1784_v17 }
 0x44c   : > { %v5493_v12 = vpop.eup %4239  ;;  %v1800_v58 = vmul.f32 1.442695, %v1740_v62 }
 0x44d   : > { %v5495_v16 = vpop.eup %4241  ;;  %v1685_v43 = vpop.xlane.xlu0 %1684  ;;  %v1887_v22 = vsel %vm1606_vm10, %v5493_v12, 0.0 }
 0x44e   : > { %v5501_v56 = vpop.eup %4243  ;;  %v1741_v32 = vsub.f32 %v5346_v34, %v1685_v43  ;;  %1888 = vadd.xlane.f32.xlu0 %v1887_v22  ;;  %1858 = vadd.xlane.f32.xlu1 %v1857_v18  ;;  %4255 = vpow2.f32 %v1800_v58  ;;  %v1860_v24 = vsel %vm1606_vm10, %v5495_v16, 0.0 }
 0x44f   : > { %v5504_v54 = vpop.eup %4245  ;;  %v1863_v55 = vsel %vm1606_vm10, %v5501_v56, 0.0  ;;  %4257 = vpow2.f32 %v1786_v21 }
 0x450   : > { %v1802_v35 = vmul.f32 1.442695, %v1741_v32  ;;  %v5510_v13 = vpop.eup %4247  ;;  %v1866_v59 = vsel %vm1606_vm10, %v5504_v54, 0.0 }
 0x451   : > { %v1688_v53 = vpop.xlane.xlu0 %1687  ;;  %v5513_v5 = vpop.eup %4249  ;;  %v1890_v50 = vsel %vm1606_vm10, %v5510_v13, 0.0 }
 0x452   : > { %v1742_v10 = vsub.f32 %v5350_v7, %v1688_v53  ;;  %1864 = vadd.xlane.f32.xlu0 %v1863_v55  ;;  %1861 = vadd.xlane.f32.xlu1 %v1860_v24  ;;  %4259 = vpow2.f32 %v1802_v35  ;;  %v1869_v11 = vsel %vm1606_vm10, %v5513_v5, 0.0 }
 0x454   : > { %v1804_v34 = vmul.f32 1.442695, %v1742_v10  ;;  %v5519_v19 = vpop.eup %4251 }
 0x455   : > { %v5522_v15 = vpop.eup %4253  ;;  %v1893_v1 = vsel %vm1606_vm10, %v5519_v19, 0.0 }
 0x456   : > { %1867 = vadd.xlane.f32.xlu0 %v1866_v59  ;;  %1891 = vadd.xlane.f32.xlu1 %v1890_v50  ;;  %4261 = vpow2.f32 %v1804_v34  ;;  %v1872_v22 = vsel %vm1606_vm10, %v5522_v15, 0.0 }
 0x458   : > { %v1691_v3 = vpop.xlane.xlu1 %1690  ;;  %v5528_v62 = vpop.eup %4255 }
 0x459   : > { %v1743_v7 = vsub.f32 %v5373_v26, %v1691_v3  ;;  %v5531_v43 = vpop.eup %4257  ;;  %v1896_v18 = vsel %vm1606_vm10, %v5528_v62, 0.0 }
 0x45a   : > { %1870 = vadd.xlane.f32.xlu0 %v1869_v11  ;;  %1894 = vadd.xlane.f32.xlu1 %v1893_v1  ;;  %v1875_v55 = vsel %vm1631_vm11, %v5531_v43, 0.0 }
 0x45b   : > { %v1806_v17 = vmul.f32 1.442695, %v1743_v7 }
 0x45c   : > { %v1694_v49 = vpop.xlane.xlu1 %1693  ;;  %v5537_v32 = vpop.eup %4259 }
 0x45d   : > { %4263 = vpow2.f32 %v1806_v17  ;;  %v1744_v58 = vsub.f32 %v5378_v52, %v1694_v49  ;;  %v1826_v26 = vpop.xlane.xlu0 %1825  ;;  %v1899_v24 = vsel %vm1606_vm10, %v5537_v32, 0.0 }
 0x45e   : > { %4265 = vrcp.f32 %v1826_v26  ;;  %1873 = vadd.xlane.f32.xlu0 %v1872_v22  ;;  %1897 = vadd.xlane.f32.xlu1 %v1896_v18 }
 0x45f   : > { %v1808_v21 = vmul.f32 1.442695, %v1744_v58 }
 0x460   : > { %v1697_v35 = vpop.xlane.xlu1 %1696  ;;  %v5544_v10 = vpop.eup %4261 }
 0x461   : > { %4267 = vpow2.f32 %v1808_v21  ;;  %v1745_v53 = vsub.f32 %v5387_v23, %v1697_v35  ;;  %v1829_v52 = vpop.xlane.xlu0 %1828  ;;  %v1902_v23 = vsel %vm1631_vm11, %v5544_v10, 0.0 }
 0x462   : > { %4269 = vrcp.f32 %v1829_v52  ;;  %1876 = vadd.xlane.f32.xlu0 %v1875_v55  ;;  %1900 = vadd.xlane.f32.xlu1 %v1899_v24 }
 0x463   : > { %v1810_v34 = vmul.f32 1.442695, %v1745_v53 }
 0x464   : > { %v1700_v59 = vpop.xlane.xlu1 %1699 }
 0x465   : > { %4271 = vpow2.f32 %v1810_v34  ;;  %v1746_v50 = vsub.f32 %v5396_v4, %v1700_v59  ;;  %v1832_v3 = vpop.xlane.xlu0 %1831  ;;  %v4173_v34 = vunpack.i.h.bf16 %v5215_v45  ;;  %v4172_v59 = vunpack.i.l.bf16 %v5215_v45 }
 0x466   : > { %4273 = vrcp.f32 %v1832_v3  ;;  %1903 = vadd.xlane.f32.xlu0 %v1902_v23  ;;  %v4183_v45 = vunpack.i.h.bf16 %v5223_v38 }
 0x467   : > { %v5549_v7 = vpop.eup %4263  ;;  %v1812_v11 = vmul.f32 1.442695, %v1746_v50 }
 0x468   : > { %v1703_v1 = vpop.xlane.xlu1 %1702  ;;  %v1905_v17 = vsel %vm1606_vm10, %v5549_v7, 0.0  ;;  %v4266_v49 = vpop.eup %4265 }
 0x469   : > { %4275 = vpow2.f32 %v1812_v11  ;;  %v1747_v58 = vsub.f32 %v5404_v20, %v1703_v1  ;;  %v1968_v22 = vmul.f32 %v4266_v49, %v1826_v26  ;;  %v1835_v18 = vpop.xlane.xlu0 %1834 }
 0x46a   : > { %4277 = vrcp.f32 %v1835_v18  ;;  %1906 = vadd.xlane.f32.xlu0 %v1905_v17 }
 0x46b   : > { %v5554_v4 = vpop.eup %4267  ;;  %v1814_v21 = vmul.f32 1.442695, %v1747_v58  ;;  %v2004_v35 = vsub.f32 2.0, %v1968_v22 }
 0x46c   : > { %5963 = vst [vmem:[#allocation3_spill] sm:$0xff] %v5554_v4  ;;  %v1706_v53 = vpop.xlane.xlu1 %1705  ;;  %v1908_v55 = vsel %vm1606_vm10, %v5554_v4, 0.0  ;;  %v4270_v24 = vpop.eup %4269  ;;  %v3995_v4 = vpack.c.bf16 %v4173_v34, %v4172_v59  ;;  %v4193_v59 = vunpack.i.h.bf16 %v5232_v9 }
 0x46d   : > { %4279 = vpow2.f32 %v1814_v21  ;;  %v1748_v20 = vsub.f32 %v5413_v31, %v1706_v53  ;;  %1909 = vadd.xlane.f32.xlu1 %v1908_v55  ;;  %v2040_v26 = vmul.f32 %v4266_v49, %v2004_v35  ;;  %v1969_v50 = vmul.f32 %v4270_v24, %v1829_v52 }
 0x46e   : > { %v4182_v21 = vunpack.i.l.bf16 %v5223_v38  ;;  %v5965_v55 = vmov 0.0|0.0  }
 0x46f   : > { %v5561_v23 = vpop.eup %4271  ;;  %v1816_v11 = vmul.f32 1.442695, %v1748_v20  ;;  %v2076_v1 = vmul.f32 %v5382_v47, %v2040_v26  ;;  %v2005_v17 = vsub.f32 2.0, %v1969_v50  ;;  %v5964_v47 = vmov 0.0  }
 0x470   : > { %v1838_v58 = vpop.xlane.xlu1 %1837  ;;  %v1911_v22 = vsel %vm1606_vm10, %v5561_v23, 0.0  ;;  %v4274_v0 = vpop.eup %4273  ;;  %v4192_v20 = vunpack.i.l.bf16 %v5232_v9 }
 0x471   : > { %4281 = vpow2.f32 %v1816_v11  ;;  %1912 = vadd.xlane.f32.xlu1 %v1911_v22  ;;  %v2041_v31 = vmul.f32 %v4270_v24, %v2005_v17  ;;  %v1970_v52 = vmul.f32 %v4274_v0, %v1832_v3  ;;  %3692 = vmatmul.mubr.msk.f32.vlgmr.msra.gmra.mrb[36].mxu1 %vm1606_vm10, %v2076_v1  ;;  %v3998_v3 = vpack.c.bf16 %v4183_v45, %v4182_v21 }
 0x472   : > { %4283 = vrcp.f32 %v1838_v58  ;;  %3996 = vmatpush3.bf16.msra.mxu1 %v3995_v4  ;;  %3694 = vmatprep.mubr.msk.f32.mxu1 %vm4365_vm4, %v5964_v47  ;;  %v4202_v22 = vunpack.i.l.bf16 %v5458_v33 }
 0x473   : > { %v5569_v49 = vpop.eup %4275  ;;  %v2077_v35 = vmul.f32 %v5391_v28, %v2041_v31  ;;  %v2006_v53 = vsub.f32 2.0, %v1970_v52  ;;  %3997 = vmatprep.subr.bf16.mxu1 %v5965_v55 }
 0x474   : > { %v1709_v34 = vpop.xlane.xlu1 %1708  ;;  %v1914_v38 = vsel %vm1606_vm10, %v5569_v49, 0.0  ;;  %v4278_v24 = vpop.eup %4277 }
 0x475   : > { %v1749_v4 = vsub.f32 %v5420_v60, %v1709_v34  ;;  %1915 = vadd.xlane.f32.xlu1 %v1914_v38  ;;  %v2042_v26 = vmul.f32 %v4274_v0, %v2006_v53  ;;  %v1971_v50 = vmul.f32 %v4278_v24, %v1835_v18  ;;  %3695 = vmatmul.mubr.msk.f32.gmra.mrb[38].mxu1 %vm1606_vm10, %v2077_v35  ;;  %v4203_v18 = vunpack.i.h.bf16 %v5458_v33 }
 0x476   : > { %3999 = vmatpush3.bf16.msra.mxu1 %v3998_v3  ;;  %3697 = vmatprep.mubr.msk.f32.mxu1 %vm4365_vm4, %v5964_v47  ;;  %v4001_v0 = vpack.c.bf16 %v4193_v59, %v4192_v20 }
 0x477   : > { %v5581_v28 = vpop.eup %4279  ;;  %v1818_v11 = vmul.f32 1.442695, %v1749_v4  ;;  %v2078_v1 = vmul.f32 %v5400_v2, %v2042_v26  ;;  %v2007_v17 = vsub.f32 2.0, %v1971_v50  ;;  %4000 = vmatprep.subr.bf16.mxu1 %v5965_v55  ;;  %v4004_v35 = vpack.c.bf16 %v4203_v18, %v4202_v22 }
 0x478   : > { %v1841_v9 = vpop.xlane.xlu1 %1840  ;;  %v1917_v60 = vsel %vm1606_vm10, %v5581_v28, 0.0 }
 0x479   : > { %4285 = vpow2.f32 %v1818_v11  ;;  %1918 = vadd.xlane.f32.xlu0 %v1917_v60  ;;  %v2043_v45 = vmul.f32 %v4278_v24, %v2007_v17  ;;  %3698 = vmatmul.mubr.msk.f32.gmra.mrb[40].mxu1 %vm1606_vm10, %v2078_v1 }
 0x47a   : > { %4287 = vrcp.f32 %v1841_v9  ;;  %4002 = vmatpush3.bf16.msra.mxu1 %v4001_v0  ;;  %3700 = vmatprep.mubr.msk.f32.mxu1 %vm4365_vm4, %v5964_v47 }
 0x47b   : > { %v5592_v21 = vpop.eup %4281  ;;  %v2079_v31 = vmul.f32 %v5408_v51, %v2043_v45  ;;  %4003 = vmatprep.subr.bf16.mxu1 %v5965_v55 }
 0x47c   : > { %v4284_v2 = vpop.eup %4283  ;;  %v1712_v52 = vpop.xlane.xlu1 %1711  ;;  %v1920_v33 = vsel %vm1606_vm10, %v5592_v21, 0.0 }
 0x47d   : > { %v1972_v53 = vmul.f32 %v4284_v2, %v1838_v58  ;;  %v1750_v34 = vsub.f32 %v5425_v30, %v1712_v52  ;;  %1921 = vadd.xlane.f32.xlu0 %v1920_v33  ;;  %3701 = vmatmul.mubr.msk.f32.gmra.mrb[42].mxu1 %vm1606_vm10, %v2079_v31  ;;  %v1850_v30 = vpop.xlane.xlu0 %1849 }
 0x47e   : > { %4005 = vmatpush3.bf16.msra.mxu1 %v4004_v35  ;;  %3703 = vmatprep.mubr.msk.f32.mxu1 %vm4365_vm4, %v5964_v47 }
 0x47f   : > { %v2008_v38 = vsub.f32 2.0, %v1972_v53  ;;  %v1820_v24 = vmul.f32 1.442695, %v1750_v34  ;;  %3779 = vmatprep.subr.mxu1 %v5964_v47 }
 0x480   : > { %v1844_v51 = vpop.xlane.xlu1 %1843 }
 0x481   : > { %v2044_v3 = vmul.f32 %v4284_v2, %v2008_v38  ;;  %4289 = vpow2.f32 %v1820_v24 }
 0x482   : > { %4291 = vrcp.f32 %v1844_v51 }
 0x483   : > { %v5605_v59 = vpop.eup %4285  ;;  %v2080_v58 = vmul.f32 %v5417_v44, %v2044_v3  ;;  %4293 = vrcp.f32 %v1850_v30 }
 0x484   : > { %v4288_v20 = vpop.eup %4287  ;;  %v1715_v4 = vpop.xlane.xlu1 %1714  ;;  %v1923_v26 = vsel %vm1606_vm10, %v5605_v59, 0.0 }
 0x485   : > { %v1973_v50 = vmul.f32 %v4288_v20, %v1841_v9  ;;  %3704 = vmatmul.mubr.msk.f32.gmra.mrb[44].mxu1 %vm1606_vm10, %v2080_v58  ;;  %v1751_v11 = vsub.f32 %v5431_v46, %v1715_v4  ;;  %1924 = vadd.xlane.f32.xlu0 %v1923_v26  ;;  %v4178_v26 = vunpack.i.h.bf16 %v5352_v40 }
 0x486   : > { %2458 = vrot.lane.b32.xlu1 %v4993_v37, %s4364_s20  ;;  %3706 = vmatprep.mubr.msk.f32.mxu1 %vm4365_vm4, %v5964_v47 }
 0x487   : > { %v2009_v44 = vsub.f32 2.0, %v1973_v50  ;;  %v1822_v1 = vmul.f32 1.442695, %v1751_v11 }
 0x488   : > { %v1847_v17 = vpop.xlane.xlu1 %1846 }
 0x489   : > { %v2045_v60 = vmul.f32 %v4288_v20, %v2009_v44  ;;  %4295 = vpow2.f32 %v1822_v1  ;;  %v4187_v1 = vunpack.i.l.bf16 %v5358_v29 }
 0x48a   : > { %4297 = vrcp.f32 %v1847_v17 }
 0x48b   : > { %v5616_v0 = vpop.eup %4289  ;;  %v2081_v9 = vmul.f32 %v5429_v42, %v2045_v60  ;;  %v4208_v60 = vunpack.i.h.bf16 %v5456_v39 }
 0x48c   : > { %v4292_v18 = vpop.eup %4291  ;;  %v1926_v46 = vsel %vm1606_vm10, %v5616_v0, 0.0 }
 0x48d   : > { %v1974_v22 = vmul.f32 %v4292_v18, %v1844_v51  ;;  %3707 = vmatmul.mubr.msk.f32.gmra.mrb[46].mxu1 %vm1606_vm10, %v2081_v9  ;;  %1927 = vadd.xlane.f32.xlu0 %v1926_v46  ;;  %v4294_v45 = vpop.eup %4293 }
 0x48e   : > { %3709 = vmatprep.mubr.msk.f32.mxu1 %vm4365_vm4, %v5964_v47  ;;  %v1976_v52 = vmul.f32 %v4294_v45, %v1850_v30 }
 0x48f   : > { %v2010_v37 = vsub.f32 2.0, %v1974_v22 }
 0x490   : > { %v2012_v34 = vsub.f32 2.0, %v1976_v52 }
 0x491   : > { %v2046_v2 = vmul.f32 %v4292_v18, %v2010_v37 }
 0x492   : > { %v2048_v51 = vmul.f32 %v4294_v45, %v2012_v34 }
 0x493   : > { %v5624_v31 = vpop.eup %4295  ;;  %v2082_v33 = vmul.f32 %v5435_v63, %v2046_v2 }
 0x494   : > { %v4298_v42 = vpop.eup %4297  ;;  %v1929_v35 = vsel %vm1631_vm11, %v5624_v31, 0.0  ;;  %v2084_v63 = vmul.f32 %v5439_v8, %v2048_v51  ;;  %v4188_v8 = vunpack.i.h.bf16 %v5358_v29  ;;  %v4207_v29 = vunpack.i.l.bf16 %v5456_v39 }
 0x495   : > { %v1975_v53 = vmul.f32 %v4298_v42, %v1847_v17  ;;  %3710 = vmatmul.mubr.msk.f32.gmra.mrb[48].mxu1 %vm1606_vm10, %v2082_v33  ;;  %1930 = vadd.xlane.f32.xlu0 %v1929_v35  ;;  %v4198_v17 = vunpack.i.h.bf16 %v5362_v27 }
 0x496   : > { %3712 = vmatprep.mubr.msk.f32.mxu1 %vm4365_vm4, %v5964_v47  ;;  %v4016_v9 = vpack.c.bf16 %v4208_v60, %v4207_v29 }
 0x497   : > { %v2011_v38 = vsub.f32 2.0, %v1975_v53 }
 0x499   : > { %v2047_v24 = vmul.f32 %v4298_v42, %v2011_v38 }
 0x49a   : > { %v1853_v58 = vpop.xlane.xlu1 %1852 }
 0x49b   : > { %v2083_v3 = vmul.f32 %v5447_v14, %v2047_v24  ;;  %4299 = vrcp.f32 %v1853_v58  ;;  %v4177_v14 = vunpack.i.l.bf16 %v5352_v40  ;;  %v4010_v40 = vpack.c.bf16 %v4188_v8, %v4187_v1 }
 0x49d   : > { %3713 = vmatmul.mubr.msk.f32.gmra.mrb[50].mxu1 %vm1606_vm10, %v2083_v3  ;;  %v4007_v44 = vpack.c.bf16 %v4178_v26, %v4177_v14 }
 0x49e   : > { %3715 = vmatprep.mubr.msk.f32.mxu1 %vm4365_vm4, %v5964_v47 }
 0x4a1   : > { %3716 = vmatmul.mubr.msk.f32.gmra.mrb[52].mxu1 %vm1606_vm10, %v2084_v63 }
 0x4a2   : > { %3781 = vmatprep.mubr.msk.f32.mxu1 %vm4365_vm4, %v5964_v47 }
 0x4a5   : > { %v4300_v30 = vpop.eup %4299 }
 0x4a6   : > { %v1977_v20 = vmul.f32 %v4300_v30, %v1853_v58 }
 0x4a8   : > { %v2013_v4 = vsub.f32 2.0, %v1977_v20 }
 0x4aa   : > { %v2049_v50 = vmul.f32 %v4300_v30, %v2013_v4 }
 0x4ab   : > { %2623 = vrot.lane.b32.xlu0 %v5059_v25, %s4364_s20  ;;  %v4197_v25 = vunpack.i.l.bf16 %v5362_v27  ;;  %s4370_s20 = smov 8  }
 0x4ac   : > { %v2085_v11 = vmul.f32 %v5452_v61, %v2049_v50 }
 0x4ad   : > { %v4013_v61 = vpack.c.bf16 %v4198_v17, %v4197_v25 }
 0x4ae   : > { %3737 = vmatmul.mubr.msk.f32.vlgmr.msra.gmra.mrb[54].mxu0 %vm1606_vm10, %v2085_v11 }
 0x4af   : > { %4008 = vmatpush3.bf16.msra.mxu0 %v4007_v44  ;;  %3739 = vmatprep.mubr.msk.f32.mxu0 %vm4365_vm4, %v5964_v47 }
 0x4b0   : > { %4009 = vmatprep.subr.bf16.mxu0 %v5965_v55 }
 0x4b3   : > { %4011 = vmatpush3.bf16.msra.mxu0 %v4010_v40 }
 0x4b4   : > { %4012 = vmatprep.subr.bf16.mxu0 %v5965_v55 }
 0x4b7   : > { %4014 = vmatpush3.bf16.msra.mxu0 %v4013_v61 }
 0x4b8   : > { %4015 = vmatprep.subr.bf16.mxu0 %v5965_v55 }
 0x4bb   : > { %4017 = vmatpush3.bf16.msra.mxu0 %v4016_v9 }
 0x4bc   : > { %3824 = vmatprep.subr.mxu0 %v5964_v47 }
 0x4cf   : > { %v5658_v18 = vpop.xlane.xlu1 %1879 }
 0x4d3   : > { %v1856_v46 = vpop.xlane.xlu1 %1855 }
 0x4d4   : > { %4301 = vrcp.f32 %v1856_v46 }
 0x4d7   : > { %v5660_v27 = vpop.xlane.xlu0 %1885  ;;  %v5662_v22 = vpop.xlane.xlu1 %1882 }
 0x4db   : > { %v5664_v37 = vpop.xlane.xlu0 %1888  ;;  %v1859_v45 = vpop.xlane.xlu1 %1858 }
 0x4dc   : > { %4303 = vrcp.f32 %v1859_v45 }
 0x4de   : > { %v4302_v39 = vpop.eup %4301 }
 0x4df   : > { %v1978_v2 = vmul.f32 %v4302_v39, %v1856_v46  ;;  %v1865_v52 = vpop.xlane.xlu0 %1864  ;;  %v1862_v33 = vpop.xlane.xlu1 %1861 }
 0x4e0   : > { %4305 = vrcp.f32 %v1865_v52 }
 0x4e1   : > { %v2014_v42 = vsub.f32 2.0, %v1978_v2  ;;  %4307 = vrcp.f32 %v1862_v33 }
 0x4e3   : > { %v2050_v35 = vmul.f32 %v4302_v39, %v2014_v42  ;;  %v1868_v53 = vpop.xlane.xlu0 %1867  ;;  %v5666_v34 = vpop.xlane.xlu1 %1891 }
 0x4e4   : > { %4309 = vrcp.f32 %v1868_v53 }
 0x4e5   : > { %v2086_v38 = vmul.f32 %v5473_v41, %v2050_v35 }
 0x4e6   : > { %v4304_v24 = vpop.eup %4303 }
 0x4e7   : > { %v1871_v51 = vpop.xlane.xlu0 %1870  ;;  %3740 = vmatmul.mubr.msk.f32.gmra.mrb[56].mxu0 %vm1606_vm10, %v2086_v38  ;;  %v1979_v3 = vmul.f32 %v4304_v24, %v1859_v45  ;;  %v5672_v58 = vpop.xlane.xlu1 %1894 }
 0x4e8   : > { %4311 = vrcp.f32 %v1871_v51  ;;  %3742 = vmatprep.mubr.msk.f32.mxu0 %vm4365_vm4, %v5964_v47 }
 0x4e9   : > { %v2015_v30 = vsub.f32 2.0, %v1979_v3  ;;  %4313 = vrcp.f32 %v5658_v18 }
 0x4ea   : > { %v4306_v63 = vpop.eup %4305 }
 0x4eb   : > { %v4308_v20 = vpop.eup %4307  ;;  %v1981_v4 = vmul.f32 %v4306_v63, %v1865_v52  ;;  %v1874_v26 = vpop.xlane.xlu0 %1873  ;;  %v2051_v14 = vmul.f32 %v4304_v24, %v2015_v30 }
 0x4ec   : > { %v1980_v41 = vmul.f32 %v4308_v20, %v1862_v33  ;;  %4315 = vrcp.f32 %v1874_v26  ;;  %v5677_v40 = vpop.xlane.xlu1 %1897 }
 0x4ed   : > { %v2087_v11 = vmul.f32 %v5489_v6, %v2051_v14  ;;  %v2017_v44 = vsub.f32 2.0, %v1981_v4  ;;  %4317 = vrcp.f32 %v5662_v22 }
 0x4ee   : > { %v4310_v50 = vpop.eup %4309  ;;  %v2016_v8 = vsub.f32 2.0, %v1980_v41 }
 0x4ef   : > { %v1982_v1 = vmul.f32 %v4310_v50, %v1868_v53  ;;  %v1877_v17 = vpop.xlane.xlu0 %1876  ;;  %3743 = vmatmul.mubr.msk.f32.gmra.mrb[58].mxu0 %vm1606_vm10, %v2087_v11  ;;  %v2053_v60 = vmul.f32 %v4306_v63, %v2017_v44 }
 0x4f0   : > { %v2052_v25 = vmul.f32 %v4308_v20, %v2016_v8  ;;  %4319 = vrcp.f32 %v1877_v17  ;;  %3745 = vmatprep.mubr.msk.f32.mxu0 %vm4365_vm4, %v5964_v47  ;;  %v5685_v45 = vpop.xlane.xlu1 %1900 }
 0x4f1   : > { %v2018_v6 = vsub.f32 2.0, %v1982_v1  ;;  %4321 = vrcp.f32 %v5660_v27  ;;  %v2089_v2 = vmul.f32 %v5501_v56, %v2053_v60 }
 0x4f2   : > { %v4312_v61 = vpop.eup %4311  ;;  %v2088_v29 = vmul.f32 %v5495_v16, %v2052_v25  ;;  %4323 = vrcp.f32 %v5664_v37 }
 0x4f3   : > { %v1983_v9 = vmul.f32 %v4312_v61, %v1871_v51  ;;  %v4314_v46 = vpop.eup %4313  ;;  %v2054_v52 = vmul.f32 %v4310_v50, %v2018_v6  ;;  %4325 = vrcp.f32 %v5666_v34  ;;  %v1904_v25 = vpop.xlane.xlu0 %1903 }
 0x4f4   : > { %3746 = vmatmul.mubr.msk.f32.gmra.mrb[60].mxu0 %vm1606_vm10, %v2088_v29  ;;  %v1986_v35 = vmul.f32 %v4314_v46, %v5658_v18  ;;  %4327 = vrcp.f32 %v5672_v58 }
 0x4f5   : > { %3748 = vmatprep.mubr.msk.f32.mxu0 %vm4365_vm4, %v5964_v47  ;;  %v2019_v33 = vsub.f32 2.0, %v1983_v9  ;;  %v2090_v24 = vmul.f32 %v5504_v54, %v2054_v52  ;;  %4329 = vrcp.f32 %v5677_v40 }
 0x4f6   : > { %v4316_v39 = vpop.eup %4315  ;;  %v2022_v63 = vsub.f32 2.0, %v1986_v35  ;;  %4331 = vrcp.f32 %v5685_v45 }
 0x4f7   : > { %v1984_v42 = vmul.f32 %v4316_v39, %v1874_v26  ;;  %v4318_v16 = vpop.eup %4317  ;;  %v2055_v51 = vmul.f32 %v4312_v61, %v2019_v33  ;;  %4333 = vrcp.f32 %v1904_v25 }
 0x4f8   : > { %3749 = vmatmul.mubr.msk.f32.gmra.mrb[62].mxu0 %vm1606_vm10, %v2089_v2  ;;  %v1987_v30 = vmul.f32 %v4318_v16, %v5662_v22  ;;  %v2058_v14 = vmul.f32 %v4314_v46, %v2022_v63 }
 0x4f9   : > { %3751 = vmatprep.mubr.msk.f32.mxu0 %vm4365_vm4, %v5964_v47  ;;  %v2020_v56 = vsub.f32 2.0, %v1984_v42  ;;  %v2091_v4 = vmul.f32 %v5513_v5, %v2055_v51 }
 0x4fa   : > { %v5695_v53 = vpop.xlane.xlu1 %1909  ;;  %v4320_v38 = vpop.eup %4319  ;;  %v2023_v50 = vsub.f32 2.0, %v1987_v30  ;;  %v2094_v5 = vmul.f32 %v5469_v48, %v2058_v14 }
 0x4fb   : > { %v1985_v3 = vmul.f32 %v4320_v38, %v1877_v17  ;;  %v4322_v20 = vpop.eup %4321  ;;  %v2056_v26 = vmul.f32 %v4316_v39, %v2020_v56 }
 0x4fc   : > { %3752 = vmatmul.mubr.msk.f32.gmra.mrb[64].mxu0 %vm1606_vm10, %v2090_v24  ;;  %v1988_v41 = vmul.f32 %v4322_v20, %v5660_v27  ;;  %v4324_v11 = vpop.eup %4323  ;;  %v2059_v17 = vmul.f32 %v4318_v16, %v2023_v50 }
 0x4fd   : > { %3754 = vmatprep.mubr.msk.f32.mxu0 %vm4365_vm4, %v5964_v47  ;;  %v2021_v54 = vsub.f32 2.0, %v1985_v3  ;;  %v2092_v44 = vmul.f32 %v5522_v15, %v2056_v26  ;;  %v1989_v27 = vmul.f32 %v4324_v11, %v5664_v37  ;;  %v4326_v60 = vpop.eup %4325 }
 0x4fe   : > { %v5703_v18 = vpop.xlane.xlu1 %1912  ;;  %v2024_v1 = vsub.f32 2.0, %v1988_v41  ;;  %v2095_v15 = vmul.f32 %v5479_v36, %v2059_v17  ;;  %v1990_v6 = vmul.f32 %v4326_v60, %v5666_v34  ;;  %v4328_v9 = vpop.eup %4327 }
 0x4ff   : > { %v2057_v8 = vmul.f32 %v4320_v38, %v2021_v54  ;;  %v2025_v37 = vsub.f32 2.0, %v1989_v27  ;;  %v1991_v36 = vmul.f32 %v4328_v9, %v5672_v58  ;;  %v4330_v52 = vpop.eup %4329 }
 0x500   : > { %3755 = vmatmul.mubr.msk.f32.gmra.mrb[66].mxu0 %vm1606_vm10, %v2091_v4  ;;  %v2060_v48 = vmul.f32 %v4322_v20, %v2024_v1  ;;  %v2026_v2 = vsub.f32 2.0, %v1990_v6  ;;  %v4332_v35 = vpop.eup %4331 }
 0x501   : > { %3757 = vmatprep.mubr.msk.f32.mxu0 %vm4365_vm4, %v5964_v47  ;;  %v2093_v29 = vmul.f32 %v5531_v43, %v2057_v8  ;;  %v1907_v43 = vpop.xlane.xlu0 %1906  ;;  %v2061_v39 = vmul.f32 %v4324_v11, %v2025_v37  ;;  %v2027_v16 = vsub.f32 2.0, %v1991_v36  ;;  %v4334_v58 = vpop.eup %4333  ;;  %v1993_v56 = vmul.f32 %v4332_v35, %v5685_v45 }
 0x502   : > { %v5711_v22 = vpop.xlane.xlu1 %1915  ;;  %4335 = vrcp.f32 %v1907_v43  ;;  %v2096_v46 = vmul.f32 %v5483_v57, %v2060_v48  ;;  %v2062_v42 = vmul.f32 %v4326_v60, %v2026_v2  ;;  %v1992_v57 = vmul.f32 %v4330_v52, %v5677_v40 }
 0x503   : > { %4337 = vrcp.f32 %v5695_v53  ;;  %v2097_v33 = vmul.f32 %v5493_v12, %v2061_v39  ;;  %v2063_v24 = vmul.f32 %v4328_v9, %v2027_v16  ;;  %v1994_v40 = vmul.f32 %v4334_v58, %v1904_v25 }
 0x504   : > { %3758 = vmatmul.mubr.msk.f32.gmra.mrb[68].mxu0 %vm1606_vm10, %v2092_v44  ;;  %4339 = vrcp.f32 %v5703_v18  ;;  %v2098_v38 = vmul.f32 %v5510_v13, %v2062_v42  ;;  %v2028_v51 = vsub.f32 2.0, %v1992_v57  ;;  %v2029_v20 = vsub.f32 2.0, %v1993_v56 }
 0x505   : > { %3760 = vmatprep.mubr.msk.f32.mxu0 %vm4365_vm4, %v5964_v47  ;;  %4341 = vrcp.f32 %v5711_v22  ;;  %v2099_v63 = vmul.f32 %v5519_v19, %v2063_v24  ;;  %v2030_v45 = vsub.f32 2.0, %v1994_v40 }
 0x506   : > { %v2459_v61 = vpop.permute.xlu1 %2458  ;;  %v5737_v34 = vpop.xlane.xlu0 %1918  ;;  %v2064_v30 = vmul.f32 %v4330_v52, %v2028_v51  ;;  %v2065_v14 = vmul.f32 %v4332_v35, %v2029_v20 }
 0x507   : > { %3780 = vmatpush3.msk.msra.mxu1 %vm727_vm7, %v2459_v61  ;;  %4343 = vrcp.f32 %v5737_v34  ;;  %v2066_v44 = vmul.f32 %v4334_v58, %v2030_v45 }
 0x508   : > { %3782 = vmatmul.mubr.msk.f32.vlgmr.msra.gmra.mrb[54].mxu1 %vm1606_vm10, %v2094_v5  ;;  %4024 = vmatprep.subr.bf16.mxu1 %v5965_v55  ;;  %v2100_v54 = vmul.f32 %v5528_v62, %v2064_v30  ;;  %v2101_v8 = vmul.f32 %v5537_v32, %v2065_v14 }
 0x509   : > { %3761 = vmatmul.mubr.msk.f32.gmra.mrb[70].mxu0 %vm1606_vm10, %v2093_v29  ;;  %3784 = vmatprep.mubr.msk.f32.mxu1 %vm4365_vm4, %v5964_v47 }
 0x50a   : > { %3826 = vmatprep.mubr.msk.f32.mxu0 %vm4365_vm4, %v5964_v47  ;;  %v1922_v12 = vpop.xlane.xlu0 %1921 }
 0x50b   : > { %4345 = vrcp.f32 %v1922_v12 }
 0x50c   : > { %3785 = vmatmul.mubr.msk.f32.gmra.mrb[56].mxu1 %vm1606_vm10, %v2095_v15  ;;  %v4336_v3 = vpop.eup %4335 }
 0x50d   : > { %3787 = vmatprep.mubr.msk.f32.mxu1 %vm4365_vm4, %v5964_v47  ;;  %v1995_v4 = vmul.f32 %v4336_v3, %v1907_v43  ;;  %v4338_v26 = vpop.eup %4337 }
 0x50e   : > { %v1996_v50 = vmul.f32 %v4338_v26, %v5695_v53  ;;  %v4340_v11 = vpop.eup %4339  ;;  %v2102_v53 = vmul.f32 %v5544_v10, %v2066_v44  ;;  %v5966_v10 = vld [vmem:[#allocation3_spill] sm:$0xff] }
 0x50f   : > { %v2031_v41 = vsub.f32 2.0, %v1995_v4  ;;  %v1997_v17 = vmul.f32 %v4340_v11, %v5703_v18  ;;  %v4342_v27 = vpop.eup %4341 }
 0x510   : > { %3788 = vmatmul.mubr.msk.f32.gmra.mrb[58].mxu1 %vm1606_vm10, %v2096_v46  ;;  %v2032_v1 = vsub.f32 2.0, %v1996_v50  ;;  %v1998_v32 = vmul.f32 %v4342_v27, %v5711_v22 }
 0x511   : > { %3790 = vmatprep.mubr.msk.f32.mxu1 %vm4365_vm4, %v5964_v47  ;;  %v2067_v5 = vmul.f32 %v4336_v3, %v2031_v41  ;;  %v2033_v60 = vsub.f32 2.0, %v1997_v17  ;;  %v4344_v48 = vpop.eup %4343 }
 0x512   : > { %v1925_v13 = vpop.xlane.xlu0 %1924  ;;  %v2068_v61 = vmul.f32 %v4338_v26, %v2032_v1  ;;  %v2034_v15 = vsub.f32 2.0, %v1998_v32  ;;  %v1999_v22 = vmul.f32 %v4344_v48, %v5737_v34 }
 0x513   : > { %4347 = vrcp.f32 %v1925_v13  ;;  %v2103_v25 = vmul.f32 %v5549_v7, %v2067_v5  ;;  %v2069_v18 = vmul.f32 %v4340_v11, %v2033_v60 }
 0x514   : > { %3791 = vmatmul.mubr.msk.f32.gmra.mrb[60].mxu1 %vm1606_vm10, %v2097_v33  ;;  %v2104_v7 = vmul.f32 %v5966_v10, %v2068_v61  ;;  %v2070_v43 = vmul.f32 %v4342_v27, %v2034_v15  ;;  %v2035_v9 = vsub.f32 2.0, %v1999_v22  ;;  %v2910_v10 = vld [vmem:[%s5953_s5 + $0x8] sm:$0xff] }
 0x515   : > { %3793 = vmatprep.mubr.msk.f32.mxu1 %vm4365_vm4, %v5964_v47  ;;  %v4346_v37 = vpop.eup %4345  ;;  %v2105_v6 = vmul.f32 %v5561_v23, %v2069_v18 }
 0x516   : > { %v2000_v46 = vmul.f32 %v4346_v37, %v1922_v12  ;;  %v2106_v2 = vmul.f32 %v5569_v49, %v2070_v43  ;;  %v2071_v36 = vmul.f32 %v4344_v48, %v2035_v9  ;;  %v2909_v48 = vld [vmem:[%s5953_s5] sm:$0xff] }
 0x517   : > { %v4019_v18 = vpack.c.bf16 %v2910_v10, %v2909_v48 }
 0x518   : > { %3794 = vmatmul.mubr.msk.f32.gmra.mrb[62].mxu1 %vm1606_vm10, %v2098_v38  ;;  %v2036_v52 = vsub.f32 2.0, %v2000_v46  ;;  %v2107_v23 = vmul.f32 %v5581_v28, %v2071_v36 }
 0x519   : > { %3796 = vmatprep.mubr.msk.f32.mxu1 %vm4365_vm4, %v5964_v47  ;;  %4026 = vmatpush3.bf16.msra.mxu1 %v4019_v18 }
 0x51a   : > { %v1928_v19 = vpop.xlane.xlu0 %1927  ;;  %v2072_v42 = vmul.f32 %v4346_v37, %v2036_v52  ;;  %4025 = vmatprep.subr.bf16.mxu1 %v5965_v55 }
 0x51b   : > { %4349 = vrcp.f32 %v1928_v19 }
 0x51c   : > { %3797 = vmatmul.mubr.msk.f32.gmra.mrb[64].mxu1 %vm1606_vm10, %v2099_v63  ;;  %v2108_v49 = vmul.f32 %v5592_v21, %v2072_v42 }
 0x51d   : > { %3799 = vmatprep.mubr.msk.f32.mxu1 %vm4365_vm4, %v5964_v47  ;;  %v4348_v39 = vpop.eup %4347 }
 0x51e   : > { %v2001_v34 = vmul.f32 %v4348_v39, %v1925_v13 }
 0x520   : > { %3800 = vmatmul.mubr.msk.f32.gmra.mrb[66].mxu1 %vm1606_vm10, %v2100_v54  ;;  %v2037_v16 = vsub.f32 2.0, %v2001_v34 }
 0x521   : > { %3802 = vmatprep.mubr.msk.f32.mxu1 %vm4365_vm4, %v5964_v47 }
 0x522   : > { %v1931_v62 = vpop.xlane.xlu0 %1930  ;;  %v2073_v58 = vmul.f32 %v4348_v39, %v2037_v16 }
 0x523   : > { %4351 = vrcp.f32 %v1931_v62 }
 0x524   : > { %3803 = vmatmul.mubr.msk.f32.gmra.mrb[68].mxu1 %vm1606_vm10, %v2101_v8  ;;  %v2109_v28 = vmul.f32 %v5605_v59, %v2073_v58 }
 0x525   : > { %3805 = vmatprep.mubr.msk.f32.mxu1 %vm4365_vm4, %v5964_v47  ;;  %v4350_v33 = vpop.eup %4349 }
 0x526   : > { %v2624_v29 = vpop.permute.xlu0 %2623  ;;  %v2002_v57 = vmul.f32 %v4350_v33, %v1928_v19 }
 0x527   : > { %3825 = vmatpush3.msk.msra.mxu0 %vm727_vm7, %v2624_v29 }
 0x528   : > { %3806 = vmatmul.mubr.msk.f32.gmra.mrb[70].mxu1 %vm1606_vm10, %v2102_v53  ;;  %3827 = vmatmul.mubr.msk.f32.vlgmr.msra.gmra.mrb[72].mxu0 %vm1606_vm10, %v2103_v25  ;;  %v2038_v38 = vsub.f32 2.0, %v2002_v57 }
 0x529   : > { %3829 = vmatprep.mubr.msk.f32.mxu0 %vm4365_vm4, %v5964_v47  ;;  %4018 = vmatprep.subr.bf16.mxu0 %v5965_v55 }
 0x52a   : > { %3864 = vmatprep.mubr.msk.f32.mxu1 %vm4365_vm4, %v5964_v47  ;;  %v2074_v51 = vmul.f32 %v4350_v33, %v2038_v38  ;;  %4020 = vmatpush3.bf16.msra.mxu0 %v4019_v18  ;;  %v2912_v33 = vld [vmem:[%s5953_s5 + $0x18] sm:$0xff] }
 0x52b   : > { %4021 = vmatprep.subr.bf16.mxu0 %v5965_v55  ;;  %v2911_v55 = vld [vmem:[%s5953_s5 + $0x10] sm:$0xff] }
 0x52c   : > { %3830 = vmatmul.mubr.msk.f32.gmra.mrb[74].mxu0 %vm1606_vm10, %v2104_v7  ;;  %v2110_v12 = vmul.f32 %v5616_v0, %v2074_v51  ;;  %v4022_v42 = vpack.c.bf16 %v2912_v33, %v2911_v55 }
 0x52d   : > { %3832 = vmatprep.mubr.msk.f32.mxu0 %vm4365_vm4, %v5964_v47  ;;  %v4352_v35 = vpop.eup %4351 }
 0x52e   : > { %v2003_v24 = vmul.f32 %v4352_v35, %v1931_v62  ;;  %4027 = vmatpush3.bf16.msra.mxu1 %v4022_v42  ;;  %4023 = vmatpush3.bf16.msra.mxu0 %v4022_v42 }
 0x530   : > { %3833 = vmatmul.mubr.msk.f32.gmra.mrb[76].mxu0 %vm1606_vm10, %v2105_v6  ;;  %v2039_v56 = vsub.f32 2.0, %v2003_v24 }
 0x531   : > { %3835 = vmatprep.mubr.msk.f32.mxu0 %vm4365_vm4, %v5964_v47 }
 0x532   : > { %v2075_v21 = vmul.f32 %v4352_v35, %v2039_v56 }
 0x534   : > { %3836 = vmatmul.mubr.msk.f32.gmra.mrb[78].mxu0 %vm1606_vm10, %v2106_v2  ;;  %v2111_v40 = vmul.f32 %v5624_v31, %v2075_v21 }
 0x535   : > { %3838 = vmatprep.mubr.msk.f32.mxu0 %vm4365_vm4, %v5964_v47 }
 0x538   : > { %3839 = vmatmul.mubr.msk.f32.gmra.mrb[80].mxu0 %vm1606_vm10, %v2107_v23 }
 0x539   : > { %3841 = vmatprep.mubr.msk.f32.mxu0 %vm4365_vm4, %v5964_v47 }
 0x53c   : > { %3842 = vmatmul.mubr.msk.f32.gmra.mrb[82].mxu0 %vm1606_vm10, %v2108_v49 }
 0x53d   : > { %3844 = vmatprep.mubr.msk.f32.mxu0 %vm4365_vm4, %v5964_v47 }
 0x540   : > { %3845 = vmatmul.mubr.msk.f32.gmra.mrb[84].mxu0 %vm1606_vm10, %v2109_v28 }
 0x541   : > { %3847 = vmatprep.mubr.msk.f32.mxu0 %vm4365_vm4, %v5964_v47 }
 0x544   : > { %3848 = vmatmul.mubr.msk.f32.gmra.mrb[86].mxu0 %vm1606_vm10, %v2110_v12  ;;  %v5808_v3 = vpop.f32.mrb[36].mxu1 }
 0x545   : > { %3850 = vmatprep.mubr.msk.f32.mxu0 %vm4365_vm4, %v5964_v47  ;;  %v3693_v59 = vpop.f32.mrb[37].mxu1 }
 0x548   : > { %3851 = vmatmul.mubr.msk.f32.gmra.mrb[88].mxu0 %vm1606_vm10, %v2111_v40  ;;  %v5814_v63 = vpop.f32.mrb[38].mxu1 }
 0x549   : > { %3861 = vmatprep.mubr.msk.f32.mxu0 %vm4365_vm4, %v5964_v47  ;;  %v3696_v30 = vpop.f32.mrb[39].mxu1 }
 0x54c   : > { %v5818_v0 = vpop.f32.mrb[40].mxu1 }
 0x54d   : > { %v3699_v20 = vpop.f32.mrb[41].mxu1 }
 0x550   : > { %v5820_v4 = vpop.f32.mrb[42].mxu1 }
 0x551   : > { %v3702_v13 = vpop.f32.mrb[43].mxu1 }
 0x558   : > { %v5822_v26 = vpop.f32.mrb[44].mxu1 }
 0x559   : > { %v3705_v45 = vpop.f32.mrb[45].mxu1 }
 0x560   : > { %v5824_v54 = vpop.f32.mrb[46].mxu1 }
 0x561   : > { %v3708_v31 = vpop.f32.mrb[47].mxu1 }
 0x568   : > { %v5826_v14 = vpop.f32.mrb[48].mxu1 }
 0x569   : > { %v3711_v41 = vpop.f32.mrb[49].mxu1 }
 0x570   : > { %v5828_v50 = vpop.f32.mrb[50].mxu1 }
 0x571   : > { %v3714_v19 = vpop.f32.mrb[51].mxu1 }
 0x574   : > { %v5830_v11 = vpop.f32.mrb[52].mxu1 }
 0x575   : > { %v3717_v44 = vpop.f32.mrb[53].mxu1 }
 0x581   : > { %v5832_v8 = vpop.f32.mrb[54].mxu0 }
 0x582   : > { %v3738_v5 = vpop.f32.mrb[55].mxu0 }
 0x5ba   : > { %v2403_v1 = vpop.f32.mrb[56].mxu0 }
 0x5bb   : > { %2783 = vrot.lane.b32.xlu1 %v2403_v1, %s4370_s20  ;;  %v3741_v17 = vpop.f32.mrb[57].mxu0 }
 0x5c2   : > { %v2408_v62 = vpop.f32.mrb[58].mxu0 }
 0x5c3   : > { %2785 = vrot.lane.b32.xlu0 %v2408_v62, %s4370_s20  ;;  %v3744_v27 = vpop.f32.mrb[59].mxu0 }
 0x5c7   : > { %v2413_v53 = vpop.f32.mrb[60].mxu0 }
 0x5c8   : > { %v3747_v25 = vpop.f32.mrb[61].mxu0 }
 0x5cb   : > { %v2418_v61 = vpop.f32.mrb[62].mxu0 }
 0x5cc   : > { %v3750_v60 = vpop.f32.mrb[63].mxu0 }
 0x5cf   : > { %v2423_v32 = vpop.f32.mrb[64].mxu0 }
 0x5d0   : > { %v3753_v29 = vpop.f32.mrb[65].mxu0 }
 0x5d3   : > { %v2428_v7 = vpop.f32.mrb[66].mxu0 }
 0x5d4   : > { %v3756_v15 = vpop.f32.mrb[67].mxu0 }
 0x5d7   : > { %v2433_v22 = vpop.f32.mrb[68].mxu0 }
 0x5d8   : > { %v3759_v37 = vpop.f32.mrb[69].mxu0 }
 0x5db   : > { %v2563_v6 = vpop.f32.mrb[54].mxu1 }
 0x5dc   : > { %v2438_v43 = vpop.f32.mrb[70].mxu0  ;;  %v3783_v9 = vpop.f32.mrb[55].mxu1 }
 0x5dd   : > { %v3762_v46 = vpop.f32.mrb[71].mxu0 }
 0x5df   : > { %v2568_v39 = vpop.f32.mrb[56].mxu1 }
 0x5e0   : > { %v3786_v2 = vpop.f32.mrb[57].mxu1  ;;  %2819 = vrot.lane.b32.xlu1 %v2568_v39, %s4371_s11 }
 0x5e3   : > { %v2573_v36 = vpop.f32.mrb[58].mxu1 }
 0x5e4   : > { %v3789_v52 = vpop.f32.mrb[59].mxu1  ;;  %2821 = vrot.lane.b32.xlu1 %v2573_v36, %s4371_s11 }
 0x5e7   : > { %v2578_v34 = vpop.f32.mrb[60].mxu1 }
 0x5e8   : > { %v3792_v23 = vpop.f32.mrb[61].mxu1  ;;  %2823 = vrot.lane.b32.xlu0 %v2578_v34, %s4371_s11  ;;  %2787 = vrot.lane.b32.xlu1 %v2413_v53, %s4370_s20 }
 0x5eb   : > { %v2583_v16 = vpop.f32.mrb[62].mxu1 }
 0x5ec   : > { %v3795_v57 = vpop.f32.mrb[63].mxu1  ;;  %2825 = vrot.lane.b32.xlu1 %v2583_v16, %s4371_s11  ;;  %2789 = vrot.lane.b32.xlu0 %v2418_v61, %s4370_s20 }
 0x5ef   : > { %v2588_v35 = vpop.f32.mrb[64].mxu1 }
 0x5f0   : > { %v3798_v49 = vpop.f32.mrb[65].mxu1  ;;  %2827 = vrot.lane.b32.xlu0 %v2588_v35, %s4371_s11  ;;  %2791 = vrot.lane.b32.xlu1 %v2423_v32, %s4370_s20 }
 0x5f3   : > { %v2593_v58 = vpop.f32.mrb[66].mxu1 }
 0x5f4   : > { %v3801_v38 = vpop.f32.mrb[67].mxu1  ;;  %2829 = vrot.lane.b32.xlu1 %v2593_v58, %s4371_s11  ;;  %2793 = vrot.lane.b32.xlu0 %v2428_v7, %s4370_s20 }
 0x5f7   : > { %v2598_v24 = vpop.f32.mrb[68].mxu1 }
 0x5f8   : > { %v3804_v28 = vpop.f32.mrb[69].mxu1 }
 0x5fb   : > { %v2603_v51 = vpop.f32.mrb[70].mxu1  ;;  %v2728_v56 = vpop.f32.mrb[72].mxu0 }
 0x5fc   : > { %v3807_v12 = vpop.f32.mrb[71].mxu1  ;;  %v3828_v21 = vpop.f32.mrb[73].mxu0 }
 0x5ff   : > { %v2733_v40 = vpop.f32.mrb[74].mxu0 }
 0x600   : > { %2855 = vrot.lane.b32.xlu1 %v2733_v40, %s4372_s15  ;;  %v3831_v59 = vpop.f32.mrb[75].mxu0 }
 0x603   : > { %v2738_v30 = vpop.f32.mrb[76].mxu0 }
 0x604   : > { %2795 = vrot.lane.b32.xlu1 %v2433_v22, %s4370_s20  ;;  %2857 = vrot.lane.b32.xlu0 %v2738_v30, %s4372_s15  ;;  %v3834_v20 = vpop.f32.mrb[77].mxu0 }
 0x607   : > { %v2743_v13 = vpop.f32.mrb[78].mxu0 }
 0x608   : > { %2831 = vrot.lane.b32.xlu0 %v2598_v24, %s4371_s11  ;;  %2859 = vrot.lane.b32.xlu1 %v2743_v13, %s4372_s15  ;;  %v3837_v45 = vpop.f32.mrb[79].mxu0 }
 0x60b   : > { %v2748_v31 = vpop.f32.mrb[80].mxu0 }
 0x60c   : > { %2797 = vrot.lane.b32.xlu1 %v2438_v43, %s4370_s20  ;;  %2861 = vrot.lane.b32.xlu0 %v2748_v31, %s4372_s15  ;;  %v3840_v41 = vpop.f32.mrb[81].mxu0 }
 0x60f   : > { %v2753_v19 = vpop.f32.mrb[82].mxu0 }
 0x610   : > { %2781 = vrot.lane.b32.xlu0 %v5832_v8, %s4370_s20  ;;  %2863 = vrot.lane.b32.xlu1 %v2753_v19, %s4372_s15  ;;  %v3843_v44 = vpop.f32.mrb[83].mxu0 }
 0x613   : > { %v2758_v5 = vpop.f32.mrb[84].mxu0 }
 0x614   : > { %2833 = vrot.lane.b32.xlu1 %v2603_v51, %s4371_s11  ;;  %2865 = vrot.lane.b32.xlu0 %v2758_v5, %s4372_s15  ;;  %v3846_v1 = vpop.f32.mrb[85].mxu0 }
 0x617   : > { %v2763_v17 = vpop.f32.mrb[86].mxu0 }
 0x618   : > { %2817 = vrot.lane.b32.xlu0 %v2563_v6, %s4371_s11  ;;  %2867 = vrot.lane.b32.xlu1 %v2763_v17, %s4372_s15  ;;  %v3849_v62 = vpop.f32.mrb[87].mxu0 }
 0x61b   : > { %v2768_v27 = vpop.f32.mrb[88].mxu0 }
 0x61c   : > { %2853 = vrot.lane.b32.xlu0 %v2728_v56, %s4372_s15  ;;  %2869 = vrot.lane.b32.xlu1 %v2768_v27, %s4372_s15  ;;  %v3852_v53 = vpop.f32.mrb[89].mxu0 }
 0x62d   : > { %v2784_v25 = vpop.permute.xlu1 %2783 }
 0x62e   : > { %v2881_v22 = vsel %vm967_vm8, %v5814_v63, %v2784_v25 }
 0x635   : > { %v2786_v8 = vpop.permute.xlu0 %2785 }
 0x636   : > { %v2882_v46 = vsel %vm967_vm8, %v5818_v0, %v2786_v8 }
 0x652   : > { %v2820_v61 = vpop.permute.xlu1 %2819 }
 0x653   : > { %v2891_v37 = vsel %vm2889_vm12, %v2881_v22, %v2820_v61 }
 0x656   : > { %v2822_v60 = vpop.permute.xlu1 %2821 }
 0x657   : > { %v2892_v39 = vsel %vm2889_vm12, %v2882_v46, %v2822_v60 }
 0x65a   : > { %v2788_v32 = vpop.permute.xlu1 %2787  ;;  %v2824_v29 = vpop.permute.xlu0 %2823 }
 0x65b   : > { %v2883_v63 = vsel %vm967_vm8, %v5820_v4, %v2788_v32 }
 0x65c   : > { %v2893_v0 = vsel %vm2889_vm12, %v2883_v63, %v2824_v29 }
 0x65e   : > { %v2826_v48 = vpop.permute.xlu1 %2825  ;;  %v2790_v10 = vpop.permute.xlu0 %2789 }
 0x65f   : > { %v2884_v33 = vsel %vm967_vm8, %v5822_v26, %v2790_v10 }
 0x660   : > { %v2894_v42 = vsel %vm2889_vm12, %v2884_v33, %v2826_v48 }
 0x662   : > { %v2792_v7 = vpop.permute.xlu1 %2791  ;;  %v2828_v18 = vpop.permute.xlu0 %2827 }
 0x663   : > { %v2885_v57 = vsel %vm967_vm8, %v5824_v54, %v2792_v7 }
 0x664   : > { %v2895_v49 = vsel %vm2889_vm12, %v2885_v57, %v2828_v18 }
 0x666   : > { %v2830_v15 = vpop.permute.xlu1 %2829  ;;  %v2794_v6 = vpop.permute.xlu0 %2793 }
 0x667   : > { %v2886_v38 = vsel %vm967_vm8, %v5826_v14, %v2794_v6 }
 0x668   : > { %v2896_v28 = vsel %vm2889_vm12, %v2886_v38, %v2830_v15 }
 0x672   : > { %v2856_v43 = vpop.permute.xlu1 %2855 }
 0x673   : > { %v2901_v9 = vsel %vm2899_vm13, %v2891_v37, %v2856_v43 }
 0x674   : > { %3865 = vmatmul.mubr.msk.f32.vlgmr.msra.gmra.mrb[72].mxu1 %vm371_vm5, %v2901_v9 }
 0x675   : > { %3867 = vmatprep.mubr.msk.f32.mxu1 %vm4365_vm4, %v5964_v47 }
 0x676   : > { %v2796_v2 = vpop.permute.xlu1 %2795  ;;  %v2858_v36 = vpop.permute.xlu0 %2857 }
 0x677   : > { %v2902_v52 = vsel %vm2899_vm13, %v2892_v39, %v2858_v36  ;;  %v2887_v12 = vsel %vm967_vm8, %v5828_v50, %v2796_v2 }
 0x678   : > { %3868 = vmatmul.mubr.msk.f32.gmra.mrb[74].mxu1 %vm371_vm5, %v2902_v52 }
 0x679   : > { %3870 = vmatprep.mubr.msk.f32.mxu1 %vm4365_vm4, %v5964_v47 }
 0x67a   : > { %v2832_v34 = vpop.permute.xlu0 %2831  ;;  %v2860_v55 = vpop.permute.xlu1 %2859 }
 0x67b   : > { %v2903_v23 = vsel %vm2899_vm13, %v2893_v0, %v2860_v55  ;;  %v2897_v14 = vsel %vm2889_vm12, %v2887_v12, %v2832_v34 }
 0x67c   : > { %3871 = vmatmul.mubr.msk.f32.gmra.mrb[76].mxu1 %vm371_vm5, %v2903_v23 }
 0x67d   : > { %3873 = vmatprep.mubr.msk.f32.mxu1 %vm4365_vm4, %v5964_v47 }
 0x67e   : > { %v2798_v4 = vpop.permute.xlu1 %2797  ;;  %v2862_v16 = vpop.permute.xlu0 %2861 }
 0x67f   : > { %v2904_v35 = vsel %vm2899_vm13, %v2894_v42, %v2862_v16  ;;  %v2888_v30 = vsel %vm967_vm8, %v5830_v11, %v2798_v4 }
 0x680   : > { %3874 = vmatmul.mubr.msk.f32.gmra.mrb[78].mxu1 %vm371_vm5, %v2904_v35 }
 0x681   : > { %3876 = vmatprep.mubr.msk.f32.mxu1 %vm4365_vm4, %v5964_v47 }
 0x682   : > { %v2782_v26 = vpop.permute.xlu0 %2781  ;;  %v2864_v58 = vpop.permute.xlu1 %2863 }
 0x683   : > { %v2905_v24 = vsel %vm2899_vm13, %v2895_v49, %v2864_v58  ;;  %v2880_v20 = vsel %vm967_vm8, %v5808_v3, %v2782_v26  ;;  %v3252_v3 = vld [vmem:[%s5954_s6] ss:$0 sm:$0xff] }
 0x684   : > { %3877 = vmatmul.mubr.msk.f32.gmra.mrb[80].mxu1 %vm371_vm5, %v2905_v24 }
 0x685   : > { %3879 = vmatprep.mubr.msk.f32.mxu1 %vm4365_vm4, %v5964_v47 }
 0x686   : > { %v2834_v54 = vpop.permute.xlu1 %2833  ;;  %v2866_v51 = vpop.permute.xlu0 %2865 }
 0x687   : > { %v2906_v56 = vsel %vm2899_vm13, %v2896_v28, %v2866_v51  ;;  %v2898_v50 = vsel %vm2889_vm12, %v2888_v30, %v2834_v54 }
 0x688   : > { %3880 = vmatmul.mubr.msk.f32.gmra.mrb[82].mxu1 %vm371_vm5, %v2906_v56 }
 0x689   : > { %3882 = vmatprep.mubr.msk.f32.mxu1 %vm4365_vm4, %v5964_v47 }
 0x68a   : > { %v2818_v21 = vpop.permute.xlu0 %2817  ;;  %v2868_v40 = vpop.permute.xlu1 %2867 }
 0x68b   : > { %v2907_v59 = vsel %vm2899_vm13, %v2897_v14, %v2868_v40  ;;  %v2890_v13 = vsel %vm2889_vm12, %v2880_v20, %v2818_v21 }
 0x68c   : > { %3883 = vmatmul.mubr.msk.f32.gmra.mrb[84].mxu1 %vm371_vm5, %v2907_v59 }
 0x68d   : > { %3885 = vmatprep.mubr.msk.f32.mxu1 %vm4365_vm4, %v5964_v47 }
 0x68e   : > { %v2854_v45 = vpop.permute.xlu0 %2853  ;;  %v2870_v31 = vpop.permute.xlu1 %2869 }
 0x68f   : > { %v2900_v41 = vsel %vm2899_vm13, %v2890_v13, %v2854_v45  ;;  %v2908_v19 = vsel %vm2899_vm13, %v2898_v50, %v2870_v31 }
 0x690   : > { %3862 = vmatmul.mubr.msk.f32.vlgmr.msra.gmra.mrb[90].mxu0 %vm371_vm5, %v2900_v41  ;;  %3886 = vmatmul.mubr.msk.f32.gmra.mrb[86].mxu1 %vm371_vm5, %v2908_v19 }
 0x747   : > { %v3018_v47 = vpop.f32.mrb[72].mxu1 }
 0x748   : > { %v3019_v11 = vadd.f32 %v3252_v3, %v3018_v47  ;;  %v3866_v44 = vpop.f32.mrb[73].mxu1 }
 0x74a   : > { %3058 = vst [vmem:[%s5934_s21 + $0x8] sm:$0xff] %v3019_v11 }
 0x74b   : > { %v3023_v5 = vpop.f32.mrb[74].mxu1 }
 0x74c   : > { %v3024_v1 = vadd.f32 %v3252_v3, %v3023_v5  ;;  %v3869_v17 = vpop.f32.mrb[75].mxu1 }
 0x74e   : > { %3059 = vst [vmem:[%s5934_s21 + $0x10] sm:$0xff] %v3024_v1 }
 0x74f   : > { %v3028_v62 = vpop.f32.mrb[76].mxu1 }
 0x750   : > { %v3029_v27 = vadd.f32 %v3252_v3, %v3028_v62  ;;  %v3872_v53 = vpop.f32.mrb[77].mxu1 }
 0x752   : > { %3060 = vst [vmem:[%s5934_s21 + $0x18] sm:$0xff] %v3029_v27 }
 0x753   : > { %v3033_v25 = vpop.f32.mrb[78].mxu1 }
 0x754   : > { %v3034_v61 = vadd.f32 %v3252_v3, %v3033_v25  ;;  %v3875_v60 = vpop.f32.mrb[79].mxu1 }
 0x756   : > { %3061 = vst [vmem:[%s5934_s21 + $0x20] sm:$0xff] %v3034_v61 }
 0x757   : > { %v3038_v8 = vpop.f32.mrb[80].mxu1 }
 0x758   : > { %v3039_v32 = vadd.f32 %v3252_v3, %v3038_v8  ;;  %v3878_v29 = vpop.f32.mrb[81].mxu1 }
 0x75a   : > { %3062 = vst [vmem:[%s5934_s21 + $0x28] sm:$0xff] %v3039_v32 }
 0x75b   : > { %v3043_v48 = vpop.f32.mrb[82].mxu1 }
 0x75c   : > { %v3044_v10 = vadd.f32 %v3252_v3, %v3043_v48  ;;  %v3881_v7 = vpop.f32.mrb[83].mxu1 }
 0x75e   : > { %3063 = vst [vmem:[%s5934_s21 + $0x30] sm:$0xff] %v3044_v10 }
 0x75f   : > { %v3048_v18 = vpop.f32.mrb[84].mxu1 }
 0x760   : > { %v3049_v15 = vadd.f32 %v3252_v3, %v3048_v18  ;;  %v3884_v22 = vpop.f32.mrb[85].mxu1 }
 0x762   : > { %3064 = vst [vmem:[%s5934_s21 + $0x38] sm:$0xff] %v3049_v15 }
 0x763   : > { %v3013_v37 = vpop.f32.mrb[90].mxu0  ;;  %v3053_v6 = vpop.f32.mrb[86].mxu1 }
 0x764   : > { %v3014_v43 = vadd.f32 %v3252_v3, %v3013_v37  ;;  %v3054_v9 = vadd.f32 %v3252_v3, %v3053_v6  ;;  %v3863_v46 = vpop.f32.mrb[91].mxu0  ;;  %v3887_v39 = vpop.f32.mrb[87].mxu1 }
 0x766   : > { %3057 = vst [vmem:[%s5934_s21] sm:$0xff] %v3014_v43  ;;  %3065 = vst [vmem:[%s5934_s21 + $0x40] sm:$0x1] %v3054_v9 }
 0x767 PF: > { %s17_s24 = sadd.s32 1, %s4359_s24  }
 0x768   : > { %p14_p4 = scmp.ge.s32.totalorder %s17_s24, 4  }
 0x76a   :  { %16 = sbr.rel (!%p14_p4) target bundleno = 1 (0x1), region = 81 }

</bundles_post_ra>
